<compile_context>
chip_gen: v7x
topology: tpu7x:2x2x1
jax: 0.10.0
libtpu: 0.0.40
codegen_flags: <defaults>
</compile_context>

<pallas_src>
import functools

import jax
import jax.numpy as jnp
from jax import lax
from jax.experimental import pallas as pl
from jax.experimental.pallas import tpu as pltpu

LANES = 128       # vreg lane width; every channel dim is zero-padded to this
FC1_PAD = 256     # fc1 output width (200) padded to a lane multiple


def _round_up(x, m):
    return ((x + m - 1) // m) * m


# ----------------------------------------------------------------------------
# Fused Pallas kernel: conv1+relu -> pool1 -> conv2+relu -> pool2 -> fc1..fc3
# ----------------------------------------------------------------------------
def _pighead_fused_kernel(x_ref, w1_ref, b1_ref, w2_ref, b2_ref,
                          fc1w_ref, fc1b_ref, fc2w_ref, fc2b_ref,
                          fc3w_ref, fc3b_ref, o_ref, s_a, s_b, *, hw, s2):
    f32 = jnp.float32
    m = hw * hw                     # lattice rows per batch element
    tail = s_a.shape[0] - m         # zero tail so every shifted read is in-bounds

    # Zero the scratch tails once per grid step (tail rows only ever feed
    # lattice points that are never consumed downstream; zeroing keeps the
    # shifted reads deterministic).
    zeros_tail = jnp.zeros((tail, LANES), f32)
    s_a[pl.ds(m, tail), :] = zeros_tail
    s_b[pl.ds(m, tail), :] = zeros_tail

    def conv2x2_relu(src, w_ref, b_ref, step):
        # y(r) = relu(b + sum_k src(r + shift_k) @ w[k]) for every lattice row r.
        shifts = (0, step, step * hw, step * hw + step)
        acc = jnp.dot(src[pl.ds(shifts[0], m), :], w_ref[0],
                      preferred_element_type=f32)
        for k in range(1, 4):
            acc = acc + jnp.dot(src[pl.ds(shifts[k], m), :], w_ref[k],
                                preferred_element_type=f32)
        return jnp.maximum(acc + b_ref[...], 0.0)

    def maxpool2x2(src, step):
        shifts = (0, step, step * hw, step * hw + step)
        r = src[pl.ds(shifts[0], m), :]
        for sh in shifts[1:]:
            r = jnp.maximum(r, src[pl.ds(sh, m), :])
        return r

    # convs(): everything stays in the two VMEM scratch slabs.
    s_a[pl.ds(0, m), :] = conv2x2_relu(x_ref, w1_ref, b1_ref, step=1)
    s_b[pl.ds(0, m), :] = maxpool2x2(s_a, step=1)   # pool1: valid at even rows
    s_a[pl.ds(0, m), :] = conv2x2_relu(s_b, w2_ref, b2_ref, step=2)
    s_b[pl.ds(0, m), :] = maxpool2x2(s_a, step=2)   # pool2: valid at rows 4*(a*hw+b)

    # x.view(-1, to_linear): gather the s2*s2 valid pool2 positions, lane-dense
    # (one 128-lane channel block per position); fc1 weights were pre-permuted
    # at init to match torch's (C, H, W) flatten order.
    rows = [s_b[pl.ds(4 * (a * hw + b), 1), :]
            for a in range(s2) for b in range(s2)]
    feat = jnp.broadcast_to(jnp.concatenate(rows, axis=1),
                            (8, s2 * s2 * LANES))

    # TODO(synk): Dropout(p=0.75) after fc1/fc2 is eval-mode identity here;
    # training-mode RNG masking is omitted (cannot match torch's RNG stream).
    h1 = jnp.maximum(
        jnp.dot(feat, fc1w_ref[...], preferred_element_type=f32) + fc1b_ref[...], 0.0)
    h2 = jnp.maximum(
        jnp.dot(h1, fc2w_ref[...], preferred_element_type=f32) + fc2b_ref[...], 0.0)
    h3 = jnp.dot(h2, fc3w_ref[...], preferred_element_type=f32) + fc3b_ref[...]
    o_ref[...] = h3.astype(o_ref.dtype)


# ----------------------------------------------------------------------------
# Wrapper (one pallas_call per forward pass)
# ----------------------------------------------------------------------------
def pighead_forward(params, x_nchw):
    """x_nchw: (N, 3, H, W) float32 -> (N, 2) logits (eval mode)."""
    n_batch, cin, h, w = x_nchw.shape
    assert h == w, "square inputs only (matches the PigHead spec)"
    hw = h
    m = hw * hw
    pad_rows = _round_up(2 * hw + 2, 8)       # >= largest static row shift
    padrows = m + pad_rows
    s2 = ((hw - 1) // 2 - 1) // 2             # final spatial size (3 for hw=16)

    # Cheap per-call layout prep: NCHW -> flat lattice (row = h*hw + w) with
    # channels in lanes, zero-padded to 128 lanes + `pad_rows` tail rows.
    x = jnp.transpose(x_nchw, (0, 2, 3, 1)).reshape(n_batch, m, cin)
    x = jnp.pad(x, ((0, 0), (0, pad_rows), (0, LANES - cin)))

    kernel = functools.partial(_pighead_fused_kernel, hw=hw, s2=s2)
    out = pl.pallas_call(
        kernel,
        out_shape=jax.ShapeDtypeStruct((n_batch, 8, LANES), jnp.float32),
        grid=(n_batch,),
        in_specs=[
            pl.BlockSpec((None, padrows, LANES), lambda n: (n, 0, 0)),   # x
            pl.BlockSpec((4, LANES, LANES), lambda n: (0, 0, 0)),        # w1 blocks
            pl.BlockSpec((1, LANES), lambda n: (0, 0)),                  # b1
            pl.BlockSpec((4, LANES, LANES), lambda n: (0, 0, 0)),        # w2 blocks
            pl.BlockSpec((1, LANES), lambda n: (0, 0)),                  # b2
            pl.BlockSpec((s2 * s2 * LANES, FC1_PAD), lambda n: (0, 0)),  # fc1_w
            pl.BlockSpec((1, FC1_PAD), lambda n: (0, 0)),                # fc1_b
            pl.BlockSpec((FC1_PAD, LANES), lambda n: (0, 0)),            # fc2_w
            pl.BlockSpec((1, LANES), lambda n: (0, 0)),                  # fc2_b
            pl.BlockSpec((LANES, LANES), lambda n: (0, 0)),              # fc3_w
            pl.BlockSpec((1, LANES), lambda n: (0, 0)),                  # fc3_b
        ],
        out_specs=pl.BlockSpec((None, 8, LANES), lambda n: (n, 0, 0)),
        scratch_shapes=[pltpu.VMEM((padrows, LANES), jnp.float32),
                        pltpu.VMEM((padrows, LANES), jnp.float32)],
        compiler_params=pltpu.CompilerParams(
            dimension_semantics=("parallel",)),
    )(x, params["w1"], params["b1"], params["w2"], params["b2"],
      params["fc1_w"], params["fc1_b"], params["fc2_w"], params["fc2_b"],
      params["fc3_w"], params["fc3_b"])
    return out[:, 0, :2]


# ----------------------------------------------------------------------------
# Parameters: torch-layout init + one-time conversion to kernel layout
# ----------------------------------------------------------------------------
def compute_to_linear(hw):
    s = hw - 1          # conv1 (kernel 2, valid)
    s = s // 2          # maxpool 2x2
    s = s - 1           # conv2 (kernel 2, valid)
    s = s // 2          # maxpool 2x2
    return 84 * s * s


def init_torch_params(key, hw):
    """Random parameters in PyTorch's native layouts (OIHW conv, (out,in) linear)."""
    to_linear = compute_to_linear(hw)
    ks = jax.random.split(key, 10)
    scale = 0.05
    f32 = jnp.float32
    return {
        "conv1_w": scale * jax.random.normal(ks[0], (42, 3, 2, 2), f32),
        "conv1_b": scale * jax.random.normal(ks[1], (42,), f32),
        "conv2_w": scale * jax.random.normal(ks[2], (84, 42, 2, 2), f32),
        "conv2_b": scale * jax.random.normal(ks[3], (84,), f32),
        "fc1_w": scale * jax.random.normal(ks[4], (200, to_linear), f32),
        "fc1_b": scale * jax.random.normal(ks[5], (200,), f32),
        "fc2_w": scale * jax.random.normal(ks[6], (100, 200), f32),
        "fc2_b": scale * jax.random.normal(ks[7], (100,), f32),
        "fc3_w": scale * jax.random.normal(ks[8], (2, 100), f32),
        "fc3_b": scale * jax.random.normal(ks[9], (2,), f32),
    }


def prepare_params(tp, hw):
    """One-time conversion: pad channels/K/N to 128-lane multiples, transpose to
    (in,out), and pre-permute fc1 to torch's (C,H,W) flatten order, so the
    forward pass does zero per-call weight reshaping/casting."""
    f32 = jnp.float32
    s2 = ((hw - 1) // 2 - 1) // 2

    def conv_blocks(w_oihw, b):
        cout, cin = w_oihw.shape[0], w_oihw.shape[1]
        blk = jnp.zeros((4, LANES, LANES), f32)
        for k, (kh, kw) in enumerate(((0, 0), (0, 1), (1, 0), (1, 1))):
            blk = blk.at[k, :cin, :cout].set(w_oihw[:, :, kh, kw].T)
        bias = jnp.zeros((1, LANES), f32).at[0, :cout].set(b)
        return blk, bias

    w1, b1 = conv_blocks(tp["conv1_w"], tp["conv1_b"])
    w2, b2 = conv_blocks(tp["conv2_w"], tp["conv2_b"])

    # fc1: torch flattens pool2 as (c, a, b); the kernel's feature vector is
    # (position p = a*s2 + b) blocks of 128 lanes with channel c at lane c.
    c2, d1 = 84, 200
    fc1 = tp["fc1_w"].reshape(d1, c2, s2, s2)             # (out, c, a, b)
    fc1 = jnp.transpose(fc1, (2, 3, 1, 0))                # (a, b, c, out)
    fc1 = jnp.pad(fc1, ((0, 0), (0, 0), (0, LANES - c2), (0, FC1_PAD - d1)))
    fc1w = fc1.reshape(s2 * s2 * LANES, FC1_PAD)
    fc1b = jnp.zeros((1, FC1_PAD), f32).at[0, :d1].set(tp["fc1_b"])

    fc2w = jnp.zeros((FC1_PAD, LANES), f32).at[:d1, :100].set(tp["fc2_w"].T)
    fc2b = jnp.zeros((1, LANES), f32).at[0, :100].set(tp["fc2_b"])
    fc3w = jnp.zeros((LANES, LANES), f32).at[:100, :2].set(tp["fc3_w"].T)
    fc3b = jnp.zeros((1, LANES), f32).at[0, :2].set(tp["fc3_b"])

    return {"w1": w1, "b1": b1, "w2": w2, "b2": b2,
            "fc1_w": fc1w, "fc1_b": fc1b, "fc2_w": fc2w, "fc2_b": fc2b,
            "fc3_w": fc3w, "fc3_b": fc3b}


# ----------------------------------------------------------------------------
# Pure-JAX reference (PyTorch semantics, eval mode) for a tolerance check
# ----------------------------------------------------------------------------
def reference_forward(tp, x_nchw):
    def conv(x, w, b):
        dn = lax.conv_dimension_numbers(x.shape, w.shape, ("NCHW", "OIHW", "NCHW"))
        y = lax.conv_general_dilated(x, w, (1, 1), "VALID", dimension_numbers=dn)
        return jax.nn.relu(y + b[None, :, None, None])

    def pool(x):
        return lax.reduce_window(x, -jnp.inf, lax.max,
                                 (1, 1, 2, 2), (1, 1, 2, 2), "VALID")

    y = pool(conv(x_nchw, tp["conv1_w"], tp["conv1_b"]))
    y = pool(conv(y, tp["conv2_w"], tp["conv2_b"]))
    y = y.reshape(y.shape[0], -1)
    y = jax.nn.relu(y @ tp["fc1_w"].T + tp["fc1_b"])
    y = jax.nn.relu(y @ tp["fc2_w"].T + tp["fc2_b"])
    return y @ tp["fc3_w"].T + tp["fc3_b"]


if __name__ == "__main__":
    key = jax.random.PRNGKey(0)
    k_param, k_input = jax.random.split(key)

    # Small shapes consistent with the module: batch=2, channels=3, spatial=16.
    N, C, H, W = 2, 3, 16, 16
    torch_params = init_torch_params(k_param, H)
    params = prepare_params(torch_params, H)
    x = jax.random.normal(k_input, (N, C, H, W), jnp.float32)

    fwd = jax.jit(pighead_forward)
    out = jax.block_until_ready(fwd(params, x))
    assert out.shape == (N, 2), out.shape
    assert out.dtype == jnp.float32

    ref = reference_forward(torch_params, x)
    assert jnp.allclose(out, ref, rtol=1e-3, atol=1e-3), \
        float(jnp.max(jnp.abs(out - ref)))

    print("KERNEL_OK")
</pallas_src>

<mosaic_0001>
module attributes {stable_mosaic.version = 11 : i64} {
  func.func @_pighead_fused_kernel(%arg0: i32, %arg1: memref<1x296x128xf32, #tpu.memory_space<vmem>>, %arg2: memref<4x128x128xf32, #tpu.memory_space<vmem>>, %arg3: memref<1x128xf32, #tpu.memory_space<vmem>>, %arg4: memref<4x128x128xf32, #tpu.memory_space<vmem>>, %arg5: memref<1x128xf32, #tpu.memory_space<vmem>>, %arg6: memref<1152x256xf32, #tpu.memory_space<vmem>>, %arg7: memref<1x256xf32, #tpu.memory_space<vmem>>, %arg8: memref<256x128xf32, #tpu.memory_space<vmem>>, %arg9: memref<1x128xf32, #tpu.memory_space<vmem>>, %arg10: memref<128x128xf32, #tpu.memory_space<vmem>>, %arg11: memref<1x128xf32, #tpu.memory_space<vmem>>, %arg12: memref<1x8x128xf32, #tpu.memory_space<vmem>>, %arg13: memref<296x128xf32, #tpu.memory_space<vmem>>, %arg14: memref<296x128xf32, #tpu.memory_space<vmem>>) attributes {dimension_semantics = [#tpu.dimension_semantics<parallel>], iteration_bounds = array<i64: 2>, scalar_prefetch = 0 : i64, scratch_operands = 2 : i64, tpu.core_type = #tpu.core_type<tc>, window_params = [{transform_indices = @transform_0, window_bounds = array<i64: 1, 296, 128>}, {pipeline_mode = #tpu.pipeline_mode<synchronous>, transform_indices = @transform_1, window_bounds = array<i64: 4, 128, 128>}, {pipeline_mode = #tpu.pipeline_mode<synchronous>, transform_indices = @transform_2, window_bounds = array<i64: 1, 128>}, {pipeline_mode = #tpu.pipeline_mode<synchronous>, transform_indices = @transform_3, window_bounds = array<i64: 4, 128, 128>}, {pipeline_mode = #tpu.pipeline_mode<synchronous>, transform_indices = @transform_4, window_bounds = array<i64: 1, 128>}, {pipeline_mode = #tpu.pipeline_mode<synchronous>, transform_indices = @transform_5, window_bounds = array<i64: 1152, 256>}, {pipeline_mode = #tpu.pipeline_mode<synchronous>, transform_indices = @transform_6, window_bounds = array<i64: 1, 256>}, {pipeline_mode = #tpu.pipeline_mode<synchronous>, transform_indices = @transform_7, window_bounds = array<i64: 256, 128>}, {pipeline_mode = #tpu.pipeline_mode<synchronous>, transform_indices = @transform_8, window_bounds = array<i64: 1, 128>}, {pipeline_mode = #tpu.pipeline_mode<synchronous>, transform_indices = @transform_9, window_bounds = array<i64: 128, 128>}, {pipeline_mode = #tpu.pipeline_mode<synchronous>, transform_indices = @transform_10, window_bounds = array<i64: 1, 128>}, {transform_indices = @transform_11, window_bounds = array<i64: 1, 8, 128>}]} {
    %cst = arith.constant 0.000000e+00 : f32
    %0 = vector.broadcast %cst : f32 to vector<40x128xf32>
    %c256 = arith.constant 256 : index
    %c0 = arith.constant 0 : index
    %1 = vector.load %arg13[%c256, %c0] : memref<296x128xf32, #tpu.memory_space<vmem>>, vector<40x128xf32>
    tpu.vector_store %arg13[%c256, %c0], %0 {strides = array<i32>} : memref<296x128xf32, #tpu.memory_space<vmem>>, vector<40x128xf32>,
    %c256_0 = arith.constant 256 : index
    %c0_1 = arith.constant 0 : index
    %2 = vector.load %arg14[%c256_0, %c0_1] : memref<296x128xf32, #tpu.memory_space<vmem>>, vector<40x128xf32>
    tpu.vector_store %arg14[%c256_0, %c0_1], %0 {strides = array<i32>} : memref<296x128xf32, #tpu.memory_space<vmem>>, vector<40x128xf32>,
    %c0_2 = arith.constant 0 : index
    %c0_3 = arith.constant 0 : index
    %c0_4 = arith.constant 0 : index
    %3 = vector.load %arg1[%c0_2, %c0_3, %c0_4] : memref<1x296x128xf32, #tpu.memory_space<vmem>>, vector<1x256x128xf32>
    %4 = vector.shape_cast %3 : vector<1x256x128xf32> to vector<256x128xf32>
    %c0_5 = arith.constant 0 : index
    %c0_6 = arith.constant 0 : index
    %c0_7 = arith.constant 0 : index
    %5 = vector.load %arg2[%c0_5, %c0_6, %c0_7] : memref<4x128x128xf32, #tpu.memory_space<vmem>>, vector<1x128x128xf32>
    %6 = vector.shape_cast %5 : vector<1x128x128xf32> to vector<128x128xf32>
    %cst_8 = arith.constant dense<0.000000e+00> : vector<256x128xf32>
    %7 = tpu.matmul %4, %6, %cst_8 {dimension_numbers = #tpu.dot_dimension_numbers<[1], [0], [0], [1], [0, 0, 1, 1], [], []>} : vector<256x128xf32>, vector<128x128xf32>, vector<256x128xf32> -> vector<256x128xf32>
    %c0_9 = arith.constant 0 : index
    %c1 = arith.constant 1 : index
    %c0_10 = arith.constant 0 : index
    %8 = vector.load %arg1[%c0_9, %c1, %c0_10] : memref<1x296x128xf32, #tpu.memory_space<vmem>>, vector<1x256x128xf32>
    %9 = vector.shape_cast %8 : vector<1x256x128xf32> to vector<256x128xf32>
    %c1_11 = arith.constant 1 : index
    %c0_12 = arith.constant 0 : index
    %c0_13 = arith.constant 0 : index
    %10 = vector.load %arg2[%c1_11, %c0_12, %c0_13] : memref<4x128x128xf32, #tpu.memory_space<vmem>>, vector<1x128x128xf32>
    %11 = vector.shape_cast %10 : vector<1x128x128xf32> to vector<128x128xf32>
    %cst_14 = arith.constant dense<0.000000e+00> : vector<256x128xf32>
    %12 = tpu.matmul %9, %11, %cst_14 {dimension_numbers = #tpu.dot_dimension_numbers<[1], [0], [0], [1], [0, 0, 1, 1], [], []>} : vector<256x128xf32>, vector<128x128xf32>, vector<256x128xf32> -> vector<256x128xf32>
    %13 = arith.addf %7, %12 : vector<256x128xf32>
    %c0_15 = arith.constant 0 : index
    %c16 = arith.constant 16 : index
    %c0_16 = arith.constant 0 : index
    %14 = vector.load %arg1[%c0_15, %c16, %c0_16] : memref<1x296x128xf32, #tpu.memory_space<vmem>>, vector<1x256x128xf32>
    %15 = vector.shape_cast %14 : vector<1x256x128xf32> to vector<256x128xf32>
    %c2 = arith.constant 2 : index
    %c0_17 = arith.constant 0 : index
    %c0_18 = arith.constant 0 : index
    %16 = vector.load %arg2[%c2, %c0_17, %c0_18] : memref<4x128x128xf32, #tpu.memory_space<vmem>>, vector<1x128x128xf32>
    %17 = vector.shape_cast %16 : vector<1x128x128xf32> to vector<128x128xf32>
    %cst_19 = arith.constant dense<0.000000e+00> : vector<256x128xf32>
    %18 = tpu.matmul %15, %17, %cst_19 {dimension_numbers = #tpu.dot_dimension_numbers<[1], [0], [0], [1], [0, 0, 1, 1], [], []>} : vector<256x128xf32>, vector<128x128xf32>, vector<256x128xf32> -> vector<256x128xf32>
    %19 = arith.addf %13, %18 : vector<256x128xf32>
    %c0_20 = arith.constant 0 : index
    %c17 = arith.constant 17 : index
    %c0_21 = arith.constant 0 : index
    %20 = vector.load %arg1[%c0_20, %c17, %c0_21] : memref<1x296x128xf32, #tpu.memory_space<vmem>>, vector<1x256x128xf32>
    %21 = vector.shape_cast %20 : vector<1x256x128xf32> to vector<256x128xf32>
    %c3 = arith.constant 3 : index
    %c0_22 = arith.constant 0 : index
    %c0_23 = arith.constant 0 : index
    %22 = vector.load %arg2[%c3, %c0_22, %c0_23] : memref<4x128x128xf32, #tpu.memory_space<vmem>>, vector<1x128x128xf32>
    %23 = vector.shape_cast %22 : vector<1x128x128xf32> to vector<128x128xf32>
    %cst_24 = arith.constant dense<0.000000e+00> : vector<256x128xf32>
    %24 = tpu.matmul %21, %23, %cst_24 {dimension_numbers = #tpu.dot_dimension_numbers<[1], [0], [0], [1], [0, 0, 1, 1], [], []>} : vector<256x128xf32>, vector<128x128xf32>, vector<256x128xf32> -> vector<256x128xf32>
    %25 = arith.addf %19, %24 : vector<256x128xf32>
    %c0_25 = arith.constant 0 : index
    %c0_26 = arith.constant 0 : index
    %26 = vector.load %arg3[%c0_25, %c0_26] : memref<1x128xf32, #tpu.memory_space<vmem>>, vector<1x128xf32>
    %27 = vector.broadcast %26 : vector<1x128xf32> to vector<256x128xf32>
    %28 = arith.addf %25, %27 : vector<256x128xf32>
    %cst_27 = arith.constant 0.000000e+00 : f32
    %29 = vector.broadcast %cst_27 : f32 to vector<256x128xf32>
    %30 = arith.maximumf %28, %29 : vector<256x128xf32>
    %c0_28 = arith.constant 0 : index
    %c0_29 = arith.constant 0 : index
    %31 = vector.load %arg13[%c0_28, %c0_29] : memref<296x128xf32, #tpu.memory_space<vmem>>, vector<256x128xf32>
    tpu.vector_store %arg13[%c0_28, %c0_29], %30 {strides = array<i32>} : memref<296x128xf32, #tpu.memory_space<vmem>>, vector<256x128xf32>,
    %c0_30 = arith.constant 0 : index
    %c0_31 = arith.constant 0 : index
    %32 = vector.load %arg13[%c0_30, %c0_31] : memref<296x128xf32, #tpu.memory_space<vmem>>, vector<256x128xf32>
    %c1_32 = arith.constant 1 : index
    %c0_33 = arith.constant 0 : index
    %33 = vector.load %arg13[%c1_32, %c0_33] : memref<296x128xf32, #tpu.memory_space<vmem>>, vector<256x128xf32>
    %34 = arith.maximumf %32, %33 : vector<256x128xf32>
    %c16_34 = arith.constant 16 : index
    %c0_35 = arith.constant 0 : index
    %35 = vector.load %arg13[%c16_34, %c0_35] : memref<296x128xf32, #tpu.memory_space<vmem>>, vector<256x128xf32>
    %36 = arith.maximumf %34, %35 : vector<256x128xf32>
    %c17_36 = arith.constant 17 : index
    %c0_37 = arith.constant 0 : index
    %37 = vector.load %arg13[%c17_36, %c0_37] : memref<296x128xf32, #tpu.memory_space<vmem>>, vector<256x128xf32>
    %38 = arith.maximumf %36, %37 : vector<256x128xf32>
    %c0_38 = arith.constant 0 : index
    %c0_39 = arith.constant 0 : index
    %39 = vector.load %arg14[%c0_38, %c0_39] : memref<296x128xf32, #tpu.memory_space<vmem>>, vector<256x128xf32>
    tpu.vector_store %arg14[%c0_38, %c0_39], %38 {strides = array<i32>} : memref<296x128xf32, #tpu.memory_space<vmem>>, vector<256x128xf32>,
    %c0_40 = arith.constant 0 : index
    %c0_41 = arith.constant 0 : index
    %40 = vector.load %arg14[%c0_40, %c0_41] : memref<296x128xf32, #tpu.memory_space<vmem>>, vector<256x128xf32>
    %c0_42 = arith.constant 0 : index
    %c0_43 = arith.constant 0 : index
    %c0_44 = arith.constant 0 : index
    %41 = vector.load %arg4[%c0_42, %c0_43, %c0_44] : memref<4x128x128xf32, #tpu.memory_space<vmem>>, vector<1x128x128xf32>
    %42 = vector.shape_cast %41 : vector<1x128x128xf32> to vector<128x128xf32>
    %cst_45 = arith.constant dense<0.000000e+00> : vector<256x128xf32>
    %43 = tpu.matmul %40, %42, %cst_45 {dimension_numbers = #tpu.dot_dimension_numbers<[1], [0], [0], [1], [0, 0, 1, 1], [], []>} : vector<256x128xf32>, vector<128x128xf32>, vector<256x128xf32> -> vector<256x128xf32>
    %c2_46 = arith.constant 2 : index
    %c0_47 = arith.constant 0 : index
    %44 = vector.load %arg14[%c2_46, %c0_47] : memref<296x128xf32, #tpu.memory_space<vmem>>, vector<256x128xf32>
    %c1_48 = arith.constant 1 : index
    %c0_49 = arith.constant 0 : index
    %c0_50 = arith.constant 0 : index
    %45 = vector.load %arg4[%c1_48, %c0_49, %c0_50] : memref<4x128x128xf32, #tpu.memory_space<vmem>>, vector<1x128x128xf32>
    %46 = vector.shape_cast %45 : vector<1x128x128xf32> to vector<128x128xf32>
    %cst_51 = arith.constant dense<0.000000e+00> : vector<256x128xf32>
    %47 = tpu.matmul %44, %46, %cst_51 {dimension_numbers = #tpu.dot_dimension_numbers<[1], [0], [0], [1], [0, 0, 1, 1], [], []>} : vector<256x128xf32>, vector<128x128xf32>, vector<256x128xf32> -> vector<256x128xf32>
    %48 = arith.addf %43, %47 : vector<256x128xf32>
    %c32 = arith.constant 32 : index
    %c0_52 = arith.constant 0 : index
    %49 = vector.load %arg14[%c32, %c0_52] : memref<296x128xf32, #tpu.memory_space<vmem>>, vector<256x128xf32>
    %c2_53 = arith.constant 2 : index
    %c0_54 = arith.constant 0 : index
    %c0_55 = arith.constant 0 : index
    %50 = vector.load %arg4[%c2_53, %c0_54, %c0_55] : memref<4x128x128xf32, #tpu.memory_space<vmem>>, vector<1x128x128xf32>
    %51 = vector.shape_cast %50 : vector<1x128x128xf32> to vector<128x128xf32>
    %cst_56 = arith.constant dense<0.000000e+00> : vector<256x128xf32>
    %52 = tpu.matmul %49, %51, %cst_56 {dimension_numbers = #tpu.dot_dimension_numbers<[1], [0], [0], [1], [0, 0, 1, 1], [], []>} : vector<256x128xf32>, vector<128x128xf32>, vector<256x128xf32> -> vector<256x128xf32>
    %53 = arith.addf %48, %52 : vector<256x128xf32>
    %c34 = arith.constant 34 : index
    %c0_57 = arith.constant 0 : index
    %54 = vector.load %arg14[%c34, %c0_57] : memref<296x128xf32, #tpu.memory_space<vmem>>, vector<256x128xf32>
    %c3_58 = arith.constant 3 : index
    %c0_59 = arith.constant 0 : index
    %c0_60 = arith.constant 0 : index
    %55 = vector.load %arg4[%c3_58, %c0_59, %c0_60] : memref<4x128x128xf32, #tpu.memory_space<vmem>>, vector<1x128x128xf32>
    %56 = vector.shape_cast %55 : vector<1x128x128xf32> to vector<128x128xf32>
    %cst_61 = arith.constant dense<0.000000e+00> : vector<256x128xf32>
    %57 = tpu.matmul %54, %56, %cst_61 {dimension_numbers = #tpu.dot_dimension_numbers<[1], [0], [0], [1], [0, 0, 1, 1], [], []>} : vector<256x128xf32>, vector<128x128xf32>, vector<256x128xf32> -> vector<256x128xf32>
    %58 = arith.addf %53, %57 : vector<256x128xf32>
    %c0_62 = arith.constant 0 : index
    %c0_63 = arith.constant 0 : index
    %59 = vector.load %arg5[%c0_62, %c0_63] : memref<1x128xf32, #tpu.memory_space<vmem>>, vector<1x128xf32>
    %60 = vector.broadcast %59 : vector<1x128xf32> to vector<256x128xf32>
    %61 = arith.addf %58, %60 : vector<256x128xf32>
    %cst_64 = arith.constant 0.000000e+00 : f32
    %62 = vector.broadcast %cst_64 : f32 to vector<256x128xf32>
    %63 = arith.maximumf %61, %62 : vector<256x128xf32>
    %c0_65 = arith.constant 0 : index
    %c0_66 = arith.constant 0 : index
    %64 = vector.load %arg13[%c0_65, %c0_66] : memref<296x128xf32, #tpu.memory_space<vmem>>, vector<256x128xf32>
    tpu.vector_store %arg13[%c0_65, %c0_66], %63 {strides = array<i32>} : memref<296x128xf32, #tpu.memory_space<vmem>>, vector<256x128xf32>,
    %c0_67 = arith.constant 0 : index
    %c0_68 = arith.constant 0 : index
    %65 = vector.load %arg13[%c0_67, %c0_68] : memref<296x128xf32, #tpu.memory_space<vmem>>, vector<256x128xf32>
    %c2_69 = arith.constant 2 : index
    %c0_70 = arith.constant 0 : index
    %66 = vector.load %arg13[%c2_69, %c0_70] : memref<296x128xf32, #tpu.memory_space<vmem>>, vector<256x128xf32>
    %67 = arith.maximumf %65, %66 : vector<256x128xf32>
    %c32_71 = arith.constant 32 : index
    %c0_72 = arith.constant 0 : index
    %68 = vector.load %arg13[%c32_71, %c0_72] : memref<296x128xf32, #tpu.memory_space<vmem>>, vector<256x128xf32>
    %69 = arith.maximumf %67, %68 : vector<256x128xf32>
    %c34_73 = arith.constant 34 : index
    %c0_74 = arith.constant 0 : index
    %70 = vector.load %arg13[%c34_73, %c0_74] : memref<296x128xf32, #tpu.memory_space<vmem>>, vector<256x128xf32>
    %71 = arith.maximumf %69, %70 : vector<256x128xf32>
    %c0_75 = arith.constant 0 : index
    %c0_76 = arith.constant 0 : index
    %72 = vector.load %arg14[%c0_75, %c0_76] : memref<296x128xf32, #tpu.memory_space<vmem>>, vector<256x128xf32>
    tpu.vector_store %arg14[%c0_75, %c0_76], %71 {strides = array<i32>} : memref<296x128xf32, #tpu.memory_space<vmem>>, vector<256x128xf32>,
    %c0_77 = arith.constant 0 : index
    %c0_78 = arith.constant 0 : index
    %73 = vector.load %arg14[%c0_77, %c0_78] : memref<296x128xf32, #tpu.memory_space<vmem>>, vector<1x128xf32>
    %c4 = arith.constant 4 : index
    %c0_79 = arith.constant 0 : index
    %74 = vector.load %arg14[%c4, %c0_79] : memref<296x128xf32, #tpu.memory_space<vmem>>, vector<1x128xf32>
    %c8 = arith.constant 8 : index
    %c0_80 = arith.constant 0 : index
    %75 = vector.load %arg14[%c8, %c0_80] : memref<296x128xf32, #tpu.memory_space<vmem>>, vector<1x128xf32>
    %c64 = arith.constant 64 : index
    %c0_81 = arith.constant 0 : index
    %76 = vector.load %arg14[%c64, %c0_81] : memref<296x128xf32, #tpu.memory_space<vmem>>, vector<1x128xf32>
    %c68 = arith.constant 68 : index
    %c0_82 = arith.constant 0 : index
    %77 = vector.load %arg14[%c68, %c0_82] : memref<296x128xf32, #tpu.memory_space<vmem>>, vector<1x128xf32>
    %c72 = arith.constant 72 : index
    %c0_83 = arith.constant 0 : index
    %78 = vector.load %arg14[%c72, %c0_83] : memref<296x128xf32, #tpu.memory_space<vmem>>, vector<1x128xf32>
    %c128 = arith.constant 128 : index
    %c0_84 = arith.constant 0 : index
    %79 = vector.load %arg14[%c128, %c0_84] : memref<296x128xf32, #tpu.memory_space<vmem>>, vector<1x128xf32>
    %c132 = arith.constant 132 : index
    %c0_85 = arith.constant 0 : index
    %80 = vector.load %arg14[%c132, %c0_85] : memref<296x128xf32, #tpu.memory_space<vmem>>, vector<1x128xf32>
    %c136 = arith.constant 136 : index
    %c0_86 = arith.constant 0 : index
    %81 = vector.load %arg14[%c136, %c0_86] : memref<296x128xf32, #tpu.memory_space<vmem>>, vector<1x128xf32>
    %82 = tpu.concatenate %73, %74, %75, %76, %77, %78, %79, %80, %81 in 1 : vector<1x128xf32>, vector<1x128xf32>, vector<1x128xf32>, vector<1x128xf32>, vector<1x128xf32>, vector<1x128xf32>, vector<1x128xf32>, vector<1x128xf32>, vector<1x128xf32> -> vector<1x1152xf32>
    %83 = vector.shape_cast %82 : vector<1x1152xf32> to vector<1x1152xf32>
    %84 = vector.broadcast %83 : vector<1x1152xf32> to vector<8x1152xf32>
    %c0_87 = arith.constant 0 : index
    %c0_88 = arith.constant 0 : index
    %85 = vector.load %arg6[%c0_87, %c0_88] : memref<1152x256xf32, #tpu.memory_space<vmem>>, vector<1152x256xf32>
    %cst_89 = arith.constant dense<0.000000e+00> : vector<8x256xf32>
    %86 = tpu.matmul %84, %85, %cst_89 {dimension_numbers = #tpu.dot_dimension_numbers<[1], [0], [0], [1], [0, 0, 1, 1], [], []>} : vector<8x1152xf32>, vector<1152x256xf32>, vector<8x256xf32> -> vector<8x256xf32>
    %c0_90 = arith.constant 0 : index
    %c0_91 = arith.constant 0 : index
    %87 = vector.load %arg7[%c0_90, %c0_91] : memref<1x256xf32, #tpu.memory_space<vmem>>, vector<1x256xf32>
    %88 = vector.broadcast %87 : vector<1x256xf32> to vector<8x256xf32>
    %89 = arith.addf %86, %88 : vector<8x256xf32>
    %cst_92 = arith.constant 0.000000e+00 : f32
    %90 = vector.broadcast %cst_92 : f32 to vector<8x256xf32>
    %91 = arith.maximumf %89, %90 : vector<8x256xf32>
    %c0_93 = arith.constant 0 : index
    %c0_94 = arith.constant 0 : index
    %92 = vector.load %arg8[%c0_93, %c0_94] : memref<256x128xf32, #tpu.memory_space<vmem>>, vector<256x128xf32>
    %cst_95 = arith.constant dense<0.000000e+00> : vector<8x128xf32>
    %93 = tpu.matmul %91, %92, %cst_95 {dimension_numbers = #tpu.dot_dimension_numbers<[1], [0], [0], [1], [0, 0, 1, 1], [], []>} : vector<8x256xf32>, vector<256x128xf32>, vector<8x128xf32> -> vector<8x128xf32>
    %c0_96 = arith.constant 0 : index
    %c0_97 = arith.constant 0 : index
    %94 = vector.load %arg9[%c0_96, %c0_97] : memref<1x128xf32, #tpu.memory_space<vmem>>, vector<1x128xf32>
    %95 = vector.broadcast %94 : vector<1x128xf32> to vector<8x128xf32>
    %96 = arith.addf %93, %95 : vector<8x128xf32>
    %cst_98 = arith.constant 0.000000e+00 : f32
    %97 = vector.broadcast %cst_98 : f32 to vector<8x128xf32>
    %98 = arith.maximumf %96, %97 : vector<8x128xf32>
    %c0_99 = arith.constant 0 : index
    %c0_100 = arith.constant 0 : index
    %99 = vector.load %arg10[%c0_99, %c0_100] : memref<128x128xf32, #tpu.memory_space<vmem>>, vector<128x128xf32>
    %cst_101 = arith.constant dense<0.000000e+00> : vector<8x128xf32>
    %100 = tpu.matmul %98, %99, %cst_101 {dimension_numbers = #tpu.dot_dimension_numbers<[1], [0], [0], [1], [0, 0, 1, 1], [], []>} : vector<8x128xf32>, vector<128x128xf32>, vector<8x128xf32> -> vector<8x128xf32>
    %c0_102 = arith.constant 0 : index
    %c0_103 = arith.constant 0 : index
    %101 = vector.load %arg11[%c0_102, %c0_103] : memref<1x128xf32, #tpu.memory_space<vmem>>, vector<1x128xf32>
    %102 = vector.broadcast %101 : vector<1x128xf32> to vector<8x128xf32>
    %103 = arith.addf %100, %102 : vector<8x128xf32>
    %c0_104 = arith.constant 0 : index
    %c0_105 = arith.constant 0 : index
    %c0_106 = arith.constant 0 : index
    %104 = vector.load %arg12[%c0_104, %c0_105, %c0_106] : memref<1x8x128xf32, #tpu.memory_space<vmem>>, vector<1x8x128xf32>
    %105 = vector.shape_cast %104 : vector<1x8x128xf32> to vector<8x128xf32>
    %106 = vector.shape_cast %103 : vector<8x128xf32> to vector<1x8x128xf32>
    tpu.vector_store %arg12[%c0_104, %c0_105, %c0_106], %106 {strides = array<i32>} : memref<1x8x128xf32, #tpu.memory_space<vmem>>, vector<1x8x128xf32>,
    return
  }
  func.func @transform_0(%arg0: i32) -> (i32, i32, i32) {
    %c0_i32 = arith.constant 0 : i32
    %c0_i32_0 = arith.constant 0 : i32
    %c0_i32_1 = arith.constant 0 : i32
    return %arg0, %c0_i32, %c0_i32_0 : i32, i32, i32
  }
  func.func @transform_1(%arg0: i32) -> (i32, i32, i32) {
    %c0_i32 = arith.constant 0 : i32
    %c0_i32_0 = arith.constant 0 : i32
    %c0_i32_1 = arith.constant 0 : i32
    %c0_i32_2 = arith.constant 0 : i32
    return %c0_i32, %c0_i32_0, %c0_i32_1 : i32, i32, i32
  }
  func.func @transform_2(%arg0: i32) -> (i32, i32) {
    %c0_i32 = arith.constant 0 : i32
    %c0_i32_0 = arith.constant 0 : i32
    %c0_i32_1 = arith.constant 0 : i32
    return %c0_i32, %c0_i32_0 : i32, i32
  }
  func.func @transform_3(%arg0: i32) -> (i32, i32, i32) {
    %c0_i32 = arith.constant 0 : i32
    %c0_i32_0 = arith.constant 0 : i32
    %c0_i32_1 = arith.constant 0 : i32
    %c0_i32_2 = arith.constant 0 : i32
    return %c0_i32, %c0_i32_0, %c0_i32_1 : i32, i32, i32
  }
  func.func @transform_4(%arg0: i32) -> (i32, i32) {
    %c0_i32 = arith.constant 0 : i32
    %c0_i32_0 = arith.constant 0 : i32
    %c0_i32_1 = arith.constant 0 : i32
    return %c0_i32, %c0_i32_0 : i32, i32
  }
  func.func @transform_5(%arg0: i32) -> (i32, i32) {
    %c0_i32 = arith.constant 0 : i32
    %c0_i32_0 = arith.constant 0 : i32
    %c0_i32_1 = arith.constant 0 : i32
    return %c0_i32, %c0_i32_0 : i32, i32
  }
  func.func @transform_6(%arg0: i32) -> (i32, i32) {
    %c0_i32 = arith.constant 0 : i32
    %c0_i32_0 = arith.constant 0 : i32
    %c0_i32_1 = arith.constant 0 : i32
    return %c0_i32, %c0_i32_0 : i32, i32
  }
  func.func @transform_7(%arg0: i32) -> (i32, i32) {
    %c0_i32 = arith.constant 0 : i32
    %c0_i32_0 = arith.constant 0 : i32
    %c0_i32_1 = arith.constant 0 : i32
    return %c0_i32, %c0_i32_0 : i32, i32
  }
  func.func @transform_8(%arg0: i32) -> (i32, i32) {
    %c0_i32 = arith.constant 0 : i32
    %c0_i32_0 = arith.constant 0 : i32
    %c0_i32_1 = arith.constant 0 : i32
    return %c0_i32, %c0_i32_0 : i32, i32
  }
  func.func @transform_9(%arg0: i32) -> (i32, i32) {
    %c0_i32 = arith.constant 0 : i32
    %c0_i32_0 = arith.constant 0 : i32
    %c0_i32_1 = arith.constant 0 : i32
    return %c0_i32, %c0_i32_0 : i32, i32
  }
  func.func @transform_10(%arg0: i32) -> (i32, i32) {
    %c0_i32 = arith.constant 0 : i32
    %c0_i32_0 = arith.constant 0 : i32
    %c0_i32_1 = arith.constant 0 : i32
    return %c0_i32, %c0_i32_0 : i32, i32
  }
  func.func @transform_11(%arg0: i32) -> (i32, i32, i32) {
    %c0_i32 = arith.constant 0 : i32
    %c0_i32_0 = arith.constant 0 : i32
    %c0_i32_1 = arith.constant 0 : i32
    return %arg0, %c0_i32, %c0_i32_0 : i32, i32, i32
  }
}

</mosaic_0001>

<bundles_post_ra>
// kernel: pighead_forward.1
= control target key start
LH: loop header
LB: loop body
LE: loop exit
PB: predicated region body
PF: predicated region fallthrough
CT: control target
= control target key end

     0   :  { %16 = vsyncpa [#allocation5], 0  ;;  %s8267_s0 = inlined_call_operand.vmem [shape: f32[2,296,128], index: 0, kind: input, shape index: {}]   ;;  %s8268_s1 = inlined_call_operand.hbm [shape: f32[4,128,128], index: 1, kind: input, shape index: {}]   ;;  %s8269_s2 = inlined_call_operand.hbm [shape: f32[1,128], index: 2, kind: input, shape index: {}]   ;;  %s8270_s3 = inlined_call_operand.hbm [shape: f32[4,128,128], index: 3, kind: input, shape index: {}]   ;;  %s8271_s4 = inlined_call_operand.hbm [shape: f32[1,128], index: 4, kind: input, shape index: {}]   ;;  %s8272_s5 = inlined_call_operand.hbm [shape: f32[1152,256], index: 5, kind: input, shape index: {}]   ;;  %s8273_s6 = inlined_call_operand.hbm [shape: f32[1,256], index: 6, kind: input, shape index: {}]   ;;  %s8274_s7 = inlined_call_operand.hbm [shape: f32[256,128], index: 7, kind: input, shape index: {}]   ;;  %s8275_s8 = inlined_call_operand.hbm [shape: f32[1,128], index: 8, kind: input, shape index: {}]   ;;  %s8276_s9 = inlined_call_operand.hbm [shape: f32[128,128], index: 9, kind: input, shape index: {}]   ;;  %s8277_s10 = inlined_call_operand.hbm [shape: f32[1,128], index: 10, kind: input, shape index: {}]   ;;  %s8278_s11 = inlined_call_operand.vmem [shape: f32[2,8,128], index: 11, kind: output, shape index: {}]  }
   0x1   :  { %17 = vsyncpa [#allocation7], 0 }
   0x2   :  { %18 = vsyncpa [#allocation10], 0 }
   0x3   :  { %19 = vsyncpa [#allocation13], 0 }
   0x4   :  { %20 = vsyncpa [#allocation16], 0 }
   0x5   :  { %21 = vsyncpa [#allocation19], 0  ;;  %s6987_s17 = smov 0  }
   0x6 LB: > { %s6910_s18 = smov [#allocation6]   ;;  %s6993_s20 = sadd.s32 4294967295, %s6908_s17   ;;  %s6908_s17 = sphi %s6987_s17, %s27_s17  }
   0x7   : > { %s320_s19 = sshll.u32 %s6910_s18, 4  ;;  %p4510_p0 = scmp.ge.s32.totalorder %s6908_s17, 1  ;;  %s6998_s19 = int_to_ptr.vmem [resolvable:$true] %s320_s19 }
   0x8   : > { %p294_p1 = scmp.lt.s32.totalorder %s6908_s17, 3  ;;  %p8279_p2 = scmp.eq.s32.totalorder %s6993_s20, 0 }
   0x9   : > { %s6911_s22 = smov [#allocation9]   ;;  %s6912_s24 = smov [#allocation12]  }
   0xa   : > { %p7000_p3 = pnand %p4510_p0, %p294_p1  ;;  %s344_s23 = sshll.u32 %s6911_s22, 4  ;;  %s7006_s23 = int_to_ptr.vmem [resolvable:$true] %s344_s23 }
   0xb   : > { %s368_s25 = sshll.u32 %s6912_s24, 4  ;;  %s6913_s27 = smov [#allocation15]   ;;  %s7014_s25 = int_to_ptr.vmem [resolvable:$true] %s368_s25 }
   0xc   : > { %s8297_s21 = scalar_select %p7000_p3, 1, 0 }
   0xd   : > { %p6520_p4 = pneg %p7000_p3  ;;  %s392_s28 = sshll.u32 %s6913_s27, 4  ;;  %s7016_s28 = int_to_ptr.vmem [resolvable:$true] %s392_s28 }
   0xe   : > { %s6598_s12 = scalar_lea.hbm %s8269_s2, 16 }
   0xf   : > { %p7010_p5 = pnand %p8279_p2, %p6520_p4  ;;  %p6599_p6 = scmp.ne.s32.totalorder %s8269_s2, %s6598_s12 }
  0x10   : > { %p6605_p10 = scmp.lt.u32.totalorder %s6598_s12, %s8269_s2 }
  0x11   : > { %p7026_p7 = pneg %p7010_p5 }
  0x13   : > { %p6601_p8 = pnand %p7026_p7, %p6599_p6 }
  0x15   : > { %p6602_p9 = pneg %p6601_p8 }
  0x17   : > { %p6607_p11 = pnand %p6605_p10, %p6602_p9 }
  0x19   : > { %6610 = shalt.err (!%p6607_p11)
}
  0x1a   : > { %s6611_s22 = scalar_lea.vmem %s6998_s19, 16  ;;  %s6618_s24 = scalar_lea.vmem %s6998_s19, 32 }
  0x1b   : > { %p6612_p12 = scmp.ne.s32.totalorder %s6998_s19, %s6611_s22  ;;  %p6619_p1 = scmp.lt.s32.totalorder %s6998_s19, %s6998_s19 }
  0x1c   : > { %p6620_p4 = scmp.lt.s32.totalorder %s6618_s24, %s6611_s22 }
  0x1d   : > { %p6614_p13 = pnand %p6612_p12, %p7026_p7 }
  0x1e   : > { %p6621_p6 = por %p6620_p4, %p6619_p1 }
  0x1f   : > { %p6615_p0 = pneg %p6614_p13 }
  0x21   : > { %p6622_p8 = pnand %p6621_p6, %p6615_p0 }
  0x23   : > { %6625 = shalt.err (!%p6622_p8)
}
  0x24   : > { %6526 = dma.hbm_to_vmem [thread:$0]  (!%p7010_p5), %s8269_s2, 16, %s6998_s19, [#allocation7]  }
  0x25   : > { %s6626_s13 = scalar_lea.hbm %s8271_s4, 16 }
  0x26   : > { %p6627_p9 = scmp.ne.s32.totalorder %s8271_s4, %s6626_s13  ;;  %p6633_p12 = scmp.lt.u32.totalorder %s6626_s13, %s8271_s4 }
  0x28   : > { %p6629_p10 = pnand %p6627_p9, %p7026_p7 }
  0x2a   : > { %p6630_p11 = pneg %p6629_p10 }
  0x2c   : > { %p6635_p13 = pnand %p6633_p12, %p6630_p11 }
  0x2e   : > { %6638 = shalt.err (!%p6635_p13)
}
  0x2f   : > { %s6639_s19 = scalar_lea.vmem %s7006_s23, 16  ;;  %s6646_s24 = scalar_lea.vmem %s7006_s23, 32 }
  0x30   : > { %p6640_p0 = scmp.ne.s32.totalorder %s7006_s23, %s6639_s19  ;;  %p6647_p6 = scmp.lt.s32.totalorder %s7006_s23, %s7006_s23 }
  0x31   : > { %p6648_p8 = scmp.lt.s32.totalorder %s6646_s24, %s6639_s19 }
  0x32   : > { %p6642_p1 = pnand %p6640_p0, %p7026_p7 }
  0x33   : > { %p6649_p9 = por %p6648_p8, %p6647_p6 }
  0x34   : > { %p6643_p4 = pneg %p6642_p1 }
  0x36   : > { %p6650_p10 = pnand %p6649_p9, %p6643_p4 }
  0x38   : > { %6653 = shalt.err (!%p6650_p10)
}
  0x39   : > { %6532 = dma.hbm_to_vmem [thread:$0]  (!%p7010_p5), %s8271_s4, 16, %s7006_s23, [#allocation10]  }
  0x3a   : > { %s6654_s13 = scalar_lea.hbm %s8273_s6, 32 }
  0x3b   : > { %p6655_p11 = scmp.ne.s32.totalorder %s8273_s6, %s6654_s13  ;;  %p6661_p0 = scmp.lt.u32.totalorder %s6654_s13, %s8273_s6 }
  0x3d   : > { %p6657_p12 = pnand %p6655_p11, %p7026_p7 }
  0x3f   : > { %p6658_p13 = pneg %p6657_p12 }
  0x41   : > { %p6663_p1 = pnand %p6661_p0, %p6658_p13 }
  0x43   : > { %6666 = shalt.err (!%p6663_p1)
}
  0x44   : > { %s6667_s23 = scalar_lea.vmem %s7014_s25, 32  ;;  %p6675_p9 = scmp.lt.s32.totalorder %s7014_s25, %s7014_s25 }
  0x45   : > { %p6668_p4 = scmp.ne.s32.totalorder %s7014_s25, %s6667_s23  ;;  %p6676_p10 = scmp.lt.s32.totalorder %s6667_s23, %s6667_s23 }
  0x47   : > { %p6670_p6 = pnand %p6668_p4, %p7026_p7  ;;  %p6677_p11 = por %p6676_p10, %p6675_p9 }
  0x49   : > { %p6671_p8 = pneg %p6670_p6 }
  0x4b   : > { %p6678_p12 = pnand %p6677_p11, %p6671_p8 }
  0x4d   : > { %6681 = shalt.err (!%p6678_p12)
}
  0x4e   : > { %6538 = dma.hbm_to_vmem [thread:$0]  (!%p7010_p5), %s8273_s6, 32, %s7014_s25, [#allocation13]  }
  0x4f   : > { %s6682_s30 = scalar_lea.hbm %s8275_s8, 16 }
  0x50   : > { %p6683_p13 = scmp.ne.s32.totalorder %s8275_s8, %s6682_s30  ;;  %p6689_p4 = scmp.lt.u32.totalorder %s6682_s30, %s8275_s8 }
  0x52   : > { %p6685_p0 = pnand %p6683_p13, %p7026_p7 }
  0x54   : > { %p6686_p1 = pneg %p6685_p0 }
  0x56   : > { %p6691_p6 = pnand %p6689_p4, %p6686_p1 }
  0x58   : > { %6694 = shalt.err (!%p6691_p6)
}
  0x59   : > { %s6695_s25 = scalar_lea.vmem %s7016_s28, 16  ;;  %s6702_s18 = scalar_lea.vmem %s7016_s28, 32 }
  0x5a   : > { %p6696_p8 = scmp.ne.s32.totalorder %s7016_s28, %s6695_s25  ;;  %p6703_p11 = scmp.lt.s32.totalorder %s7016_s28, %s7016_s28 }
  0x5b   : > { %p6704_p12 = scmp.lt.s32.totalorder %s6702_s18, %s6695_s25 }
  0x5c   : > { %p6698_p9 = pnand %p6696_p8, %p7026_p7 }
  0x5d   : > { %p6705_p13 = por %p6704_p12, %p6703_p11 }
  0x5e   : > { %p6699_p10 = pneg %p6698_p9 }
  0x60   : > { %p6706_p0 = pnand %p6705_p13, %p6699_p10 }
  0x62   : > { %6709 = shalt.err (!%p6706_p0)
}
  0x63   : > { %6544 = dma.hbm_to_vmem [thread:$0]  (!%p7010_p5), %s8275_s8, 16, %s7016_s28, [#allocation16]  }
  0x64   : > { %s6914_s19 = smov [#allocation4]   ;;  %s6710_s30 = scalar_lea.hbm %s8268_s1, 8192 }
  0x65   : > { %s306_s24 = sshll.u32 %s6914_s19, 4  ;;  %p6711_p1 = scmp.ne.s32.totalorder %s8268_s1, %s6710_s30  ;;  %s307_s24 = int_to_ptr.vmem [resolvable:$true] %s306_s24 }
  0x66   : > { %p6717_p8 = scmp.lt.u32.totalorder %s6710_s30, %s8268_s1 }
  0x67   : > { %p6713_p4 = pnand %p6711_p1, %p7026_p7 }
  0x69   : > { %p6714_p6 = pneg %p6713_p4 }
  0x6b   : > { %p6719_p9 = pnand %p6717_p8, %p6714_p6 }
  0x6d   : > { %6722 = shalt.err (!%p6719_p9)
}
  0x6e   : > { %s6723_s28 = scalar_lea.vmem %s307_s24, 8192  ;;  %p6731_p13 = scmp.lt.s32.totalorder %s307_s24, %s307_s24 }
  0x6f   : > { %p6724_p10 = scmp.ne.s32.totalorder %s307_s24, %s6723_s28  ;;  %p6732_p0 = scmp.lt.s32.totalorder %s6723_s28, %s6723_s28 }
  0x71   : > { %p6726_p11 = pnand %p6724_p10, %p7026_p7  ;;  %p6733_p2 = por %p6732_p0, %p6731_p13 }
  0x73   : > { %p6727_p12 = pneg %p6726_p11 }
  0x75   : > { %p6734_p3 = pnand %p6733_p2, %p6727_p12 }
  0x77   : > { %6737 = shalt.err (!%p6734_p3)
}
  0x78   : > { %s8281_s25 = smov 128   ;;  %s8283_s18 = smov 8  }
  0x79   : > { %6523 = dma.hbm_to_vmem [thread:$0]  (!%p7010_p5), %s8268_s1, 8192, %s307_s24, [#allocation5], %s8281_s25, %s8281_s25, %s8283_s18  }
  0x7a   : > { %s6917_s19 = smov [#allocation8]   ;;  %s6918_s29 = smov [#allocation11]  }
  0x7b   : > { %s330_s27 = sshll.u32 %s6917_s19, 4  ;;  %s354_s30 = sshll.u32 %s6918_s29, 4  ;;  %s331_s27 = int_to_ptr.vmem [resolvable:$true] %s330_s27  ;;  %s7140_s30 = int_to_ptr.vmem [resolvable:$true] %s354_s30 }
  0x7c   : > { %s6738_s14 = scalar_lea.hbm %s8270_s3, 8192 }
  0x7d   : > { %p6739_p2 = scmp.ne.s32.totalorder %s8270_s3, %s6738_s14  ;;  %p6745_p4 = scmp.lt.u32.totalorder %s6738_s14, %s8270_s3 }
  0x7f   : > { %p6741_p3 = pnand %p6739_p2, %p7026_p7 }
  0x81   : > { %p6742_p1 = pneg %p6741_p3 }
  0x83   : > { %p6747_p6 = pnand %p6745_p4, %p6742_p1 }
  0x85   : > { %6750 = shalt.err (!%p6747_p6)
}
  0x86   : > { %s6751_s23 = scalar_lea.vmem %s331_s27, 8192  ;;  %p6759_p11 = scmp.lt.s32.totalorder %s331_s27, %s331_s27 }
  0x87   : > { %p6752_p8 = scmp.ne.s32.totalorder %s331_s27, %s6751_s23  ;;  %p6760_p12 = scmp.lt.s32.totalorder %s6751_s23, %s6751_s23 }
  0x89   : > { %p6754_p9 = pnand %p6752_p8, %p7026_p7  ;;  %p6761_p13 = por %p6760_p12, %p6759_p11 }
  0x8b   : > { %p6755_p10 = pneg %p6754_p9 }
  0x8d   : > { %p6762_p0 = pnand %p6761_p13, %p6755_p10 }
  0x8f   : > { %6765 = shalt.err (!%p6762_p0)
}
  0x90   : > { %6529 = dma.hbm_to_vmem [thread:$0]  (!%p7010_p5), %s8270_s3, 8192, %s331_s27, [#allocation7], %s8281_s25, %s8281_s25, %s8283_s18  }
  0x91   : > { %s6766_s14 = scalar_lea.hbm %s8272_s5, 36864 }
  0x92   : > { %p6767_p2 = scmp.ne.s32.totalorder %s8272_s5, %s6766_s14  ;;  %p6773_p4 = scmp.lt.u32.totalorder %s6766_s14, %s8272_s5 }
  0x94   : > { %p6769_p3 = pnand %p6767_p2, %p7026_p7 }
  0x96   : > { %p6770_p1 = pneg %p6769_p3 }
  0x98   : > { %p6775_p6 = pnand %p6773_p4, %p6770_p1 }
  0x9a   : > { %6778 = shalt.err (!%p6775_p6)
}
  0x9b   : > { %s6779_s27 = scalar_lea.vmem %s7140_s30, 36864  ;;  %p6787_p11 = scmp.lt.s32.totalorder %s7140_s30, %s7140_s30 }
  0x9c   : > { %p6780_p8 = scmp.ne.s32.totalorder %s7140_s30, %s6779_s27  ;;  %p6788_p12 = scmp.lt.s32.totalorder %s6779_s27, %s6779_s27 }
  0x9e   : > { %p6782_p9 = pnand %p6780_p8, %p7026_p7  ;;  %p6789_p13 = por %p6788_p12, %p6787_p11 }
  0xa0   : > { %p6783_p10 = pneg %p6782_p9 }
  0xa2   : > { %p6790_p0 = pnand %p6789_p13, %p6783_p10 }
  0xa4   : > { %6793 = shalt.err (!%p6790_p0)
}
  0xa5   : > { %s6919_s23 = smov 256   ;;  %s6920_s19 = smov 16  }
  0xa6   : > { %6535 = dma.hbm_to_vmem [thread:$0]  (!%p7010_p5), %s8272_s5, 36864, %s7140_s30, [#allocation10], %s6919_s23, %s6919_s23, %s6920_s19  }
  0xa7   : > { %s6921_s13 = smov [#allocation14]   ;;  %s6922_s16 = smov [#allocation17]  }
  0xa8   : > { %s378_s14 = sshll.u32 %s6921_s13, 4  ;;  %s402_s28 = sshll.u32 %s6922_s16, 4  ;;  %s379_s14 = int_to_ptr.vmem [resolvable:$true] %s378_s14  ;;  %s7186_s28 = int_to_ptr.vmem [resolvable:$true] %s402_s28 }
  0xa9   : > { %s6794_s27 = scalar_lea.hbm %s8274_s7, 4096 }
  0xaa   : > { %p6795_p2 = scmp.ne.s32.totalorder %s8274_s7, %s6794_s27  ;;  %p6801_p4 = scmp.lt.u32.totalorder %s6794_s27, %s8274_s7 }
  0xac   : > { %p6797_p3 = pnand %p6795_p2, %p7026_p7 }
  0xae   : > { %p6798_p1 = pneg %p6797_p3 }
  0xb0   : > { %p6803_p6 = pnand %p6801_p4, %p6798_p1 }
  0xb2   : > { %6806 = shalt.err (!%p6803_p6)
}
  0xb3   : > { %s6807_s23 = scalar_lea.vmem %s379_s14, 4096  ;;  %p6815_p11 = scmp.lt.s32.totalorder %s379_s14, %s379_s14 }
  0xb4   : > { %p6808_p8 = scmp.ne.s32.totalorder %s379_s14, %s6807_s23  ;;  %p6816_p12 = scmp.lt.s32.totalorder %s6807_s23, %s6807_s23 }
  0xb6   : > { %p6810_p9 = pnand %p6808_p8, %p7026_p7  ;;  %p6817_p13 = por %p6816_p12, %p6815_p11 }
  0xb8   : > { %p6811_p10 = pneg %p6810_p9 }
  0xba   : > { %p6818_p0 = pnand %p6817_p13, %p6811_p10 }
  0xbc   : > { %6821 = shalt.err (!%p6818_p0)
}
  0xbd   : > { %s8300_s25 = smov 8   ;;  %s8301_s18 = smov 128  }
  0xbe   : > { %6541 = dma.hbm_to_vmem [thread:$0]  (!%p7010_p5), %s8274_s7, 4096, %s379_s14, [#allocation13], %s8301_s18, %s8301_s18, %s8300_s25  }
  0xbf   : > { %s6822_s22 = scalar_lea.hbm %s8276_s9, 2048 }
  0xc0   : > { %p6823_p2 = scmp.ne.s32.totalorder %s8276_s9, %s6822_s22  ;;  %p6829_p4 = scmp.lt.u32.totalorder %s6822_s22, %s8276_s9 }
  0xc2   : > { %p6825_p3 = pnand %p6823_p2, %p7026_p7 }
  0xc4   : > { %p6826_p1 = pneg %p6825_p3 }
  0xc6   : > { %p6831_p6 = pnand %p6829_p4, %p6826_p1 }
  0xc8   : > { %6834 = shalt.err (!%p6831_p6)
}
  0xc9   : > { %s6835_s14 = scalar_lea.vmem %s7186_s28, 2048  ;;  %p6843_p11 = scmp.lt.s32.totalorder %s7186_s28, %s7186_s28 }
  0xca   : > { %p6836_p8 = scmp.ne.s32.totalorder %s7186_s28, %s6835_s14  ;;  %p6844_p12 = scmp.lt.s32.totalorder %s6835_s14, %s6835_s14 }
  0xcc   : > { %p6838_p9 = pnand %p6836_p8, %p7026_p7  ;;  %p6845_p13 = por %p6844_p12, %p6843_p11 }
  0xce   : > { %p6839_p10 = pneg %p6838_p9 }
  0xd0   : > { %p6846_p0 = pnand %p6845_p13, %p6839_p10 }
  0xd2   : > { %6849 = shalt.err (!%p6846_p0)
}
  0xd3   : > { %6547 = dma.hbm_to_vmem [thread:$0]  (!%p7010_p5), %s8276_s9, 2048, %s7186_s28, [#allocation16], %s8301_s18, %s8301_s18, %s8300_s25  }
  0xd4   : > { %s6923_s12 = smov [#allocation18]   ;;  %s6850_s24 = scalar_lea.hbm %s8277_s10, 16 }
  0xd5   : > { %s416_s13 = sshll.u32 %s6923_s12, 4  ;;  %p6851_p2 = scmp.ne.s32.totalorder %s8277_s10, %s6850_s24  ;;  %s417_s13 = int_to_ptr.vmem [resolvable:$true] %s416_s13 }
  0xd6   : > { %p6857_p4 = scmp.lt.u32.totalorder %s6850_s24, %s8277_s10 }
  0xd7   : > { %p6853_p3 = pnand %p6851_p2, %p7026_p7 }
  0xd9   : > { %p6854_p1 = pneg %p6853_p3 }
  0xdb   : > { %p6859_p6 = pnand %p6857_p4, %p6854_p1 }
  0xdd   : > { %6862 = shalt.err (!%p6859_p6)
}
  0xde   : > { %s6863_s28 = scalar_lea.vmem %s417_s13, 16  ;;  %s6870_s25 = scalar_lea.vmem %s417_s13, 32 }
  0xdf   : > { %p6864_p8 = scmp.ne.s32.totalorder %s417_s13, %s6863_s28  ;;  %p6871_p11 = scmp.lt.s32.totalorder %s417_s13, %s417_s13 }
  0xe0   : > { %p6872_p12 = scmp.lt.s32.totalorder %s6870_s25, %s6863_s28 }
  0xe1   : > { %p6866_p9 = pnand %p6864_p8, %p7026_p7 }
  0xe2   : > { %p6873_p13 = por %p6872_p12, %p6871_p11 }
  0xe3   : > { %p6867_p10 = pneg %p6866_p9 }
  0xe5   : > { %p6874_p0 = pnand %p6873_p13, %p6867_p10 }
  0xe7   : > { %6877 = shalt.err (!%p6874_p0)
}
  0xe8   : > { %6550 = dma.hbm_to_vmem [thread:$0]  (!%p7010_p5), %s8277_s10, 16, %s417_s13, [#allocation19]  }
  0xe9   : > { %p8302_p2 = scmp.ne.s32.totalorder %s8297_s21, 0 }
  0xeb   : > { %437 = sbr.rel (%p8302_p2) target bundleno = 1952 (0x7a0), region = 64 }
  0xf2   : > { %p8303_p3 = scmp.eq.s32.totalorder %s6993_s20, 0 }
  0xf4   : > { %6883 = dma.done.wait (%p8303_p3), [#allocation5], 8192   ;;  %p8304_p7 = pmov %p8303_p3 }
  0xf5   : > { %p8305_p1 = pmov %p8303_p3 }
  0xf6   : > { %6885 = vsyncadd (%p8304_p7), [#allocation5], 4294959104 }
  0xf7   : > { %6887 = dma.done.wait (%p8305_p1), [#allocation7], 8208   ;;  %p8306_p4 = pmov %p8305_p1 }
  0xf8   : > { %p8307_p6 = pmov %p8305_p1 }
  0xf9   : > { %6889 = vsyncadd (%p8306_p4), [#allocation7], 4294959088 }
  0xfa   : > { %6891 = dma.done.wait (%p8307_p6), [#allocation10], 36880   ;;  %p8308_p5 = pmov %p8305_p1 }
  0xfb   : > { %p8309_p8 = pmov %p8305_p1 }
  0xfc   : > { %6893 = vsyncadd (%p8308_p5), [#allocation10], 4294930416 }
  0xfd   : > { %6895 = dma.done.wait (%p8309_p8), [#allocation13], 4128   ;;  %p8310_p9 = pmov %p8305_p1 }
  0xfe   : > { %p8311_p10 = pmov %p8305_p1 }
  0xff   : > { %6897 = vsyncadd (%p8310_p9), [#allocation13], 4294963168 }
 0x100   : > { %6899 = dma.done.wait (%p8311_p10), [#allocation16], 2064   ;;  %p8312_p11 = pmov %p8305_p1 }
 0x101   : > { %p8313_p12 = pmov %p8305_p1 }
 0x102   : > { %6901 = vsyncadd (%p8312_p11), [#allocation16], 4294965232 }
 0x103   : > { %6903 = dma.done.wait (%p8313_p12), [#allocation19], 16   ;;  %p8314_p13 = pmov %p8305_p1 }
 0x104   : > { %p512_p0 = scmp.lt.s32.totalorder %s6993_s20, 1  ;;  %v563_v0 = vld [vmem:[#allocation4] sm:$0xff]  ;;  %v564_v1 = vld [vmem:[#allocation4 + $0x8] sm:$0xff]  ;;  %v565_v2 = vld [vmem:[#allocation4 + $0x10] sm:$0xff]  ;;  %vm6926_vm0 = vmmov 0  }
 0x105   : > { %6905 = vsyncadd (%p8314_p13), [#allocation19], 4294967280  ;;  %v7284_v3 = vpack.c.bf16 %v564_v1, %v563_v0  ;;  %v566_v4 = vld [vmem:[#allocation4 + $0x18] sm:$0xff]  ;;  %v567_v6 = vld [vmem:[#allocation4 + $0x20] sm:$0xff] }
 0x106   : > { %s8340_s20 = smov (!%p512_p0, %s6993_s20), 1  ;;  %v7286_v5 = vpack.c.bf16 %v566_v4, %v565_v2  ;;  %v568_v7 = vld [vmem:[#allocation4 + $0x28] sm:$0xff]  ;;  %v612_v10 = vld [vmem:[#allocation4 + $0x80] sm:$0xff]  ;;  %v569_v11 = vld [vmem:[#allocation4 + $0x30] sm:$0xff] }
 0x107   : > { %s6479_s21 = smul.u32 296, %s8340_s20  ;;  %5694 = vmatprep.subr.bf16.mxu0 %v7284_v3  ;;  %v7296_v8 = vpack.c.bf16 %v568_v7, %v567_v6  ;;  %v570_v12 = vld [vmem:[#allocation4 + $0x38] sm:$0xff]  ;;  %v613_v13 = vld [vmem:[#allocation4 + $0x88] sm:$0xff]  ;;  %v614_v15 = vld [vmem:[#allocation4 + $0x90] sm:$0xff]  ;;  %s4534_s12 = sshll.u32 %s8340_s20, 3 }
 0x108   : > { %5696 = vmatpush3.bf16.msra.mxu0 %v7284_v3  ;;  %v5661_v14 = vpack.c.bf16 %v613_v13, %v612_v10  ;;  %v615_v16 = vld [vmem:[#allocation4 + $0x98] sm:$0xff]  ;;  %v7301_v17 = vpack.c.bf16 %v570_v12, %v569_v11  ;;  %v616_v19 = vld [vmem:[#allocation4 + $0xa0] sm:$0xff]  ;;  %v572_v21 = vld [vmem:[#allocation4 + $0x48] sm:$0xff]  ;;  %s520_s22 = scalar_lea.vmem %s8278_s11, %s4534_s12 }
 0x109   : > { %s7291_s19 = scalar_lea.vmem %s8267_s0, %s6479_s21  ;;  %5698 = vmatprep.subr.bf16.mxu0 %v7286_v5  ;;  %v5665_v18 = vpack.c.bf16 %v615_v16, %v614_v15  ;;  %v571_v20 = vld [vmem:[#allocation4 + $0x40] sm:$0xff]  ;;  %v617_v22 = vld [vmem:[#allocation4 + $0xa8] sm:$0xff]  ;;  %v618_v24 = vld [vmem:[#allocation4 + $0xb0] sm:$0xff] }
 0x10a   : > { %v531_v9 = vld [vmem:[%s7291_s19] sm:$0xff]  ;;  %5662 = vmatprep.subr.bf16.mxu1 %v5661_v14  ;;  %v5669_v23 = vpack.c.bf16 %v617_v22, %v616_v19  ;;  %v619_v25 = vld [vmem:[#allocation4 + $0xb8] sm:$0xff]  ;;  %v7305_v26 = vpack.c.bf16 %v572_v21, %v571_v20  ;;  %v620_v30 = vld [vmem:[#allocation4 + $0xc0] sm:$0xff] }
 0x10b   : > { %5098 = vmatprep.mubr.f32.mxu0 %v531_v9  ;;  %5664 = vmatpush3.bf16.msra.mxu1 %v5661_v14  ;;  %v573_v27 = vld [vmem:[#allocation4 + $0x50] sm:$0xff]  ;;  %v574_v28 = vld [vmem:[#allocation4 + $0x58] sm:$0xff]  ;;  %v5673_v29 = vpack.c.bf16 %v619_v25, %v618_v24  ;;  %v621_v31 = vld [vmem:[#allocation4 + $0xc8] sm:$0xff] }
 0x10c   : > { %5700 = vmatpush3.bf16.msra.mxu0 %v7286_v5  ;;  %5666 = vmatprep.subr.bf16.mxu1 %v5665_v18  ;;  %v7309_v32 = vpack.c.bf16 %v574_v28, %v573_v27  ;;  %v575_v33 = vld [vmem:[#allocation4 + $0x60] sm:$0xff]  ;;  %v576_v34 = vld [vmem:[#allocation4 + $0x68] sm:$0xff]  ;;  %v5677_v35 = vpack.c.bf16 %v621_v31, %v620_v30  ;;  %v622_v36 = vld [vmem:[#allocation4 + $0xd0] sm:$0xff] }
 0x10d   : > { %5702 = vmatprep.subr.bf16.mxu0 %v7296_v8  ;;  %v623_v37 = vld [vmem:[#allocation4 + $0xd8] sm:$0xff]  ;;  %v7313_v38 = vpack.c.bf16 %v576_v34, %v575_v33  ;;  %v577_v40 = vld [vmem:[#allocation4 + $0x70] sm:$0xff]  ;;  %v624_v43 = vld [vmem:[#allocation4 + $0xe0] sm:$0xff] }
 0x10e   : > { %v579_v39 = vld [vmem:[%s7291_s19 + $0x1] sm:$0xff]  ;;  %v5681_v42 = vpack.c.bf16 %v623_v37, %v622_v36  ;;  %v625_v44 = vld [vmem:[#allocation4 + $0xe8] sm:$0xff]  ;;  %v1111_v46 = vld [vmem:[#allocation4 + $0x100] sm:$0xff] }
 0x10f   : > { %5668 = vmatpush3.bf16.msra.mxu1 %v5665_v18  ;;  %v578_v41 = vld [vmem:[#allocation4 + $0x78] sm:$0xff]  ;;  %5018 = vmatprep.mubr.f32.mxu1 %v579_v39  ;;  %v1112_v47 = vld [vmem:[#allocation4 + $0x108] sm:$0xff]  ;;  %v5685_v48 = vpack.c.bf16 %v625_v44, %v624_v43  ;;  %v626_v49 = vld [vmem:[#allocation4 + $0xf0] sm:$0xff] }
 0x110   : > { %5704 = vmatpush3.bf16.msra.mxu0 %v7296_v8  ;;  %5670 = vmatprep.subr.bf16.mxu1 %v5669_v23  ;;  %v7318_v45 = vpack.c.bf16 %v578_v41, %v577_v40  ;;  %v627_v50 = vld [vmem:[#allocation4 + $0xf8] sm:$0xff]  ;;  %v5725_v51 = vpack.c.bf16 %v1112_v47, %v1111_v46  ;;  %v1113_v52 = vld [vmem:[#allocation4 + $0x110] sm:$0xff]  ;;  %v7325_v56 = vld [vmem:[%s7291_s19 + $0x10] sm:$0xff] }
 0x111   : > { %5706 = vmatprep.subr.bf16.mxu0 %v7301_v17  ;;  %v1114_v53 = vld [vmem:[#allocation4 + $0x118] sm:$0xff]  ;;  %v5689_v54 = vpack.c.bf16 %v627_v50, %v626_v49  ;;  %v1115_v58 = vld [vmem:[#allocation4 + $0x120] sm:$0xff]  ;;  %v1116_v59 = vld [vmem:[#allocation4 + $0x128] sm:$0xff] }
 0x112   : > { %v532_v55 = vld [vmem:[%s7291_s19 + $0x8] sm:$0xff]  ;;  %v5729_v57 = vpack.c.bf16 %v1114_v53, %v1113_v52  ;;  %v7329_v60 = vld [vmem:[%s7291_s19 + $0x18] sm:$0xff]  ;;  %v7332_v61 = vld [vmem:[%s7291_s19 + $0x20] sm:$0xff]  ;;  %v5733_v62 = vpack.c.bf16 %v1116_v59, %v1115_v58 }
 0x113   : > { %5672 = vmatpush3.bf16.msra.mxu1 %v5669_v23  ;;  %v1117_v63 = vld [vmem:[#allocation4 + $0x130] sm:$0xff]  ;;  %v1118_v0 = vld [vmem:[#allocation4 + $0x138] sm:$0xff]  ;;  %v7337_v2 = vld [vmem:[%s7291_s19 + $0x11] sm:$0xff] }
 0x114   : > { %5708 = vmatpush3.bf16.msra.mxu0 %v7301_v17  ;;  %5674 = vmatprep.subr.bf16.mxu1 %v5673_v29  ;;  %v580_v1 = vld [vmem:[%s7291_s19 + $0x9] sm:$0xff]  ;;  %v5737_v7 = vpack.c.bf16 %v1118_v0, %v1117_v63  ;;  %v1120_v10 = vld [vmem:[#allocation4 + $0x148] sm:$0xff]  ;;  %v7354_v12 = vld [vmem:[%s7291_s19 + $0x21] sm:$0xff] }
 0x115   : > { %5710 = vmatprep.subr.bf16.mxu0 %v7305_v26  ;;  %v7342_v4 = vld [vmem:[%s7291_s19 + $0x28] sm:$0xff]  ;;  %v7345_v6 = vld [vmem:[%s7291_s19 + $0x30] sm:$0xff]  ;;  %v7349_v11 = vld [vmem:[%s7291_s19 + $0x19] sm:$0xff] }
 0x116   : > { %v1119_v9 = vld [vmem:[#allocation4 + $0x140] sm:$0xff]  ;;  %v7359_v13 = vld [vmem:[%s7291_s19 + $0x38] sm:$0xff]  ;;  %v7362_v14 = vld [vmem:[%s7291_s19 + $0x40] sm:$0xff] }
 0x117   : > { %5676 = vmatpush3.bf16.msra.mxu1 %v5673_v29  ;;  %v5741_v15 = vpack.c.bf16 %v1120_v10, %v1119_v9  ;;  %v1122_v16 = vld [vmem:[#allocation4 + $0x158] sm:$0xff]  ;;  %v7372_v19 = vld [vmem:[%s7291_s19 + $0x31] sm:$0xff]  ;;  %v7385_v24 = vld [vmem:[%s7291_s19 + $0x39] sm:$0xff] }
 0x118   : > { %5712 = vmatpush3.bf16.msra.mxu0 %v7305_v26  ;;  %5678 = vmatprep.subr.bf16.mxu1 %v5677_v35  ;;  %v7367_v18 = vld [vmem:[%s7291_s19 + $0x29] sm:$0xff]  ;;  %v1124_v23 = vld [vmem:[#allocation4 + $0x168] sm:$0xff]  ;;  %v7390_v25 = vld [vmem:[%s7291_s19 + $0x41] sm:$0xff] }
 0x119   : > { %5714 = vmatprep.subr.bf16.mxu0 %v7309_v32  ;;  %v7377_v20 = vld [vmem:[%s7291_s19 + $0x48] sm:$0xff]  ;;  %v7380_v21 = vld [vmem:[%s7291_s19 + $0x50] sm:$0xff]  ;;  %v7395_v27 = vld [vmem:[%s7291_s19 + $0x58] sm:$0xff] }
 0x11a   : > { %v7398_v28 = vld [vmem:[%s7291_s19 + $0x60] sm:$0xff]  ;;  %v1126_v30 = vld [vmem:[#allocation4 + $0x178] sm:$0xff]  ;;  %v7408_v33 = vld [vmem:[%s7291_s19 + $0x51] sm:$0xff] }
 0x11b   : > { %5680 = vmatpush3.bf16.msra.mxu1 %v5677_v35  ;;  %v7403_v31 = vld [vmem:[%s7291_s19 + $0x49] sm:$0xff]  ;;  %v1418_v37 = vld [vmem:[#allocation4 + $0x188] sm:$0xff]  ;;  %v7426_v40 = vld [vmem:[%s7291_s19 + $0x61] sm:$0xff] }
 0x11c   : > { %5716 = vmatpush3.bf16.msra.mxu0 %v7309_v32  ;;  %5682 = vmatprep.subr.bf16.mxu1 %v5681_v42  ;;  %v7413_v34 = vld [vmem:[%s7291_s19 + $0x68] sm:$0xff]  ;;  %v7416_v35 = vld [vmem:[%s7291_s19 + $0x70] sm:$0xff]  ;;  %v7421_v39 = vld [vmem:[%s7291_s19 + $0x59] sm:$0xff] }
 0x11d   : > { %5718 = vmatprep.subr.bf16.mxu0 %v7313_v38  ;;  %v7431_v41 = vld [vmem:[%s7291_s19 + $0x78] sm:$0xff]  ;;  %v1419_v43 = vld [vmem:[#allocation4 + $0x190] sm:$0xff]  ;;  %v1420_v44 = vld [vmem:[#allocation4 + $0x198] sm:$0xff] }
 0x11e   : > { %v7441_v46 = vld [vmem:[%s7291_s19 + $0x71] sm:$0xff]  ;;  %v5761_v47 = vpack.c.bf16 %v1420_v44, %v1419_v43  ;;  %v7448_v50 = vld [vmem:[%s7291_s19 + $0x79] sm:$0xff]  ;;  %v1424_v53 = vld [vmem:[#allocation4 + $0x1b8] sm:$0xff] }
 0x11f   : > { %5684 = vmatpush3.bf16.msra.mxu1 %v5681_v42  ;;  %v1422_v49 = vld [vmem:[#allocation4 + $0x1a8] sm:$0xff]  ;;  %v1423_v52 = vld [vmem:[#allocation4 + $0x1b0] sm:$0xff]  ;;  %v7501_v10 = vld [vmem:[%s7291_s19 + $0xc9] sm:$0xff] }
 0x120   : > { %5720 = vmatpush3.bf16.msra.mxu0 %v7313_v38  ;;  %5686 = vmatprep.subr.bf16.mxu1 %v5685_v48  ;;  %v7471_v58 = vld [vmem:[%s7291_s19 + $0x99] sm:$0xff]  ;;  %v7485_v63 = vld [vmem:[%s7291_s19 + $0xb1] sm:$0xff]  ;;  %v1105_v43 = vld [vmem:[%s7291_s19 + $0xe8] sm:$0xff] }
 0x121   : > { %5722 = vmatprep.subr.bf16.mxu0 %v7318_v45  ;;  %v1106_v44 = vld [vmem:[%s7291_s19 + $0xf0] sm:$0xff] }
 0x123   : > { %5688 = vmatpush3.bf16.msra.mxu1 %v5685_v48  ;;  %v1421_v48 = vld [vmem:[#allocation4 + $0x1a0] sm:$0xff] }
 0x124   : > { %5724 = vmatpush3.bf16.msra.mxu0 %v7318_v45  ;;  %5690 = vmatprep.subr.bf16.mxu1 %v5689_v54 }
 0x125   : > { %5726 = vmatprep.subr.bf16.mxu0 %v5725_v51 }
 0x127   : > { %5099 = vmatmul.mubr.f32.vlgmr.msra.gmra.mrb[0].mxu0 %v532_v55  ;;  %5692 = vmatpush3.bf16.msra.mxu1 %v5689_v54  ;;  %v7465_v54 = vld [vmem:[%s7291_s19 + $0x91] sm:$0xff]  ;;  %v5769_v55 = vpack.c.bf16 %v1424_v53, %v1423_v52  ;;  %v2080_v53 = vld [vmem:[#allocation8 + $0xd0] sm:$0xff] }
 0x128   : > { %5728 = vmatpush3.bf16.msra.mxu0 %v5725_v51  ;;  %5101 = vmatprep.mubr.f32.mxu0 %v7325_v56  ;;  %v5765_v51 = vpack.c.bf16 %v1422_v49, %v1421_v48  ;;  %v1108_v48 = vld [vmem:[%s7291_s19 + $0x100] sm:$0xff]  ;;  %v1109_v49 = vld [vmem:[%s7291_s19 + $0x108] sm:$0xff] }
 0x129   : > { %5730 = vmatprep.subr.bf16.mxu0 %v5729_v57  ;;  %6261 = vmatprep.subr.bf16.mxu1 %v7284_v3 }
 0x12a   : > { %5019 = vmatmul.mubr.f32.vlgmr.msra.gmra.mrb[0].mxu1 %v580_v1  ;;  %v7491_v1 = vld [vmem:[%s7291_s19 + $0xb9] sm:$0xff] }
 0x12b   : > { %5102 = vmatmul.mubr.f32.gmra.mrb[2].mxu0 %v7329_v60  ;;  %5021 = vmatprep.mubr.f32.mxu1 %v7337_v2 }
 0x12c   : > { %5732 = vmatpush3.bf16.msra.mxu0 %v5729_v57  ;;  %5104 = vmatprep.mubr.f32.mxu0 %v7332_v61  ;;  %v1426_v57 = vld [vmem:[#allocation4 + $0x1c8] sm:$0xff] }
 0x12d   : > { %5734 = vmatprep.subr.bf16.mxu0 %v5733_v62  ;;  %6269 = vmatpush3.bf16.msra.mxu1 %v7284_v3  ;;  %v1121_v3 = vld [vmem:[#allocation4 + $0x150] sm:$0xff] }
 0x12e   : > { %6262 = vmatprep.subr.bf16.mxu1 %v7286_v5  ;;  %5022 = vmatmul.mubr.f32.gmra.mrb[2].mxu1 %v7349_v11  ;;  %v5745_v22 = vpack.c.bf16 %v1122_v16, %v1121_v3  ;;  %v1092_v3 = vld [vmem:[%s7291_s19 + $0x80] sm:$0xff] }
 0x12f   : > { %5105 = vmatmul.mubr.f32.gmra.mrb[4].mxu0 %v7342_v4  ;;  %5024 = vmatprep.mubr.f32.mxu1 %v7354_v12 }
 0x130   : > { %5736 = vmatpush3.bf16.msra.mxu0 %v5733_v62  ;;  %5107 = vmatprep.mubr.f32.mxu0 %v7345_v6  ;;  %v1428_v62 = vld [vmem:[#allocation4 + $0x1d8] sm:$0xff] }
 0x131   : > { %5738 = vmatprep.subr.bf16.mxu0 %v5737_v7  ;;  %6270 = vmatpush3.bf16.msra.mxu1 %v7286_v5  ;;  %v1123_v5 = vld [vmem:[#allocation4 + $0x160] sm:$0xff] }
 0x132   : > { %6263 = vmatprep.subr.bf16.mxu1 %v7296_v8  ;;  %5025 = vmatmul.mubr.f32.gmra.mrb[4].mxu1 %v7367_v18  ;;  %v5749_v29 = vpack.c.bf16 %v1124_v23, %v1123_v5  ;;  %v1094_v5 = vld [vmem:[%s7291_s19 + $0x90] sm:$0xff] }
 0x133   : > { %5108 = vmatmul.mubr.f32.gmra.mrb[6].mxu0 %v7359_v13  ;;  %5027 = vmatprep.mubr.f32.mxu1 %v7372_v19  ;;  %v7523_v23 = vld [vmem:[%s7291_s19 + $0xe9] sm:$0xff] }
 0x134   : > { %5740 = vmatpush3.bf16.msra.mxu0 %v5737_v7  ;;  %5110 = vmatprep.mubr.f32.mxu0 %v7362_v14  ;;  %v7495_v7 = vld [vmem:[%s7291_s19 + $0xc1] sm:$0xff] }
 0x135   : > { %5742 = vmatprep.subr.bf16.mxu0 %v5741_v15  ;;  %6271 = vmatpush3.bf16.msra.mxu1 %v7296_v8  ;;  %v1125_v8 = vld [vmem:[#allocation4 + $0x170] sm:$0xff] }
 0x136   : > { %6264 = vmatprep.subr.bf16.mxu1 %v7301_v17  ;;  %5028 = vmatmul.mubr.f32.gmra.mrb[6].mxu1 %v7385_v24  ;;  %v5753_v36 = vpack.c.bf16 %v1126_v30, %v1125_v8  ;;  %v7533_v8 = vld [vmem:[%s7291_s19 + $0xf9] sm:$0xff]  ;;  %v1097_v30 = vld [vmem:[%s7291_s19 + $0xa8] sm:$0xff] }
 0x137   : > { %5111 = vmatmul.mubr.f32.gmra.mrb[8].mxu0 %v7377_v20  ;;  %5030 = vmatprep.mubr.f32.mxu1 %v7390_v25 }
 0x138   : > { %5744 = vmatpush3.bf16.msra.mxu0 %v5741_v15  ;;  %5113 = vmatprep.mubr.f32.mxu0 %v7380_v21  ;;  %v7505_v15 = vld [vmem:[%s7291_s19 + $0xd1] sm:$0xff] }
 0x139   : > { %5746 = vmatprep.subr.bf16.mxu0 %v5745_v22  ;;  %6272 = vmatpush3.bf16.msra.mxu1 %v7301_v17  ;;  %v1417_v17 = vld [vmem:[#allocation4 + $0x180] sm:$0xff] }
 0x13a   : > { %6265 = vmatprep.subr.bf16.mxu1 %v7305_v26  ;;  %5031 = vmatmul.mubr.f32.gmra.mrb[8].mxu1 %v7403_v31  ;;  %v5757_v42 = vpack.c.bf16 %v1418_v37, %v1417_v17  ;;  %v1101_v17 = vld [vmem:[%s7291_s19 + $0xc8] sm:$0xff]  ;;  %v1102_v37 = vld [vmem:[%s7291_s19 + $0xd0] sm:$0xff] }
 0x13b   : > { %5114 = vmatmul.mubr.f32.gmra.mrb[10].mxu0 %v7395_v27  ;;  %5033 = vmatprep.mubr.f32.mxu1 %v7408_v33 }
 0x13c   : > { %5748 = vmatpush3.bf16.msra.mxu0 %v5745_v22  ;;  %5116 = vmatprep.mubr.f32.mxu0 %v7398_v28  ;;  %v1093_v22 = vld [vmem:[%s7291_s19 + $0x88] sm:$0xff] }
 0x13d   : > { %5750 = vmatprep.subr.bf16.mxu0 %v5749_v29  ;;  %6273 = vmatpush3.bf16.msra.mxu1 %v7305_v26  ;;  %v7436_v26 = vld [vmem:[%s7291_s19 + $0x69] sm:$0xff] }
 0x13e   : > { %6266 = vmatprep.subr.bf16.mxu1 %v7309_v32  ;;  %5034 = vmatmul.mubr.f32.gmra.mrb[10].mxu1 %v7421_v39 }
 0x13f   : > { %5117 = vmatmul.mubr.f32.gmra.mrb[12].mxu0 %v7413_v34  ;;  %5036 = vmatprep.mubr.f32.mxu1 %v7426_v40 }
 0x140   : > { %5752 = vmatpush3.bf16.msra.mxu0 %v5749_v29  ;;  %5119 = vmatprep.mubr.f32.mxu0 %v7416_v35  ;;  %v1096_v29 = vld [vmem:[%s7291_s19 + $0xa0] sm:$0xff] }
 0x141   : > { %5754 = vmatprep.subr.bf16.mxu0 %v5753_v36  ;;  %6274 = vmatpush3.bf16.msra.mxu1 %v7309_v32  ;;  %v7453_v32 = vld [vmem:[%s7291_s19 + $0x81] sm:$0xff] }
 0x142   : > { %6267 = vmatprep.subr.bf16.mxu1 %v7313_v38  ;;  %5037 = vmatmul.mubr.f32.gmra.mrb[12].mxu1 %v7436_v26 }
 0x143   : > { %5120 = vmatmul.mubr.f32.gmra.mrb[14].mxu0 %v7431_v41  ;;  %5039 = vmatprep.mubr.f32.mxu1 %v7441_v46 }
 0x144   : > { %5756 = vmatpush3.bf16.msra.mxu0 %v5753_v36  ;;  %5178 = vmatprep.mubr.f32.mxu0 %v7325_v56  ;;  %v1425_v56 = vld [vmem:[#allocation4 + $0x1c0] sm:$0xff]  ;;  %v1100_v36 = vld [vmem:[%s7291_s19 + $0xc0] sm:$0xff] }
 0x145   : > { %5758 = vmatprep.subr.bf16.mxu0 %v5757_v42  ;;  %6275 = vmatpush3.bf16.msra.mxu1 %v7313_v38  ;;  %v7460_v38 = vld [vmem:[%s7291_s19 + $0x89] sm:$0xff]  ;;  %v5773_v59 = vpack.c.bf16 %v1426_v57, %v1425_v56  ;;  %v2083_v56 = vld [vmem:[#allocation8 + $0xe8] sm:$0xff] }
 0x146   : > { %6268 = vmatprep.subr.bf16.mxu1 %v7318_v45  ;;  %5040 = vmatmul.mubr.f32.gmra.mrb[14].mxu1 %v7448_v50 }
 0x147   : > { %5179 = vmatmul.mubr.f32.vlgmr.msra.gmra.mrb[0].mxu0 %v7329_v60  ;;  %5042 = vmatprep.mubr.f32.mxu1 %v7453_v32  ;;  %v7481_v60 = vld [vmem:[%s7291_s19 + $0xa9] sm:$0xff] }
 0x148   : > { %5760 = vmatpush3.bf16.msra.mxu0 %v5757_v42  ;;  %5181 = vmatprep.mubr.f32.mxu0 %v7332_v61  ;;  %v1427_v61 = vld [vmem:[#allocation4 + $0x1d0] sm:$0xff] }
 0x149   : > { %5762 = vmatprep.subr.bf16.mxu0 %v5761_v47  ;;  %6276 = vmatpush3.bf16.msra.mxu1 %v7318_v45  ;;  %v7475_v45 = vld [vmem:[%s7291_s19 + $0xa1] sm:$0xff]  ;;  %v5777_v0 = vpack.c.bf16 %v1428_v62, %v1427_v61 }
 0x14a   : > { %5043 = vmatmul.mubr.f32.gmra.mrb[16].mxu1 %v7460_v38  ;;  %v1104_v42 = vld [vmem:[%s7291_s19 + $0xe0] sm:$0xff] }
 0x14b   : > { %5182 = vmatmul.mubr.f32.gmra.mrb[2].mxu0 %v7342_v4  ;;  %5045 = vmatprep.mubr.f32.mxu1 %v7465_v54  ;;  %v1429_v4 = vld [vmem:[#allocation4 + $0x1e0] sm:$0xff] }
 0x14c   : > { %5184 = vmatprep.mubr.f32.mxu0 %v7345_v6  ;;  %5764 = vmatpush3.bf16.msra.mxu0 %v5761_v47  ;;  %v1430_v6 = vld [vmem:[#allocation4 + $0x1e8] sm:$0xff] }
 0x14d   : > { %5766 = vmatprep.subr.bf16.mxu0 %v5765_v51  ;;  %v5781_v9 = vpack.c.bf16 %v1430_v6, %v1429_v4  ;;  %v1107_v47 = vld [vmem:[%s7291_s19 + $0xf8] sm:$0xff] }
 0x14e   : > { %5046 = vmatmul.mubr.f32.gmra.mrb[18].mxu1 %v7471_v58  ;;  %v2021_v4 = vld [vmem:[#allocation8] sm:$0xff]  ;;  %v2022_v6 = vld [vmem:[#allocation8 + $0x8] sm:$0xff] }
 0x14f   : > { %5185 = vmatmul.mubr.f32.gmra.mrb[4].mxu0 %v7359_v13  ;;  %5048 = vmatprep.mubr.f32.mxu1 %v7475_v45  ;;  %v1431_v13 = vld [vmem:[#allocation4 + $0x1f0] sm:$0xff] }
 0x150   : > { %5187 = vmatprep.mubr.f32.mxu0 %v7362_v14  ;;  %5768 = vmatpush3.bf16.msra.mxu0 %v5765_v51  ;;  %v1432_v14 = vld [vmem:[#allocation4 + $0x1f8] sm:$0xff]  ;;  %v2079_v51 = vld [vmem:[#allocation8 + $0xc8] sm:$0xff] }
 0x151   : > { %5770 = vmatprep.subr.bf16.mxu0 %v5769_v55  ;;  %v5785_v16 = vpack.c.bf16 %v1432_v14, %v1431_v13 }
 0x152   : > { %5049 = vmatmul.mubr.f32.gmra.mrb[20].mxu1 %v7481_v60 }
 0x153   : > { %5188 = vmatmul.mubr.f32.gmra.mrb[6].mxu0 %v7377_v20  ;;  %5051 = vmatprep.mubr.f32.mxu1 %v7485_v63  ;;  %v7512_v20 = vld [vmem:[%s7291_s19 + $0xd9] sm:$0xff] }
 0x154   : > { %5190 = vmatprep.mubr.f32.mxu0 %v7380_v21  ;;  %5772 = vmatpush3.bf16.msra.mxu0 %v5769_v55  ;;  %v7516_v21 = vld [vmem:[%s7291_s19 + $0xe1] sm:$0xff]  ;;  %v2082_v55 = vld [vmem:[#allocation8 + $0xe0] sm:$0xff] }
 0x155   : > { %5774 = vmatprep.subr.bf16.mxu0 %v5773_v59  ;;  %v5813_v57 = vpack.c.bf16 %v2083_v56, %v2082_v55 }
 0x156   : > { %5052 = vmatmul.mubr.f32.gmra.mrb[22].mxu1 %v7491_v1 }
 0x157   : > { %5191 = vmatmul.mubr.f32.gmra.mrb[8].mxu0 %v7395_v27  ;;  %5054 = vmatprep.mubr.f32.mxu1 %v7495_v7  ;;  %v7526_v27 = vld [vmem:[%s7291_s19 + $0xf1] sm:$0xff] }
 0x158   : > { %5193 = vmatprep.mubr.f32.mxu0 %v7398_v28  ;;  %5776 = vmatpush3.bf16.msra.mxu0 %v5773_v59  ;;  %v1095_v28 = vld [vmem:[%s7291_s19 + $0x98] sm:$0xff] }
 0x159   : > { %5778 = vmatprep.subr.bf16.mxu0 %v5777_v0 }
 0x15a   : > { %5055 = vmatmul.mubr.f32.gmra.mrb[24].mxu1 %v7501_v10 }
 0x15b   : > { %5194 = vmatmul.mubr.f32.gmra.mrb[10].mxu0 %v7413_v34  ;;  %5057 = vmatprep.mubr.f32.mxu1 %v7505_v15  ;;  %v1098_v34 = vld [vmem:[%s7291_s19 + $0xb0] sm:$0xff] }
 0x15c   : > { %5196 = vmatprep.mubr.f32.mxu0 %v7416_v35  ;;  %5780 = vmatpush3.bf16.msra.mxu0 %v5777_v0  ;;  %v1099_v35 = vld [vmem:[%s7291_s19 + $0xb8] sm:$0xff] }
 0x15d   : > { %5782 = vmatprep.subr.bf16.mxu0 %v5781_v9 }
 0x15e   : > { %5058 = vmatmul.mubr.f32.gmra.mrb[26].mxu1 %v7512_v20 }
 0x15f   : > { %5197 = vmatmul.mubr.f32.gmra.mrb[12].mxu0 %v7431_v41  ;;  %5060 = vmatprep.mubr.f32.mxu1 %v7516_v21  ;;  %v1103_v41 = vld [vmem:[%s7291_s19 + $0xd8] sm:$0xff] }
 0x160   : > { %5199 = vmatprep.mubr.f32.mxu0 %v1092_v3  ;;  %5784 = vmatpush3.bf16.msra.mxu0 %v5781_v9 }
 0x161   : > { %5786 = vmatprep.subr.bf16.mxu0 %v5785_v16 }
 0x162   : > { %5061 = vmatmul.mubr.f32.gmra.mrb[28].mxu1 %v7523_v23 }
 0x163   : > { %5200 = vmatmul.mubr.f32.gmra.mrb[14].mxu0 %v1093_v22  ;;  %5063 = vmatprep.mubr.f32.mxu1 %v7526_v27 }
 0x164   : > { %5202 = vmatprep.mubr.f32.mxu0 %v1094_v5  ;;  %5788 = vmatpush3.bf16.msra.mxu0 %v5785_v16 }
 0x166   : > { %5064 = vmatmul.mubr.f32.gmra.mrb[30].mxu1 %v7533_v8 }
 0x167   : > { %5203 = vmatmul.mubr.f32.gmra.mrb[16].mxu0 %v1095_v28  ;;  %5122 = vmatprep.mubr.f32.mxu1 %v1092_v3 }
 0x168   : > { %5205 = vmatprep.mubr.f32.mxu0 %v1096_v29 }
 0x16a   : > { %5123 = vmatmul.mubr.f32.vlgmr.msra.gmra.mrb[16].mxu1 %v1093_v22 }
 0x16b   : > { %5206 = vmatmul.mubr.f32.gmra.mrb[18].mxu0 %v1097_v30  ;;  %5125 = vmatprep.mubr.f32.mxu1 %v1094_v5  ;;  %v6924_v5 = vmov 0.0  }
 0x16c   : > { %5208 = vmatprep.mubr.f32.mxu0 %v1098_v34  ;;  %521 = vst [vmem:[#allocation2 + $0x100] sm:$0xff] %v6924_v5  ;;  %522 = vst [vmem:[#allocation2 + $0x108] sm:$0xff] %v6924_v5 }
 0x16d   : > { %523 = vst [vmem:[#allocation2 + $0x110] sm:$0xff] %v6924_v5  ;;  %524 = vst [vmem:[#allocation2 + $0x118] sm:$0xff] %v6924_v5 }
 0x16e   : > { %5126 = vmatmul.mubr.f32.gmra.mrb[18].mxu1 %v1095_v28  ;;  %525 = vst [vmem:[#allocation2 + $0x120] sm:$0xff] %v6924_v5  ;;  %526 = vst [vmem:[#allocation3 + $0x100] sm:$0xff] %v6924_v5 }
 0x16f   : > { %5209 = vmatmul.mubr.f32.gmra.mrb[20].mxu0 %v1099_v35  ;;  %5128 = vmatprep.mubr.f32.mxu1 %v1096_v29  ;;  %527 = vst [vmem:[#allocation3 + $0x108] sm:$0xff] %v6924_v5  ;;  %528 = vst [vmem:[#allocation3 + $0x110] sm:$0xff] %v6924_v5 }
 0x170   : > { %5211 = vmatprep.mubr.f32.mxu0 %v1100_v36  ;;  %529 = vst [vmem:[#allocation3 + $0x118] sm:$0xff] %v6924_v5  ;;  %530 = vst [vmem:[#allocation3 + $0x120] sm:$0xff] %v6924_v5 }
 0x172   : > { %5129 = vmatmul.mubr.f32.gmra.mrb[20].mxu1 %v1097_v30 }
 0x173   : > { %5212 = vmatmul.mubr.f32.gmra.mrb[22].mxu0 %v1101_v17  ;;  %5131 = vmatprep.mubr.f32.mxu1 %v1098_v34 }
 0x174   : > { %5214 = vmatprep.mubr.f32.mxu0 %v1102_v37 }
 0x176   : > { %5132 = vmatmul.mubr.f32.gmra.mrb[22].mxu1 %v1099_v35 }
 0x177   : > { %5215 = vmatmul.mubr.f32.gmra.mrb[24].mxu0 %v1103_v41  ;;  %5134 = vmatprep.mubr.f32.mxu1 %v1100_v36 }
 0x178   : > { %5217 = vmatprep.mubr.f32.mxu0 %v1104_v42 }
 0x17a   : > { %5135 = vmatmul.mubr.f32.gmra.mrb[24].mxu1 %v1101_v17 }
 0x17b   : > { %5218 = vmatmul.mubr.f32.gmra.mrb[26].mxu0 %v1105_v43  ;;  %5137 = vmatprep.mubr.f32.mxu1 %v1102_v37 }
 0x17c   : > { %5220 = vmatprep.mubr.f32.mxu0 %v1106_v44 }
 0x17e   : > { %5138 = vmatmul.mubr.f32.gmra.mrb[26].mxu1 %v1103_v41 }
 0x17f   : > { %5221 = vmatmul.mubr.f32.gmra.mrb[28].mxu0 %v1107_v47  ;;  %5140 = vmatprep.mubr.f32.mxu1 %v1104_v42 }
 0x180   : > { %5223 = vmatprep.mubr.f32.mxu0 %v1108_v48 }
 0x182   : > { %5141 = vmatmul.mubr.f32.gmra.mrb[28].mxu1 %v1105_v43 }
 0x183   : > { %5224 = vmatmul.mubr.f32.gmra.mrb[30].mxu0 %v1109_v49  ;;  %5143 = vmatprep.mubr.f32.mxu1 %v1106_v44 }
 0x184   : > { %5258 = vmatprep.mubr.f32.mxu0 %v7337_v2  ;;  %v1414_v2 = vld [vmem:[%s7291_s19 + $0x101] sm:$0xff] }
 0x186   : > { %5144 = vmatmul.mubr.f32.gmra.mrb[30].mxu1 %v1107_v47  ;;  %v7634_v47 = vld [vmem:[#allocation6] ss:$0 sm:$0xff] }
 0x187   : > { %5259 = vmatmul.mubr.f32.vlgmr.msra.gmra.mrb[0].mxu0 %v7349_v11  ;;  %v1415_v11 = vld [vmem:[%s7291_s19 + $0x109] sm:$0xff] }
 0x188   : > { %5261 = vmatprep.mubr.f32.mxu0 %v7354_v12  ;;  %v2070_v12 = vld [vmem:[#allocation8 + $0x80] sm:$0xff] }
 0x18b   : > { %5262 = vmatmul.mubr.f32.gmra.mrb[2].mxu0 %v7367_v18  ;;  %v2071_v18 = vld [vmem:[#allocation8 + $0x88] sm:$0xff] }
 0x18c   : > { %5264 = vmatprep.mubr.f32.mxu0 %v7372_v19  ;;  %v5789_v19 = vpack.c.bf16 %v2071_v18, %v2070_v12 }
 0x18e   : > { %5790 = vmatprep.subr.bf16.mxu1 %v5789_v19 }
 0x18f   : > { %5265 = vmatmul.mubr.f32.gmra.mrb[4].mxu0 %v7385_v24  ;;  %5792 = vmatpush3.bf16.msra.mxu1 %v5789_v19  ;;  %v2072_v24 = vld [vmem:[#allocation8 + $0x90] sm:$0xff] }
 0x190   : > { %5267 = vmatprep.mubr.f32.mxu0 %v7390_v25  ;;  %v2073_v25 = vld [vmem:[#allocation8 + $0x98] sm:$0xff] }
 0x193   : > { %5268 = vmatmul.mubr.f32.gmra.mrb[6].mxu0 %v7403_v31  ;;  %v5793_v31 = vpack.c.bf16 %v2073_v25, %v2072_v24 }
 0x194   : > { %5270 = vmatprep.mubr.f32.mxu0 %v7408_v33  ;;  %v2074_v33 = vld [vmem:[#allocation8 + $0xa0] sm:$0xff] }
 0x195   : > { %5794 = vmatprep.subr.bf16.mxu1 %v5793_v31 }
 0x196   : > { %5796 = vmatpush3.bf16.msra.mxu1 %v5793_v31 }
 0x197   : > { %5271 = vmatmul.mubr.f32.gmra.mrb[8].mxu0 %v7421_v39  ;;  %v2075_v39 = vld [vmem:[#allocation8 + $0xa8] sm:$0xff] }
 0x198   : > { %5273 = vmatprep.mubr.f32.mxu0 %v7426_v40  ;;  %v5797_v40 = vpack.c.bf16 %v2075_v39, %v2074_v33 }
 0x19a   : > { %5798 = vmatprep.subr.bf16.mxu1 %v5797_v40 }
 0x19b   : > { %5274 = vmatmul.mubr.f32.gmra.mrb[10].mxu0 %v7436_v26  ;;  %5800 = vmatpush3.bf16.msra.mxu1 %v5797_v40  ;;  %v2076_v26 = vld [vmem:[#allocation8 + $0xb0] sm:$0xff] }
 0x19c   : > { %5276 = vmatprep.mubr.f32.mxu0 %v7441_v46  ;;  %v2077_v46 = vld [vmem:[#allocation8 + $0xb8] sm:$0xff] }
 0x19f   : > { %5277 = vmatmul.mubr.f32.gmra.mrb[12].mxu0 %v7448_v50  ;;  %v5801_v50 = vpack.c.bf16 %v2077_v46, %v2076_v26 }
 0x1a0   : > { %5279 = vmatprep.mubr.f32.mxu0 %v7453_v32  ;;  %v2078_v32 = vld [vmem:[#allocation8 + $0xc0] sm:$0xff] }
 0x1a1   : > { %5802 = vmatprep.subr.bf16.mxu1 %v5801_v50  ;;  %v5805_v52 = vpack.c.bf16 %v2079_v51, %v2078_v32 }
 0x1a2   : > { %5804 = vmatpush3.bf16.msra.mxu1 %v5801_v50 }
 0x1a3   : > { %5280 = vmatmul.mubr.f32.gmra.mrb[14].mxu0 %v7460_v38  ;;  %5806 = vmatprep.subr.bf16.mxu1 %v5805_v52  ;;  %v2081_v38 = vld [vmem:[#allocation8 + $0xd8] sm:$0xff] }
 0x1a4   : > { %5282 = vmatprep.mubr.f32.mxu0 %v7465_v54  ;;  %v5809_v54 = vpack.c.bf16 %v2081_v38, %v2080_v53 }
 0x1a6   : > { %5808 = vmatpush3.bf16.msra.mxu1 %v5805_v52 }
 0x1a7   : > { %5283 = vmatmul.mubr.f32.gmra.mrb[16].mxu0 %v7471_v58  ;;  %5810 = vmatprep.subr.bf16.mxu1 %v5809_v54  ;;  %v2084_v58 = vld [vmem:[#allocation8 + $0xf0] sm:$0xff] }
 0x1a8   : > { %5285 = vmatprep.mubr.f32.mxu0 %v7475_v45  ;;  %v2085_v45 = vld [vmem:[#allocation8 + $0xf8] sm:$0xff] }
 0x1a9   : > { %v5817_v59 = vpack.c.bf16 %v2085_v45, %v2084_v58 }
 0x1aa   : > { %5812 = vmatpush3.bf16.msra.mxu1 %v5809_v54 }
 0x1ab   : > { %5286 = vmatmul.mubr.f32.gmra.mrb[18].mxu0 %v7481_v60  ;;  %5814 = vmatprep.subr.bf16.mxu1 %v5813_v57 }
 0x1ac   : > { %5288 = vmatprep.mubr.f32.mxu0 %v7485_v63 }
 0x1ae   : > { %5816 = vmatpush3.bf16.msra.mxu1 %v5813_v57 }
 0x1af   : > { %5289 = vmatmul.mubr.f32.gmra.mrb[20].mxu0 %v7491_v1  ;;  %5818 = vmatprep.subr.bf16.mxu1 %v5817_v59 }
 0x1b0   : > { %5291 = vmatprep.mubr.f32.mxu0 %v7495_v7  ;;  %v7583_v7 = vpack.c.bf16 %v2022_v6, %v2021_v4 }
 0x1b2   : > { %5820 = vmatpush3.bf16.msra.mxu1 %v5817_v59 }
 0x1b3   : > { %5292 = vmatmul.mubr.f32.gmra.mrb[22].mxu0 %v7501_v10  ;;  %5822 = vmatprep.subr.bf16.mxu1 %v7583_v7 }
 0x1b4   : > { %5294 = vmatprep.mubr.f32.mxu0 %v7505_v15 }
 0x1b7   : > { %5295 = vmatmul.mubr.f32.gmra.mrb[24].mxu0 %v7512_v20 }
 0x1b8   : > { %5297 = vmatprep.mubr.f32.mxu0 %v7516_v21 }
 0x1bb   : > { %5298 = vmatmul.mubr.f32.gmra.mrb[26].mxu0 %v7523_v23 }
 0x1bc   : > { %5300 = vmatprep.mubr.f32.mxu0 %v7526_v27 }
 0x1bf   : > { %5301 = vmatmul.mubr.f32.gmra.mrb[28].mxu0 %v7533_v8 }
 0x1c0   : > { %5303 = vmatprep.mubr.f32.mxu0 %v1414_v2 }
 0x1c3   : > { %5304 = vmatmul.mubr.f32.gmra.mrb[30].mxu0 %v1415_v11 }
 0x1fd   : > { %v5020_v60 = vpop.f32.mrb[0].mxu1 }
 0x1fe   : > { %v694_v61 = vpop.f32.mrb[1].mxu1 }
 0x201   : > { %v5023_v62 = vpop.f32.mrb[2].mxu1 }
 0x202   : > { %v704_v63 = vpop.f32.mrb[3].mxu1 }
 0x205   : > { %v5026_v0 = vpop.f32.mrb[4].mxu1 }
 0x206   : > { %v7581_v1 = vpop.f32.mrb[5].mxu1 }
 0x209   : > { %v7585_v9 = vpop.f32.mrb[6].mxu1 }
 0x20a   : > { %v7587_v10 = vpop.f32.mrb[7].mxu1 }
 0x20d   : > { %v7590_v13 = vpop.f32.mrb[8].mxu1 }
 0x20e   : > { %v7592_v14 = vpop.f32.mrb[9].mxu1 }
 0x211   : > { %v7594_v15 = vpop.f32.mrb[10].mxu1 }
 0x212   : > { %v7596_v3 = vpop.f32.mrb[11].mxu1 }
 0x215   : > { %v7598_v16 = vpop.f32.mrb[12].mxu1 }
 0x216   : > { %v7600_v20 = vpop.f32.mrb[13].mxu1 }
 0x219   : > { %v7602_v21 = vpop.f32.mrb[14].mxu1 }
 0x21a   : > { %v7604_v22 = vpop.f32.mrb[15].mxu1 }
 0x23d   : > { %v7606_v23 = vpop.f32.mrb[16].mxu1 }
 0x23e   : > { %v7608_v27 = vpop.f32.mrb[17].mxu1 }
 0x241   : > { %v7610_v28 = vpop.f32.mrb[18].mxu1 }
 0x242   : > { %v7612_v29 = vpop.f32.mrb[19].mxu1 }
 0x245   : > { %v7614_v8 = vpop.f32.mrb[20].mxu1 }
 0x246   : > { %v7616_v30 = vpop.f32.mrb[21].mxu1 }
 0x249   : > { %v7618_v34 = vpop.f32.mrb[22].mxu1 }
 0x24a   : > { %v7620_v35 = vpop.f32.mrb[23].mxu1 }
 0x24d   : > { %v7622_v36 = vpop.f32.mrb[24].mxu1 }
 0x24e   : > { %v7624_v17 = vpop.f32.mrb[25].mxu1 }
 0x251   : > { %v7626_v37 = vpop.f32.mrb[26].mxu1 }
 0x252   : > { %v7628_v41 = vpop.f32.mrb[27].mxu1 }
 0x255   : > { %v7630_v42 = vpop.f32.mrb[28].mxu1 }
 0x256   : > { %v7632_v43 = vpop.f32.mrb[29].mxu1 }
 0x259   : > { %v7636_v11 = vpop.f32.mrb[30].mxu1 }
 0x25a   : > { %v5260_v44 = vpop.f32.mrb[0].mxu0  ;;  %v7639_v18 = vpop.f32.mrb[31].mxu1 }
 0x25b   : > { %v6277_v48 = vadd.f32 %v5260_v44, %v5020_v60  ;;  %v1499_v49 = vpop.f32.mrb[1].mxu0 }
 0x25c   : > { %v6278_v2 = vadd.f32 %v1499_v49, %v694_v61 }
 0x25d   : > { %v1698_v12 = vadd.f32 %v6277_v48, %v7634_v47 }
 0x25e   : > { %v1697_v19 = vadd.f32 %v6278_v2, %v7634_v47  ;;  %v5263_v24 = vpop.f32.mrb[2].mxu0 }
 0x25f   : > { %v1730_v25 = vmax.f32 %v1698_v12, 0.0  ;;  %v6279_v31 = vadd.f32 %v5263_v24, %v5023_v62  ;;  %v1509_v33 = vpop.f32.mrb[3].mxu0 }
 0x260   : > { %v1729_v39 = vmax.f32 %v1697_v19, 0.0  ;;  %v6280_v40 = vadd.f32 %v1509_v33, %v704_v63 }
 0x261   : > { %1762 = vst [vmem:[#allocation2 + $0x8] sm:$0xff] %v1730_v25  ;;  %v1700_v26 = vadd.f32 %v6279_v31, %v7634_v47 }
 0x262   : > { %1761 = vst [vmem:[#allocation2] sm:$0xff] %v1729_v39  ;;  %v1699_v46 = vadd.f32 %v6280_v40, %v7634_v47  ;;  %v5266_v50 = vpop.f32.mrb[4].mxu0 }
 0x263   : > { %v7644_v32 = vmax.f32 %v1700_v26, 0.0  ;;  %v6281_v51 = vadd.f32 %v5266_v50, %v5026_v0  ;;  %v1519_v52 = vpop.f32.mrb[5].mxu0 }
 0x264   : > { %v1731_v53 = vmax.f32 %v1699_v46, 0.0  ;;  %v6282_v38 = vadd.f32 %v1519_v52, %v7581_v1 }
 0x265   : > { %1764 = vst [vmem:[#allocation2 + $0x18] sm:$0xff] %v7644_v32  ;;  %v1702_v54 = vadd.f32 %v6281_v51, %v7634_v47 }
 0x266   : > { %1763 = vst [vmem:[#allocation2 + $0x10] sm:$0xff] %v1731_v53  ;;  %v1701_v55 = vadd.f32 %v6282_v38, %v7634_v47  ;;  %v5269_v56 = vpop.f32.mrb[6].mxu0 }
 0x267   : > { %v7650_v57 = vmax.f32 %v1702_v54, 0.0  ;;  %v6283_v58 = vadd.f32 %v5269_v56, %v7585_v9  ;;  %v1529_v45 = vpop.f32.mrb[7].mxu0 }
 0x268   : > { %v1733_v59 = vmax.f32 %v1701_v55, 0.0  ;;  %v6284_v60 = vadd.f32 %v1529_v45, %v7587_v10 }
 0x269   : > { %v1825_v61 = vld [vmem:[#allocation2 + $0x1] sm:$0xff]  ;;  %1766 = vst [vmem:[#allocation2 + $0x28] sm:$0xff] %v7650_v57  ;;  %v1704_v62 = vadd.f32 %v6283_v58, %v7634_v47 }
 0x26a   : > { %v1857_v63 = vmax.f32 %v1729_v39, %v1825_v61  ;;  %1765 = vst [vmem:[#allocation2 + $0x20] sm:$0xff] %v1733_v59  ;;  %v1703_v0 = vadd.f32 %v6284_v60, %v7634_v47  ;;  %v5272_v1 = vpop.f32.mrb[8].mxu0 }
 0x26b   : > { %v7657_v4 = vmax.f32 %v1704_v62, 0.0  ;;  %v6285_v6 = vadd.f32 %v5272_v1, %v7590_v13  ;;  %v1539_v5 = vpop.f32.mrb[9].mxu0 }
 0x26c   : > { %v1735_v9 = vmax.f32 %v1703_v0, 0.0  ;;  %v6286_v44 = vadd.f32 %v1539_v5, %v7592_v14  ;;  %v1891_v48 = vmax.f32 %v1857_v63, %v1731_v53 }
 0x26d   : > { %v1826_v10 = vld [vmem:[#allocation2 + $0x9] sm:$0xff]  ;;  %v1827_v49 = vld [vmem:[#allocation2 + $0x11] sm:$0xff]  ;;  %1768 = vst [vmem:[#allocation2 + $0x38] sm:$0xff] %v7657_v4  ;;  %v1706_v2 = vadd.f32 %v6285_v6, %v7634_v47 }
 0x26e   : > { %v1858_v12 = vmax.f32 %v1730_v25, %v1826_v10  ;;  %v1859_v19 = vmax.f32 %v1731_v53, %v1827_v49  ;;  %1767 = vst [vmem:[#allocation2 + $0x30] sm:$0xff] %v1735_v9  ;;  %v1705_v24 = vadd.f32 %v6286_v44, %v7634_v47  ;;  %v5275_v31 = vpop.f32.mrb[10].mxu0  ;;  %v7664_v33 = vmax.f32 %v1891_v48, %v1827_v49 }
 0x26f   : > { %v7666_v13 = vmax.f32 %v1706_v2, 0.0  ;;  %v6287_v39 = vadd.f32 %v5275_v31, %v7594_v15  ;;  %v1549_v14 = vpop.f32.mrb[11].mxu0  ;;  %v2024_v31 = vld [vmem:[#allocation8 + $0x18] sm:$0xff] }
 0x270   : > { %v1893_v40 = vmax.f32 %v1859_v19, %v1733_v59  ;;  %v7669_v26 = vmax.f32 %v1705_v24, 0.0  ;;  %v6288_v46 = vadd.f32 %v1549_v14, %v7596_v3  ;;  %v1892_v50 = vmax.f32 %v1858_v12, %v7644_v32  ;;  %1957 = vst [vmem:[#allocation3] sm:$0xff] %v7664_v33  ;;  %v2023_v24 = vld [vmem:[#allocation8 + $0x10] sm:$0xff] }
 0x271   : > { %v1828_v25 = vld [vmem:[#allocation2 + $0x19] sm:$0xff]  ;;  %v1829_v51 = vld [vmem:[#allocation2 + $0x21] sm:$0xff]  ;;  %1770 = vst [vmem:[#allocation2 + $0x48] sm:$0xff] %v7666_v13  ;;  %v1708_v52 = vadd.f32 %v6287_v39, %v7634_v47 }
 0x272   : > { %v1861_v53 = vmax.f32 %v1733_v59, %v1829_v51  ;;  %1769 = vst [vmem:[#allocation2 + $0x40] sm:$0xff] %v7669_v26  ;;  %v1707_v15 = vadd.f32 %v6288_v46, %v7634_v47  ;;  %v5278_v38 = vpop.f32.mrb[12].mxu0  ;;  %v7678_v54 = vmax.f32 %v1892_v50, %v1828_v25  ;;  %v7680_v55 = vmax.f32 %v1893_v40, %v1829_v51 }
 0x273   : > { %v7682_v3 = vmax.f32 %v1708_v52, 0.0  ;;  %v6289_v56 = vadd.f32 %v5278_v38, %v7598_v16  ;;  %v1559_v58 = vpop.f32.mrb[13].mxu0  ;;  %v1860_v45 = vmax.f32 %v7644_v32, %v1828_v25  ;;  %v5825_v38 = vpack.c.bf16 %v2024_v31, %v2023_v24  ;;  %v2027_v31 = vld [vmem:[#allocation8 + $0x30] sm:$0xff] }
 0x274   : > { %v7686_v60 = vmax.f32 %v1707_v15, 0.0  ;;  %v6290_v59 = vadd.f32 %v1559_v58, %v7600_v20  ;;  %1958 = vst [vmem:[#allocation3 + $0x8] sm:$0xff] %v7678_v54  ;;  %1959 = vst [vmem:[#allocation3 + $0x10] sm:$0xff] %v7680_v55  ;;  %v1895_v61 = vmax.f32 %v1861_v53, %v1735_v9 }
 0x275   : > { %v1830_v62 = vld [vmem:[#allocation2 + $0x29] sm:$0xff]  ;;  %v1831_v63 = vld [vmem:[#allocation2 + $0x31] sm:$0xff]  ;;  %1772 = vst [vmem:[#allocation2 + $0x58] sm:$0xff] %v7682_v3  ;;  %v1710_v0 = vadd.f32 %v6289_v56, %v7634_v47  ;;  %v1894_v16 = vmax.f32 %v1860_v45, %v7650_v57 }
 0x276   : > { %v1863_v1 = vmax.f32 %v1735_v9, %v1831_v63  ;;  %1771 = vst [vmem:[#allocation2 + $0x50] sm:$0xff] %v7686_v60  ;;  %v1709_v32 = vadd.f32 %v6290_v59, %v7634_v47  ;;  %v5281_v6 = vpop.f32.mrb[14].mxu0  ;;  %v7696_v20 = vmax.f32 %v1895_v61, %v1831_v63  ;;  %v1862_v5 = vmax.f32 %v7650_v57, %v1830_v62  ;;  %v2025_v59 = vld [vmem:[#allocation8 + $0x20] sm:$0xff]  ;;  %v2026_v61 = vld [vmem:[#allocation8 + $0x28] sm:$0xff] }
 0x277   : > { %v7699_v44 = vmax.f32 %v1710_v0, 0.0  ;;  %v6291_v48 = vadd.f32 %v5281_v6, %v7602_v21  ;;  %v1569_v10 = vpop.f32.mrb[15].mxu0  ;;  %v7702_v49 = vmax.f32 %v1894_v16, %v1830_v62 }
 0x278   : > { %v7704_v2 = vmax.f32 %v1709_v32, 0.0  ;;  %v6292_v9 = vadd.f32 %v1569_v10, %v7604_v22  ;;  %1961 = vst [vmem:[#allocation3 + $0x20] sm:$0xff] %v7696_v20  ;;  %v1896_v12 = vmax.f32 %v1862_v5, %v7657_v4  ;;  %v1897_v19 = vmax.f32 %v1863_v1, %v7669_v26 }
 0x279   : > { %v1832_v57 = vld [vmem:[#allocation2 + $0x39] sm:$0xff]  ;;  %v1833_v39 = vld [vmem:[#allocation2 + $0x41] sm:$0xff]  ;;  %1774 = vst [vmem:[#allocation2 + $0x68] sm:$0xff] %v7699_v44  ;;  %v1712_v21 = vadd.f32 %v6291_v48, %v7634_v47  ;;  %1960 = vst [vmem:[#allocation3 + $0x18] sm:$0xff] %v7702_v49 }
 0x27a   : > { %v1865_v14 = vmax.f32 %v7669_v26, %v1833_v39  ;;  %1773 = vst [vmem:[#allocation2 + $0x60] sm:$0xff] %v7704_v2  ;;  %v1711_v22 = vadd.f32 %v6292_v9, %v7634_v47  ;;  %v5284_v40 = vpop.f32.mrb[16].mxu0  ;;  %v7716_v46 = vmax.f32 %v1896_v12, %v1832_v57  ;;  %v7718_v50 = vmax.f32 %v1897_v19, %v1833_v39 }
 0x27b   : > { %v7720_v25 = vmax.f32 %v1712_v21, 0.0  ;;  %v6293_v51 = vadd.f32 %v5284_v40, %v7606_v23  ;;  %v1579_v52 = vpop.f32.mrb[17].mxu0  ;;  %v2037_v53 = vld [vmem:[#allocation3 + $0x2] sm:$0xff]  ;;  %v2038_v15 = vld [vmem:[#allocation3 + $0xa] sm:$0xff]  ;;  %v1864_v56 = vmax.f32 %v7657_v4, %v1832_v57 }
 0x27c   : > { %v7724_v26 = vmax.f32 %v1711_v22, 0.0  ;;  %v6294_v58 = vadd.f32 %v1579_v52, %v7608_v27  ;;  %5338 = vmatprep.mubr.f32.mxu1 %v2037_v53  ;;  %1962 = vst [vmem:[#allocation3 + $0x28] sm:$0xff] %v7716_v46  ;;  %1963 = vst [vmem:[#allocation3 + $0x30] sm:$0xff] %v7718_v50  ;;  %v1899_v45 = vmax.f32 %v1865_v14, %v7686_v60  ;;  %v2028_v21 = vld [vmem:[#allocation8 + $0x38] sm:$0xff] }
 0x27d   : > { %v1834_v23 = vld [vmem:[#allocation2 + $0x49] sm:$0xff]  ;;  %v1835_v62 = vld [vmem:[#allocation2 + $0x51] sm:$0xff]  ;;  %1776 = vst [vmem:[#allocation2 + $0x78] sm:$0xff] %v7720_v25  ;;  %v1714_v63 = vadd.f32 %v6293_v51, %v7634_v47  ;;  %5339 = vmatmul.mubr.f32.vlgmr.msra.gmra.mrb[32].mxu1 %v2038_v15  ;;  %v1898_v4 = vmax.f32 %v1864_v56, %v7666_v13 }
 0x27e   : > { %v1867_v27 = vmax.f32 %v7686_v60, %v1835_v62  ;;  %1775 = vst [vmem:[#allocation2 + $0x70] sm:$0xff] %v7724_v26  ;;  %v1713_v0 = vadd.f32 %v6294_v58, %v7634_v47  ;;  %v5287_v16 = vpop.f32.mrb[18].mxu0  ;;  %5824 = vmatpush3.bf16.msra.mxu1 %v7583_v7  ;;  %v7737_v1 = vmax.f32 %v1899_v45, %v1835_v62  ;;  %v2030_v62 = vld [vmem:[#allocation8 + $0x48] sm:$0xff] }
 0x27f   : > { %v1866_v32 = vmax.f32 %v7666_v13, %v1834_v23  ;;  %v7740_v6 = vmax.f32 %v1714_v63, 0.0  ;;  %v6295_v5 = vadd.f32 %v5287_v16, %v7610_v28  ;;  %v1589_v48 = vpop.f32.mrb[19].mxu0  ;;  %5826 = vmatprep.subr.bf16.mxu1 %v5825_v38  ;;  %v7743_v10 = vmax.f32 %v1898_v4, %v1834_v23  ;;  %v2029_v23 = vld [vmem:[#allocation8 + $0x40] sm:$0xff] }
 0x280   : > { %v5829_v60 = vpack.c.bf16 %v2026_v61, %v2025_v59  ;;  %v7745_v9 = vmax.f32 %v1713_v0, 0.0  ;;  %v6296_v12 = vadd.f32 %v1589_v48, %v7612_v29  ;;  %v2039_v19 = vld [vmem:[#allocation3 + $0x12] sm:$0xff]  ;;  %v2040_v24 = vld [vmem:[#allocation3 + $0x1a] sm:$0xff]  ;;  %1965 = vst [vmem:[#allocation3 + $0x40] sm:$0xff] %v7737_v1  ;;  %v1901_v13 = vmax.f32 %v1867_v27, %v7704_v2 }
 0x281   : > { %v1900_v7 = vmax.f32 %v1866_v32, %v7682_v3  ;;  %v1836_v57 = vld [vmem:[#allocation2 + $0x59] sm:$0xff]  ;;  %v1837_v28 = vld [vmem:[#allocation2 + $0x61] sm:$0xff]  ;;  %1778 = vst [vmem:[#allocation2 + $0x88] sm:$0xff] %v7740_v6  ;;  %v1716_v39 = vadd.f32 %v6295_v5, %v7634_v47  ;;  %5341 = vmatprep.mubr.f32.mxu1 %v2039_v19  ;;  %1964 = vst [vmem:[#allocation3 + $0x38] sm:$0xff] %v7743_v10  ;;  %v5833_v61 = vpack.c.bf16 %v2028_v21, %v2027_v31 }
 0x282   : > { %v1869_v29 = vmax.f32 %v7704_v2, %v1837_v28  ;;  %1777 = vst [vmem:[#allocation2 + $0x80] sm:$0xff] %v7745_v9  ;;  %v1715_v14 = vadd.f32 %v6296_v12, %v7634_v47  ;;  %v5290_v22 = vpop.f32.mrb[20].mxu0  ;;  %5342 = vmatmul.mubr.f32.gmra.mrb[34].mxu1 %v2040_v24  ;;  %v7759_v51 = vmax.f32 %v1901_v13, %v1837_v28 }
 0x283   : > { %v7757_v40 = vmax.f32 %v1900_v7, %v1836_v57  ;;  %v7761_v52 = vmax.f32 %v1716_v39, 0.0  ;;  %v6297_v53 = vadd.f32 %v5290_v22, %v7614_v8  ;;  %v1599_v15 = vpop.f32.mrb[21].mxu0  ;;  %v7764_v56 = vld [vmem:[#allocation3 + $0x22] sm:$0xff]  ;;  %v7766_v58 = vld [vmem:[#allocation3 + $0x2a] sm:$0xff]  ;;  %5828 = vmatpush3.bf16.msra.mxu1 %v5825_v38  ;;  %v1868_v2 = vmax.f32 %v7682_v3, %v1836_v57 }
 0x284   : > { %v7769_v45 = vmax.f32 %v1715_v14, 0.0  ;;  %v6298_v59 = vadd.f32 %v1599_v15, %v7616_v30  ;;  %5344 = vmatprep.mubr.f32.mxu1 %v7764_v56  ;;  %1967 = vst [vmem:[#allocation3 + $0x50] sm:$0xff] %v7759_v51  ;;  %5830 = vmatprep.subr.bf16.mxu1 %v5829_v60  ;;  %v1903_v8 = vmax.f32 %v1869_v29, %v7724_v26 }
 0x285   : > { %1966 = vst [vmem:[#allocation3 + $0x48] sm:$0xff] %v7757_v40  ;;  %v1838_v63 = vld [vmem:[#allocation2 + $0x69] sm:$0xff]  ;;  %v1839_v38 = vld [vmem:[#allocation2 + $0x71] sm:$0xff]  ;;  %1780 = vst [vmem:[#allocation2 + $0x98] sm:$0xff] %v7761_v52  ;;  %v1718_v3 = vadd.f32 %v6297_v53, %v7634_v47  ;;  %v1902_v30 = vmax.f32 %v1868_v2, %v7699_v44 }
 0x286   : > { %v1871_v4 = vmax.f32 %v7724_v26, %v1839_v38  ;;  %1779 = vst [vmem:[#allocation2 + $0x90] sm:$0xff] %v7769_v45  ;;  %v1717_v27 = vadd.f32 %v6298_v59, %v7634_v47  ;;  %v5293_v0 = vpop.f32.mrb[22].mxu0  ;;  %5345 = vmatmul.mubr.f32.gmra.mrb[36].mxu1 %v7766_v58  ;;  %v7783_v16 = vmax.f32 %v1903_v8, %v1839_v38 }
 0x287   : > { %v1870_v32 = vmax.f32 %v7699_v44, %v1838_v63  ;;  %v7786_v5 = vmax.f32 %v1718_v3, 0.0  ;;  %v6299_v48 = vadd.f32 %v5293_v0, %v7618_v34  ;;  %v1609_v12 = vpop.f32.mrb[23].mxu0  ;;  %5832 = vmatpush3.bf16.msra.mxu1 %v5829_v60  ;;  %v7789_v19 = vmax.f32 %v1902_v30, %v1838_v63  ;;  %v2031_v34 = vld [vmem:[#allocation8 + $0x50] sm:$0xff]  ;;  %v2033_v3 = vld [vmem:[#allocation8 + $0x60] sm:$0xff]  ;;  %v2034_v30 = vld [vmem:[#allocation8 + $0x68] sm:$0xff] }
 0x288   : > { %v5837_v26 = vpack.c.bf16 %v2030_v62, %v2029_v23  ;;  %v7791_v24 = vmax.f32 %v1717_v27, 0.0  ;;  %v6300_v7 = vadd.f32 %v1609_v12, %v7620_v35  ;;  %v7794_v13 = vld [vmem:[#allocation3 + $0x32] sm:$0xff]  ;;  %v7796_v31 = vld [vmem:[#allocation3 + $0x3a] sm:$0xff]  ;;  %1969 = vst [vmem:[#allocation3 + $0x60] sm:$0xff] %v7783_v16  ;;  %v1905_v57 = vmax.f32 %v1871_v4, %v7745_v9  ;;  %5834 = vmatprep.subr.bf16.mxu1 %v5833_v61  ;;  %v2032_v35 = vld [vmem:[#allocation8 + $0x58] sm:$0xff] }
 0x289   : > { %v1904_v44 = vmax.f32 %v1870_v32, %v7720_v25  ;;  %v1840_v60 = vld [vmem:[#allocation2 + $0x79] sm:$0xff]  ;;  %v1841_v28 = vld [vmem:[#allocation2 + $0x81] sm:$0xff]  ;;  %1782 = vst [vmem:[#allocation2 + $0xa8] sm:$0xff] %v7786_v5  ;;  %v1720_v39 = vadd.f32 %v6299_v48, %v7634_v47  ;;  %5347 = vmatprep.mubr.f32.mxu1 %v7794_v13  ;;  %1968 = vst [vmem:[#allocation3 + $0x58] sm:$0xff] %v7789_v19  ;;  %v5841_v38 = vpack.c.bf16 %v2032_v35, %v2031_v34 }
 0x28a   : > { %v1873_v21 = vmax.f32 %v7745_v9, %v1841_v28  ;;  %1781 = vst [vmem:[#allocation2 + $0xa0] sm:$0xff] %v7791_v24  ;;  %v1719_v29 = vadd.f32 %v6300_v7, %v7634_v47  ;;  %v5296_v14 = vpop.f32.mrb[24].mxu0  ;;  %5348 = vmatmul.mubr.f32.gmra.mrb[38].mxu1 %v7796_v31  ;;  %v7811_v53 = vmax.f32 %v1905_v57, %v1841_v28 }
 0x28b   : > { %v7809_v22 = vmax.f32 %v1904_v44, %v1840_v60  ;;  %v7813_v15 = vmax.f32 %v1720_v39, 0.0  ;;  %v6301_v2 = vadd.f32 %v5296_v14, %v7622_v36  ;;  %v1619_v59 = vpop.f32.mrb[25].mxu0  ;;  %5836 = vmatpush3.bf16.msra.mxu1 %v5833_v61  ;;  %v1872_v9 = vmax.f32 %v7720_v25, %v1840_v60 }
 0x28c   : > { %v7816_v8 = vld [vmem:[#allocation3 + $0x42] sm:$0xff]  ;;  %v7818_v23 = vld [vmem:[#allocation3 + $0x4a] sm:$0xff]  ;;  %v7821_v62 = vmax.f32 %v1719_v29, 0.0  ;;  %v6302_v63 = vadd.f32 %v1619_v59, %v7624_v17  ;;  %1971 = vst [vmem:[#allocation3 + $0x70] sm:$0xff] %v7811_v53  ;;  %v1907_v36 = vmax.f32 %v1873_v21, %v7769_v45  ;;  %5838 = vmatprep.subr.bf16.mxu1 %v5837_v26 }
 0x28d   : > { %5350 = vmatprep.mubr.f32.mxu1 %v7816_v8  ;;  %1970 = vst [vmem:[#allocation3 + $0x68] sm:$0xff] %v7809_v22  ;;  %v1842_v4 = vld [vmem:[#allocation2 + $0x89] sm:$0xff]  ;;  %v1843_v61 = vld [vmem:[#allocation2 + $0x91] sm:$0xff]  ;;  %1784 = vst [vmem:[#allocation2 + $0xb8] sm:$0xff] %v7813_v15  ;;  %v1722_v25 = vadd.f32 %v6301_v2, %v7634_v47  ;;  %v1906_v17 = vmax.f32 %v1872_v9, %v7740_v6 }
 0x28e   : > { %v1875_v27 = vmax.f32 %v7769_v45, %v1843_v61  ;;  %1783 = vst [vmem:[#allocation2 + $0xb0] sm:$0xff] %v7821_v62  ;;  %v1721_v0 = vadd.f32 %v6302_v63, %v7634_v47  ;;  %v5299_v32 = vpop.f32.mrb[26].mxu0  ;;  %5351 = vmatmul.mubr.f32.gmra.mrb[40].mxu1 %v7818_v23  ;;  %v7835_v48 = vmax.f32 %v1907_v36, %v1843_v61 }
 0x28f   : > { %v1874_v12 = vmax.f32 %v7740_v6, %v1842_v4  ;;  %v7838_v7 = vmax.f32 %v1722_v25, 0.0  ;;  %v6303_v44 = vadd.f32 %v5299_v32, %v7626_v37  ;;  %v1629_v57 = vpop.f32.mrb[27].mxu0  ;;  %v7841_v34 = vmax.f32 %v1906_v17, %v1842_v4  ;;  %5840 = vmatpush3.bf16.msra.mxu1 %v5837_v26  ;;  %v2035_v37 = vld [vmem:[#allocation8 + $0x70] sm:$0xff]  ;;  %v2569_v32 = vld [vmem:[#allocation8 + $0x100] sm:$0xff] }
 0x290   : > { %v5845_v45 = vpack.c.bf16 %v2034_v30, %v2033_v3  ;;  %v7843_v60 = vmax.f32 %v1721_v0, 0.0  ;;  %v6304_v28 = vadd.f32 %v1629_v57, %v7628_v41  ;;  %v7846_v39 = vld [vmem:[#allocation3 + $0x52] sm:$0xff]  ;;  %v7848_v35 = vld [vmem:[#allocation3 + $0x5a] sm:$0xff]  ;;  %1973 = vst [vmem:[#allocation3 + $0x80] sm:$0xff] %v7835_v48  ;;  %v1909_v21 = vmax.f32 %v1875_v27, %v7791_v24  ;;  %5842 = vmatprep.subr.bf16.mxu1 %v5841_v38  ;;  %v2036_v41 = vld [vmem:[#allocation8 + $0x78] sm:$0xff] }
 0x291   : > { %v1908_v6 = vmax.f32 %v1874_v12, %v7761_v52  ;;  %v1844_v29 = vld [vmem:[#allocation2 + $0x99] sm:$0xff]  ;;  %v1845_v14 = vld [vmem:[#allocation2 + $0xa1] sm:$0xff]  ;;  %1786 = vst [vmem:[#allocation2 + $0xc8] sm:$0xff] %v7838_v7  ;;  %v1724_v26 = vadd.f32 %v6303_v44, %v7634_v47  ;;  %5353 = vmatprep.mubr.f32.mxu1 %v7846_v39  ;;  %1972 = vst [vmem:[#allocation3 + $0x78] sm:$0xff] %v7841_v34  ;;  %v5849_v0 = vpack.c.bf16 %v2036_v41, %v2035_v37 }
 0x292   : > { %v1877_v2 = vmax.f32 %v7791_v24, %v1845_v14  ;;  %1785 = vst [vmem:[#allocation2 + $0xc0] sm:$0xff] %v7843_v60  ;;  %v1723_v59 = vadd.f32 %v6304_v28, %v7634_v47  ;;  %v5302_v9 = vpop.f32.mrb[28].mxu0  ;;  %5354 = vmatmul.mubr.f32.gmra.mrb[42].mxu1 %v7848_v35  ;;  %v7863_v36 = vmax.f32 %v1909_v21, %v1845_v14  ;;  %v2570_v12 = vld [vmem:[#allocation8 + $0x108] sm:$0xff] }
 0x293   : > { %v7861_v63 = vmax.f32 %v1908_v6, %v1844_v29  ;;  %v7865_v3 = vmax.f32 %v1724_v26, 0.0  ;;  %v6305_v30 = vadd.f32 %v5302_v9, %v7630_v42  ;;  %v1639_v4 = vpop.f32.mrb[29].mxu0  ;;  %v1876_v24 = vmax.f32 %v7761_v52, %v1844_v29  ;;  %5844 = vmatpush3.bf16.msra.mxu1 %v5841_v38 }
 0x294   : > { %v7868_v61 = vld [vmem:[#allocation3 + $0x62] sm:$0xff]  ;;  %v7870_v25 = vld [vmem:[#allocation3 + $0x6a] sm:$0xff]  ;;  %v7873_v17 = vmax.f32 %v1723_v59, 0.0  ;;  %v6306_v27 = vadd.f32 %v1639_v4, %v7632_v43  ;;  %1975 = vst [vmem:[#allocation3 + $0x90] sm:$0xff] %v7863_v36  ;;  %v1911_v42 = vmax.f32 %v1877_v2, %v7821_v62  ;;  %5846 = vmatprep.subr.bf16.mxu1 %v5845_v45 }
 0x295   : > { %5356 = vmatprep.mubr.f32.mxu1 %v7868_v61  ;;  %1974 = vst [vmem:[#allocation3 + $0x88] sm:$0xff] %v7861_v63  ;;  %v1846_v44 = vld [vmem:[#allocation2 + $0xa9] sm:$0xff]  ;;  %v1847_v57 = vld [vmem:[#allocation2 + $0xb1] sm:$0xff]  ;;  %1788 = vst [vmem:[#allocation2 + $0xd8] sm:$0xff] %v7865_v3  ;;  %v1726_v52 = vadd.f32 %v6305_v30, %v7634_v47  ;;  %v1910_v43 = vmax.f32 %v1876_v24, %v7786_v5 }
 0x296   : > { %v1879_v38 = vmax.f32 %v7821_v62, %v1847_v57  ;;  %1787 = vst [vmem:[#allocation2 + $0xd0] sm:$0xff] %v7873_v17  ;;  %v1725_v28 = vadd.f32 %v6306_v27, %v7634_v47  ;;  %v5305_v6 = vpop.f32.mrb[30].mxu0  ;;  %5357 = vmatmul.mubr.f32.gmra.mrb[44].mxu1 %v7870_v25  ;;  %v7887_v21 = vmax.f32 %v1911_v42, %v1847_v57 }
 0x297   : > { %v1878_v37 = vmax.f32 %v7786_v5, %v1846_v44  ;;  %v7890_v29 = vmax.f32 %v1726_v52, 0.0  ;;  %v6307_v14 = vadd.f32 %v5305_v6, %v7636_v11  ;;  %v1649_v26 = vpop.f32.mrb[31].mxu0  ;;  %v7893_v41 = vmax.f32 %v1910_v43, %v1846_v44  ;;  %5848 = vmatpush3.bf16.msra.mxu1 %v5845_v45 }
 0x298   : > { %v7895_v62 = vpack.c.bf16 %v2570_v12, %v2569_v32  ;;  %v7897_v2 = vmax.f32 %v1725_v28, 0.0  ;;  %v6308_v59 = vadd.f32 %v1649_v26, %v7639_v18  ;;  %v7900_v9 = vld [vmem:[#allocation3 + $0x72] sm:$0xff]  ;;  %v7902_v30 = vld [vmem:[#allocation3 + $0x7a] sm:$0xff]  ;;  %1977 = vst [vmem:[#allocation3 + $0xa0] sm:$0xff] %v7887_v21  ;;  %v1913_v11 = vmax.f32 %v1879_v38, %v7843_v60  ;;  %5850 = vmatprep.subr.bf16.mxu1 %v5849_v0 }
 0x299   : > { %v1912_v5 = vmax.f32 %v1878_v37, %v7813_v15  ;;  %v1848_v4 = vld [vmem:[#allocation2 + $0xb9] sm:$0xff]  ;;  %v1849_v24 = vld [vmem:[#allocation2 + $0xc1] sm:$0xff]  ;;  %1790 = vst [vmem:[#allocation2 + $0xe8] sm:$0xff] %v7890_v29  ;;  %v1728_v45 = vadd.f32 %v6307_v14, %v7634_v47  ;;  %5359 = vmatprep.mubr.f32.mxu1 %v7900_v9  ;;  %1976 = vst [vmem:[#allocation3 + $0x98] sm:$0xff] %v7893_v41 }
 0x29a   : > { %v1881_v18 = vmax.f32 %v7843_v60, %v1849_v24  ;;  %1789 = vst [vmem:[#allocation2 + $0xe0] sm:$0xff] %v7897_v2  ;;  %v1727_v27 = vadd.f32 %v6308_v59, %v7634_v47  ;;  %5360 = vmatmul.mubr.f32.gmra.mrb[46].mxu1 %v7902_v30  ;;  %v7917_v32 = vmax.f32 %v1913_v11, %v1849_v24 }
 0x29b   : > { %v7915_v42 = vmax.f32 %v1912_v5, %v1848_v4  ;;  %v1760_v12 = vmax.f32 %v1728_v45, 0.0  ;;  %v1880_v52 = vmax.f32 %v7813_v15, %v1848_v4  ;;  %5852 = vmatpush3.bf16.msra.mxu1 %v5849_v0 }
 0x29c   : > { %v7919_v44 = vld [vmem:[#allocation3 + $0x82] sm:$0xff]  ;;  %v7921_v57 = vld [vmem:[#allocation3 + $0x8a] sm:$0xff]  ;;  %v1759_v43 = vmax.f32 %v1727_v27, 0.0  ;;  %1979 = vst [vmem:[#allocation3 + $0xb0] sm:$0xff] %v7917_v32  ;;  %v1915_v47 = vmax.f32 %v1881_v18, %v7873_v17  ;;  %5854 = vmatprep.subr.bf16.mxu1 %v7895_v62 }
 0x29d   : > { %5362 = vmatprep.mubr.f32.mxu1 %v7919_v44  ;;  %1978 = vst [vmem:[#allocation3 + $0xa8] sm:$0xff] %v7915_v42  ;;  %v1850_v60 = vld [vmem:[#allocation2 + $0xc9] sm:$0xff]  ;;  %v1851_v38 = vld [vmem:[#allocation2 + $0xd1] sm:$0xff]  ;;  %1792 = vst [vmem:[#allocation2 + $0xf8] sm:$0xff] %v1760_v12  ;;  %v1914_v28 = vmax.f32 %v1880_v52, %v7838_v7 }
 0x29e   : > { %v1883_v6 = vmax.f32 %v7873_v17, %v1851_v38  ;;  %1791 = vst [vmem:[#allocation2 + $0xf0] sm:$0xff] %v1759_v43  ;;  %5363 = vmatmul.mubr.f32.gmra.mrb[48].mxu1 %v7921_v57  ;;  %v7932_v15 = vmax.f32 %v1915_v47, %v1851_v38  ;;  %v1882_v0 = vmax.f32 %v7838_v7, %v1850_v60 }
 0x29f   : > { %v7935_v37 = vmax.f32 %v1914_v28, %v1850_v60 }
 0x2a0   : > { %v7937_v14 = vld [vmem:[#allocation3 + $0x92] sm:$0xff]  ;;  %v7939_v26 = vld [vmem:[#allocation3 + $0x9a] sm:$0xff]  ;;  %1981 = vst [vmem:[#allocation3 + $0xc0] sm:$0xff] %v7932_v15  ;;  %v1916_v59 = vmax.f32 %v1882_v0, %v7865_v3  ;;  %v1917_v5 = vmax.f32 %v1883_v6, %v7897_v2 }
 0x2a1   : > { %8315 = vst [vmem:[#allocation26_spill] sm:$0xff] %v7939_v26  ;;  %v1852_v17 = vld [vmem:[#allocation2 + $0xd9] sm:$0xff]  ;;  %v1853_v11 = vld [vmem:[#allocation2 + $0xe1] sm:$0xff]  ;;  %5365 = vmatprep.mubr.f32.mxu1 %v7937_v14  ;;  %1980 = vst [vmem:[#allocation3 + $0xb8] sm:$0xff] %v7935_v37 }
 0x2a2   : > { %v1885_v7 = vmax.f32 %v7897_v2, %v1853_v11  ;;  %5366 = vmatmul.mubr.f32.gmra.mrb[50].mxu1 %v7939_v26  ;;  %v7948_v4 = vmax.f32 %v1916_v59, %v1852_v17  ;;  %v7950_v24 = vmax.f32 %v1917_v5, %v1853_v11  ;;  %v1884_v45 = vmax.f32 %v7865_v3, %v1852_v17  ;;  %v1924_v5 = vld [vmem:[#allocation2 + $0x109] sm:$0xff]  ;;  %v1923_v17 = vld [vmem:[#allocation2 + $0x101] sm:$0xff] }
 0x2a4   : > { %v7953_v18 = vld [vmem:[#allocation3 + $0xa2] sm:$0xff]  ;;  %v7955_v27 = vld [vmem:[#allocation3 + $0xaa] sm:$0xff]  ;;  %1982 = vst [vmem:[#allocation3 + $0xc8] sm:$0xff] %v7948_v4  ;;  %1983 = vst [vmem:[#allocation3 + $0xd0] sm:$0xff] %v7950_v24  ;;  %v1918_v2 = vmax.f32 %v1884_v45, %v7890_v29  ;;  %v1919_v47 = vmax.f32 %v1885_v7, %v1759_v43 }
 0x2a5   : > { %8316 = vst [vmem:[#allocation27_spill] sm:$0xff] %v7953_v18  ;;  %v1856_v52 = vld [vmem:[#allocation2 + $0xf9] sm:$0xff]  ;;  %5368 = vmatprep.mubr.f32.mxu1 %v7953_v18  ;;  %v1854_v38 = vld [vmem:[#allocation2 + $0xe9] sm:$0xff]  ;;  %v1855_v28 = vld [vmem:[#allocation2 + $0xf1] sm:$0xff] }
 0x2a6   : > { %v1888_v60 = vmax.f32 %v1760_v12, %v1856_v52  ;;  %v1887_v6 = vmax.f32 %v1759_v43, %v1855_v28  ;;  %5369 = vmatmul.mubr.f32.gmra.mrb[52].mxu1 %v7955_v27  ;;  %v7962_v3 = vmax.f32 %v1918_v2, %v1854_v38  ;;  %v7964_v0 = vmax.f32 %v1919_v47, %v1855_v28 }
 0x2a7   : > { %v1886_v59 = vmax.f32 %v7890_v29, %v1854_v38 }
 0x2a8   : > { %v1922_v11 = vmax.f32 %v1888_v60, 0.0  ;;  %v7967_v18 = vld [vmem:[#allocation3 + $0xb2] sm:$0xff]  ;;  %v7969_v26 = vld [vmem:[#allocation3 + $0xba] sm:$0xff]  ;;  %1984 = vst [vmem:[#allocation3 + $0xd8] sm:$0xff] %v7962_v3  ;;  %1985 = vst [vmem:[#allocation3 + $0xe0] sm:$0xff] %v7964_v0  ;;  %v1921_v7 = vmax.f32 %v1887_v6, 0.0 }
 0x2a9   : > { %8317 = vst [vmem:[#allocation28_spill] sm:$0xff] %v7967_v18  ;;  %8318 = vst [vmem:[#allocation29_spill] sm:$0xff] %v7969_v26  ;;  %v1920_v43 = vmax.f32 %v1886_v59, %v1760_v12  ;;  %5371 = vmatprep.mubr.f32.mxu1 %v7967_v18 }
 0x2aa   : > { %v7974_v45 = vmax.f32 %v1922_v11, %v1924_v5  ;;  %5372 = vmatmul.mubr.f32.gmra.mrb[54].mxu1 %v7969_v26  ;;  %v7979_v2 = vmax.f32 %v1921_v7, %v1923_v17  ;;  %v2571_v5 = vld [vmem:[#allocation8 + $0x110] sm:$0xff]  ;;  %v2572_v17 = vld [vmem:[#allocation8 + $0x118] sm:$0xff]  ;;  %v2574_v7 = vld [vmem:[#allocation8 + $0x128] sm:$0xff] }
 0x2ab   : > { %v7977_v29 = vmax.f32 %v1920_v43, %v1856_v52  ;;  %v7981_v47 = vld [vmem:[#allocation3 + $0xc2] sm:$0xff]  ;;  %v7983_v60 = vld [vmem:[#allocation3 + $0xca] sm:$0xff]  ;;  %v5857_v11 = vpack.c.bf16 %v2572_v17, %v2571_v5  ;;  %v2578_v17 = vld [vmem:[#allocation8 + $0x148] sm:$0xff] }
 0x2ac   : > { %8319 = vst [vmem:[#allocation30_spill] sm:$0xff] %v7981_v47  ;;  %8320 = vst [vmem:[#allocation31_spill] sm:$0xff] %v7983_v60  ;;  %5374 = vmatprep.mubr.f32.mxu1 %v7981_v47  ;;  %v2573_v43 = vld [vmem:[#allocation8 + $0x120] sm:$0xff]  ;;  %v3505_v47 = vld [vmem:[#allocation11 + $0x48] sm:$0xff] }
 0x2ad   : > { %1988 = vst [vmem:[#allocation3 + $0xf8] sm:$0xff] %v7974_v45  ;;  %1986 = vst [vmem:[#allocation3 + $0xe8] sm:$0xff] %v7977_v29  ;;  %v2577_v5 = vld [vmem:[#allocation8 + $0x140] sm:$0xff] }
 0x2ae   : > { %1987 = vst [vmem:[#allocation3 + $0xf0] sm:$0xff] %v7979_v2  ;;  %5375 = vmatmul.mubr.f32.gmra.mrb[56].mxu1 %v7983_v60  ;;  %v2880_v60 = vld [vmem:[#allocation8 + $0x1a8] sm:$0xff]  ;;  %v3507_v26 = vld [vmem:[#allocation11 + $0x58] sm:$0xff] }
 0x2af   : > { %v7990_v12 = vld [vmem:[#allocation3 + $0xd2] sm:$0xff]  ;;  %v7992_v52 = vld [vmem:[#allocation3 + $0xda] sm:$0xff] }
 0x2b0   : > { %8321 = vst [vmem:[#allocation32_spill] sm:$0xff] %v7990_v12  ;;  %8322 = vst [vmem:[#allocation33_spill] sm:$0xff] %v7992_v52  ;;  %5377 = vmatprep.mubr.f32.mxu1 %v7990_v12  ;;  %v3502_v12 = vld [vmem:[#allocation11 + $0x30] sm:$0xff] }
 0x2b2   : > { %5378 = vmatmul.mubr.f32.gmra.mrb[58].mxu1 %v7992_v52  ;;  %v3500_v52 = vld [vmem:[#allocation11 + $0x20] sm:$0xff] }
 0x2b3   : > { %v5923_v18 = vpack.c.bf16 %v3502_v12, %v3500_v52  ;;  %v2883_v52 = vld [vmem:[#allocation8 + $0x1c0] sm:$0xff] }
 0x2b4   : > { %v7996_v38 = vld [vmem:[#allocation3 + $0xe2] sm:$0xff]  ;;  %v8005_v59 = vld [vmem:[#allocation3 + $0xfa] sm:$0xff] }
 0x2b5   : > { %8323 = vst [vmem:[#allocation34_spill] sm:$0xff] %v7996_v38  ;;  %v7998_v28 = vld [vmem:[#allocation3 + $0xea] sm:$0xff]  ;;  %5380 = vmatprep.mubr.f32.mxu1 %v7996_v38  ;;  %v8002_v6 = vld [vmem:[#allocation3 + $0xf2] sm:$0xff]  ;;  %8326 = vst [vmem:[#allocation37_spill] sm:$0xff] %v8005_v59 }
 0x2b6   : > { %8324 = vst [vmem:[#allocation35_spill] sm:$0xff] %v7998_v28  ;;  %5381 = vmatmul.mubr.f32.gmra.mrb[60].mxu1 %v7998_v28  ;;  %8325 = vst [vmem:[#allocation36_spill] sm:$0xff] %v8002_v6  ;;  %v5861_v28 = vpack.c.bf16 %v2574_v7, %v2573_v43  ;;  %v2576_v38 = vld [vmem:[#allocation8 + $0x138] sm:$0xff] }
 0x2b7   : > { %5383 = vmatprep.mubr.f32.mxu1 %v8002_v6  ;;  %v2575_v6 = vld [vmem:[#allocation8 + $0x130] sm:$0xff]  ;;  %v2584_v43 = vld [vmem:[#allocation8 + $0x178] sm:$0xff] }
 0x2ba   : > { %5384 = vmatmul.mubr.f32.gmra.mrb[62].mxu1 %v8005_v59 }
 0x2bb   : > { %5418 = vmatprep.mubr.f32.mxu1 %v7664_v33  ;;  %v5865_v33 = vpack.c.bf16 %v2576_v38, %v2575_v6  ;;  %v2582_v38 = vld [vmem:[#allocation8 + $0x168] sm:$0xff]  ;;  %v2583_v6 = vld [vmem:[#allocation8 + $0x170] sm:$0xff] }
 0x2bc   : > { %v5881_v7 = vpack.c.bf16 %v2584_v43, %v2583_v6  ;;  %v3501_v6 = vld [vmem:[#allocation11 + $0x28] sm:$0xff]  ;;  %v3503_v43 = vld [vmem:[#allocation11 + $0x38] sm:$0xff] }
 0x2bd   : > { %v5921_v59 = vpack.c.bf16 %v3503_v43, %v3501_v6  ;;  %v3511_v6 = vld [vmem:[#allocation11 + $0x78] sm:$0xff]  ;;  %v2885_v43 = vld [vmem:[#allocation8 + $0x1d0] sm:$0xff] }
 0x2be   : > { %5419 = vmatmul.mubr.f32.vlgmr.msra.gmra.mrb[32].mxu1 %v7678_v54  ;;  %v5869_v54 = vpack.c.bf16 %v2578_v17, %v2577_v5  ;;  %v2876_v5 = vld [vmem:[#allocation8 + $0x188] sm:$0xff] }
 0x2bf   : > { %5421 = vmatprep.mubr.f32.mxu1 %v7680_v55  ;;  %5856 = vmatpush3.bf16.msra.mxu1 %v7895_v62  ;;  %v2579_v55 = vld [vmem:[#allocation8 + $0x150] sm:$0xff]  ;;  %v2580_v62 = vld [vmem:[#allocation8 + $0x158] sm:$0xff] }
 0x2c0   : > { %5858 = vmatprep.subr.bf16.mxu1 %v5857_v11 }
 0x2c2   : > { %5422 = vmatmul.mubr.f32.gmra.mrb[34].mxu1 %v7702_v49  ;;  %v5873_v49 = vpack.c.bf16 %v2580_v62, %v2579_v55  ;;  %v2878_v55 = vld [vmem:[#allocation8 + $0x198] sm:$0xff]  ;;  %v3497_v62 = vld [vmem:[#allocation11 + $0x8] sm:$0xff] }
 0x2c3   : > { %5424 = vmatprep.mubr.f32.mxu1 %v7696_v20  ;;  %5860 = vmatpush3.bf16.msra.mxu1 %v5857_v11  ;;  %v2581_v11 = vld [vmem:[#allocation8 + $0x160] sm:$0xff] }
 0x2c4   : > { %5862 = vmatprep.subr.bf16.mxu1 %v5861_v28 }
 0x2c6   : > { %5425 = vmatmul.mubr.f32.gmra.mrb[36].mxu1 %v7716_v46 }
 0x2c7   : > { %5427 = vmatprep.mubr.f32.mxu1 %v7718_v50  ;;  %5864 = vmatpush3.bf16.msra.mxu1 %v5861_v28  ;;  %v5877_v28 = vpack.c.bf16 %v2582_v38, %v2581_v11  ;;  %v3496_v11 = vld [vmem:[#allocation11] sm:$0xff] }
 0x2c8   : > { %5866 = vmatprep.subr.bf16.mxu1 %v5865_v33 }
 0x2ca   : > { %5428 = vmatmul.mubr.f32.gmra.mrb[38].mxu1 %v7743_v10 }
 0x2cb   : > { %5430 = vmatprep.mubr.f32.mxu1 %v7737_v1  ;;  %5868 = vmatpush3.bf16.msra.mxu1 %v5865_v33  ;;  %v2875_v33 = vld [vmem:[#allocation8 + $0x180] sm:$0xff] }
 0x2cc   : > { %5870 = vmatprep.subr.bf16.mxu1 %v5869_v54  ;;  %v5885_v17 = vpack.c.bf16 %v2876_v5, %v2875_v33  ;;  %v2879_v33 = vld [vmem:[#allocation8 + $0x1a0] sm:$0xff] }
 0x2ce   : > { %5431 = vmatmul.mubr.f32.gmra.mrb[40].mxu1 %v7757_v40 }
 0x2cf   : > { %5433 = vmatprep.mubr.f32.mxu1 %v7759_v51  ;;  %5872 = vmatpush3.bf16.msra.mxu1 %v5869_v54  ;;  %v2877_v54 = vld [vmem:[#allocation8 + $0x190] sm:$0xff] }
 0x2d0   : > { %5874 = vmatprep.subr.bf16.mxu1 %v5873_v49 }
 0x2d2   : > { %5434 = vmatmul.mubr.f32.gmra.mrb[42].mxu1 %v7789_v19 }
 0x2d3   : > { %5436 = vmatprep.mubr.f32.mxu1 %v7783_v16  ;;  %5876 = vmatpush3.bf16.msra.mxu1 %v5873_v49  ;;  %v3499_v49 = vld [vmem:[#allocation11 + $0x18] sm:$0xff] }
 0x2d4   : > { %5878 = vmatprep.subr.bf16.mxu1 %v5877_v28  ;;  %v5917_v38 = vpack.c.bf16 %v3499_v49, %v3497_v62  ;;  %v3506_v62 = vld [vmem:[#allocation11 + $0x50] sm:$0xff]  ;;  %v5925_v49 = vpack.c.bf16 %v3507_v26, %v3505_v47  ;;  %v3515_v26 = vld [vmem:[#allocation11 + $0x98] sm:$0xff] }
 0x2d6   : > { %5437 = vmatmul.mubr.f32.gmra.mrb[44].mxu1 %v7809_v22  ;;  %5918 = vmatprep.subr.bf16.mxu0 %v5917_v38 }
 0x2d7   : > { %5439 = vmatprep.mubr.f32.mxu1 %v7811_v53  ;;  %5880 = vmatpush3.bf16.msra.mxu1 %v5877_v28  ;;  %v3498_v28 = vld [vmem:[#allocation11 + $0x10] sm:$0xff] }
 0x2d8   : > { %5882 = vmatprep.subr.bf16.mxu1 %v5881_v7  ;;  %v5919_v5 = vpack.c.bf16 %v3498_v28, %v3496_v11  ;;  %v2882_v11 = vld [vmem:[#allocation8 + $0x1b8] sm:$0xff]  ;;  %v3509_v28 = vld [vmem:[#allocation11 + $0x68] sm:$0xff] }
 0x2da   : > { %5440 = vmatmul.mubr.f32.gmra.mrb[46].mxu1 %v7841_v34  ;;  %5920 = vmatpush1.bf16.msra.mxu0 %v5919_v5  ;;  %v3517_v5 = vld [vmem:[#allocation11 + $0xa8] sm:$0xff] }
 0x2db   : > { %5442 = vmatprep.mubr.f32.mxu1 %v7835_v48  ;;  %5884 = vmatpush3.bf16.msra.mxu1 %v5881_v7  ;;  %v5889_v7 = vpack.c.bf16 %v2878_v55, %v2877_v54  ;;  %v5893_v54 = vpack.c.bf16 %v2880_v60, %v2879_v33  ;;  %v2881_v55 = vld [vmem:[#allocation8 + $0x1b0] sm:$0xff]  ;;  %v5929_v60 = vpack.c.bf16 %v3511_v6, %v3509_v28  ;;  %v2886_v33 = vld [vmem:[#allocation8 + $0x1d8] sm:$0xff] }
 0x2dc   : > { %5886 = vmatprep.subr.bf16.mxu1 %v5885_v17  ;;  %5922 = vmatprep.subr.bf16.mxu0 %v5921_v59  ;;  %v5897_v12 = vpack.c.bf16 %v2882_v11, %v2881_v55  ;;  %v3513_v59 = vld [vmem:[#allocation11 + $0x88] sm:$0xff]  ;;  %v2887_v55 = vld [vmem:[#allocation8 + $0x1e0] sm:$0xff] }
 0x2dd   : > { %v2888_v11 = vld [vmem:[#allocation8 + $0x1e8] sm:$0xff]  ;;  %v3523_v6 = vld [vmem:[#allocation11 + $0xd8] sm:$0xff] }
 0x2de   : > { %5443 = vmatmul.mubr.f32.gmra.mrb[48].mxu1 %v7861_v63  ;;  %5924 = vmatpush1.bf16.msra.mxu0 %v5923_v18  ;;  %v3521_v28 = vld [vmem:[#allocation11 + $0xc8] sm:$0xff] }
 0x2df   : > { %5445 = vmatprep.mubr.f32.mxu1 %v7863_v36  ;;  %5926 = vmatprep.subr.bf16.mxu0 %v5925_v49 }
 0x2e2   : > { %5446 = vmatmul.mubr.f32.gmra.mrb[50].mxu1 %v7893_v41 }
 0x2e3   : > { %5448 = vmatprep.mubr.f32.mxu1 %v7887_v21 }
 0x2e6   : > { %5449 = vmatmul.mubr.f32.gmra.mrb[52].mxu1 %v7915_v42 }
 0x2e7   : > { %5451 = vmatprep.mubr.f32.mxu1 %v7917_v32 }
 0x2ea   : > { %5452 = vmatmul.mubr.f32.gmra.mrb[54].mxu1 %v7935_v37 }
 0x2eb   : > { %5454 = vmatprep.mubr.f32.mxu1 %v7932_v15 }
 0x2ee   : > { %5455 = vmatmul.mubr.f32.gmra.mrb[56].mxu1 %v7948_v4 }
 0x2ef   : > { %5457 = vmatprep.mubr.f32.mxu1 %v7950_v24 }
 0x2f2   : > { %5458 = vmatmul.mubr.f32.gmra.mrb[58].mxu1 %v7962_v3 }
 0x2f3   : > { %5460 = vmatprep.mubr.f32.mxu1 %v7964_v0 }
 0x2f6   : > { %5461 = vmatmul.mubr.f32.gmra.mrb[60].mxu1 %v7977_v29 }
 0x2f7   : > { %5463 = vmatprep.mubr.f32.mxu1 %v7979_v2 }
 0x2fa   : > { %5464 = vmatmul.mubr.f32.gmra.mrb[62].mxu1 %v7974_v45 }
 0x2fb   : > { %5498 = vmatprep.mubr.f32.mxu1 %v7696_v20  ;;  %v3504_v20 = vld [vmem:[#allocation11 + $0x40] sm:$0xff] }
 0x2fc   : > { %v5927_v38 = vpack.c.bf16 %v3506_v62, %v3504_v20  ;;  %v3519_v20 = vld [vmem:[#allocation11 + $0xb8] sm:$0xff] }
 0x2fd   : > { %v5937_v49 = vpack.c.bf16 %v3519_v20, %v3517_v5  ;;  %v3540_v5 = vld [vmem:[#allocation11 + $0x160] sm:$0xff]  ;;  %v3542_v20 = vld [vmem:[#allocation11 + $0x170] sm:$0xff] }
 0x2fe   : > { %5499 = vmatmul.mubr.f32.vlgmr.msra.gmra.mrb[32].mxu1 %v7716_v46  ;;  %v3508_v46 = vld [vmem:[#allocation11 + $0x60] sm:$0xff]  ;;  %5928 = vmatpush1.bf16.msra.mxu0 %v5927_v38 }
 0x2ff   : > { %5501 = vmatprep.mubr.f32.mxu1 %v7718_v50  ;;  %5888 = vmatpush3.bf16.msra.mxu1 %v5885_v17  ;;  %v3510_v50 = vld [vmem:[#allocation11 + $0x70] sm:$0xff]  ;;  %v2884_v17 = vld [vmem:[#allocation8 + $0x1c8] sm:$0xff] }
 0x300   : > { %5890 = vmatprep.subr.bf16.mxu1 %v5889_v7  ;;  %v5931_v47 = vpack.c.bf16 %v3510_v50, %v3508_v46  ;;  %v5901_v18 = vpack.c.bf16 %v2884_v17, %v2883_v52  ;;  %5930 = vmatprep.subr.bf16.mxu0 %v5929_v60  ;;  %v5909_v46 = vpack.c.bf16 %v2888_v11, %v2887_v55  ;;  %v2889_v50 = vld [vmem:[#allocation8 + $0x1f0] sm:$0xff]  ;;  %v2890_v52 = vld [vmem:[#allocation8 + $0x1f8] sm:$0xff]  ;;  %v3544_v55 = vld [vmem:[#allocation11 + $0x180] sm:$0xff] }
 0x301   : > { %v3525_v60 = vld [vmem:[#allocation11 + $0xe8] sm:$0xff]  ;;  %v3527_v17 = vld [vmem:[#allocation11 + $0xf8] sm:$0xff] }
 0x302   : > { %5502 = vmatmul.mubr.f32.gmra.mrb[34].mxu1 %v7743_v10  ;;  %v3512_v10 = vld [vmem:[#allocation11 + $0x80] sm:$0xff]  ;;  %5932 = vmatpush1.bf16.msra.mxu0 %v5931_v47  ;;  %v5945_v47 = vpack.c.bf16 %v3527_v17, %v3525_v60  ;;  %v3554_v17 = vld [vmem:[#allocation11 + $0x1d0] sm:$0xff] }
 0x303   : > { %5504 = vmatprep.mubr.f32.mxu1 %v7737_v1  ;;  %5892 = vmatpush3.bf16.msra.mxu1 %v5889_v7  ;;  %v3514_v1 = vld [vmem:[#allocation11 + $0x90] sm:$0xff]  ;;  %v5933_v7 = vpack.c.bf16 %v3515_v26, %v3513_v59  ;;  %v5913_v26 = vpack.c.bf16 %v2890_v52, %v2889_v50  ;;  %v3553_v50 = vld [vmem:[#allocation11 + $0x1c8] sm:$0xff]  ;;  %v3552_v60 = vld [vmem:[#allocation11 + $0x1c0] sm:$0xff] }
 0x304   : > { %5894 = vmatprep.subr.bf16.mxu1 %v5893_v54  ;;  %v5935_v62 = vpack.c.bf16 %v3514_v1, %v3512_v10  ;;  %v3538_v1 = vld [vmem:[#allocation11 + $0x150] sm:$0xff] }
 0x305   : > { %5934 = vmatprep.subr.bf16.mxu0 %v5933_v7  ;;  %v3543_v7 = vld [vmem:[#allocation11 + $0x178] sm:$0xff] }
 0x306   : > { %5505 = vmatmul.mubr.f32.gmra.mrb[36].mxu1 %v7757_v40  ;;  %v3516_v40 = vld [vmem:[#allocation11 + $0xa0] sm:$0xff]  ;;  %5936 = vmatpush1.bf16.msra.mxu0 %v5935_v62  ;;  %v5963_v62 = vpack.c.bf16 %v3542_v20, %v3540_v5 }
 0x307   : > { %5507 = vmatprep.mubr.f32.mxu1 %v7759_v51  ;;  %5896 = vmatpush3.bf16.msra.mxu1 %v5893_v54  ;;  %v3518_v51 = vld [vmem:[#allocation11 + $0xb0] sm:$0xff]  ;;  %v5905_v54 = vpack.c.bf16 %v2886_v33, %v2885_v43  ;;  %v3541_v43 = vld [vmem:[#allocation11 + $0x168] sm:$0xff] }
 0x308   : > { %5898 = vmatprep.subr.bf16.mxu1 %v5897_v12  ;;  %v5939_v38 = vpack.c.bf16 %v3518_v51, %v3516_v40  ;;  %5938 = vmatprep.subr.bf16.mxu0 %v5937_v49  ;;  %v5961_v33 = vpack.c.bf16 %v3543_v7, %v3541_v43  ;;  %v3545_v40 = vld [vmem:[#allocation11 + $0x188] sm:$0xff]  ;;  %v3547_v51 = vld [vmem:[#allocation11 + $0x198] sm:$0xff]  ;;  %v3546_v49 = vld [vmem:[#allocation11 + $0x190] sm:$0xff] }
 0x309   : > { %v5967_v11 = vpack.c.bf16 %v3546_v49, %v3544_v55 }
 0x30a   : > { %5508 = vmatmul.mubr.f32.gmra.mrb[38].mxu1 %v7789_v19  ;;  %v3520_v19 = vld [vmem:[#allocation11 + $0xc0] sm:$0xff]  ;;  %5940 = vmatpush1.bf16.msra.mxu0 %v5939_v38 }
 0x30b   : > { %5510 = vmatprep.mubr.f32.mxu1 %v7783_v16  ;;  %5900 = vmatpush3.bf16.msra.mxu1 %v5897_v12  ;;  %v3522_v16 = vld [vmem:[#allocation11 + $0xd0] sm:$0xff]  ;;  %v5941_v12 = vpack.c.bf16 %v3523_v6, %v3521_v28  ;;  %v3549_v28 = vld [vmem:[#allocation11 + $0x1a8] sm:$0xff]  ;;  %v3551_v6 = vld [vmem:[#allocation11 + $0x1b8] sm:$0xff] }
 0x30c   : > { %5902 = vmatprep.subr.bf16.mxu1 %v5901_v18  ;;  %v5943_v59 = vpack.c.bf16 %v3522_v16, %v3520_v19  ;;  %v5969_v38 = vpack.c.bf16 %v3551_v6, %v3549_v28  ;;  %v3548_v19 = vld [vmem:[#allocation11 + $0x1a0] sm:$0xff]  ;;  %v3550_v16 = vld [vmem:[#allocation11 + $0x1b0] sm:$0xff] }
 0x30d   : > { %5942 = vmatprep.subr.bf16.mxu0 %v5941_v12  ;;  %v3555_v12 = vld [vmem:[#allocation11 + $0x1d8] sm:$0xff] }
 0x30e   : > { %5511 = vmatmul.mubr.f32.gmra.mrb[40].mxu1 %v7809_v22  ;;  %v3524_v22 = vld [vmem:[#allocation11 + $0xe0] sm:$0xff]  ;;  %5944 = vmatpush1.bf16.msra.mxu0 %v5943_v59  ;;  %v5973_v52 = vpack.c.bf16 %v3555_v12, %v3553_v50  ;;  %v5975_v59 = vpack.c.bf16 %v3554_v17, %v3552_v60 }
 0x30f   : > { %5513 = vmatprep.mubr.f32.mxu1 %v7811_v53  ;;  %5904 = vmatpush3.bf16.msra.mxu1 %v5901_v18  ;;  %v3526_v53 = vld [vmem:[#allocation11 + $0xf0] sm:$0xff] }
 0x310   : > { %5906 = vmatprep.subr.bf16.mxu1 %v5905_v54  ;;  %v5947_v10 = vpack.c.bf16 %v3526_v53, %v3524_v22  ;;  %5946 = vmatprep.subr.bf16.mxu0 %v5945_v47  ;;  %v3557_v22 = vld [vmem:[#allocation11 + $0x1e8] sm:$0xff]  ;;  %v3559_v53 = vld [vmem:[#allocation11 + $0x1f8] sm:$0xff]  ;;  %v3556_v47 = vld [vmem:[#allocation11 + $0x1e0] sm:$0xff] }
 0x312   : > { %5514 = vmatmul.mubr.f32.gmra.mrb[42].mxu1 %v7841_v34  ;;  %5948 = vmatpush1.bf16.msra.mxu0 %v5947_v10  ;;  %v8333_v34 = vld [vmem:[#allocation32_spill] sm:$0xff] }
 0x313   : > { %5516 = vmatprep.mubr.f32.mxu1 %v7835_v48  ;;  %5908 = vmatpush3.bf16.msra.mxu1 %v5905_v54  ;;  %v8069_v48 = vld [vmem:[#allocation2 + $0x100] sm:$0xff]  ;;  %v5965_v54 = vpack.c.bf16 %v3547_v51, %v3545_v40 }
 0x314   : > { %5910 = vmatprep.subr.bf16.mxu1 %v5909_v46  ;;  %v3558_v10 = vld [vmem:[#allocation11 + $0x1f0] sm:$0xff] }
 0x316   : > { %5517 = vmatmul.mubr.f32.gmra.mrb[44].mxu1 %v7861_v63  ;;  %v8336_v63 = vld [vmem:[#allocation35_spill] sm:$0xff] }
 0x317   : > { %5519 = vmatprep.mubr.f32.mxu1 %v7863_v36  ;;  %5912 = vmatpush3.bf16.msra.mxu1 %v5909_v46  ;;  %v8337_v36 = vld [vmem:[#allocation36_spill] sm:$0xff]  ;;  %v5971_v46 = vpack.c.bf16 %v3550_v16, %v3548_v19 }
 0x318   : > { %5914 = vmatprep.subr.bf16.mxu1 %v5913_v26 }
 0x31a   : > { %5520 = vmatmul.mubr.f32.gmra.mrb[46].mxu1 %v7893_v41  ;;  %v2872_v41 = vld [vmem:[#allocation3 + $0x112] sm:$0xff] }
 0x31b   : > { %5522 = vmatprep.mubr.f32.mxu1 %v7887_v21  ;;  %5916 = vmatpush3.bf16.msra.mxu1 %v5913_v26  ;;  %v2871_v21 = vld [vmem:[#allocation3 + $0x10a] sm:$0xff]  ;;  %v5977_v26 = vpack.c.bf16 %v3559_v53, %v3557_v22 }
 0x31e   : > { %5523 = vmatmul.mubr.f32.gmra.mrb[48].mxu1 %v7915_v42  ;;  %v3531_v42 = vld [vmem:[#allocation11 + $0x118] sm:$0xff] }
 0x31f   : > { %5525 = vmatprep.mubr.f32.mxu1 %v7917_v32 }
 0x322   : > { %5526 = vmatmul.mubr.f32.gmra.mrb[50].mxu1 %v7935_v37  ;;  %v3533_v37 = vld [vmem:[#allocation11 + $0x128] sm:$0xff] }
 0x323   : > { %5528 = vmatprep.mubr.f32.mxu1 %v7932_v15 }
 0x326   : > { %5529 = vmatmul.mubr.f32.gmra.mrb[52].mxu1 %v7948_v4 }
 0x327   : > { %5531 = vmatprep.mubr.f32.mxu1 %v7950_v24  ;;  %v3532_v24 = vld [vmem:[#allocation11 + $0x120] sm:$0xff] }
 0x32a   : > { %5532 = vmatmul.mubr.f32.gmra.mrb[54].mxu1 %v7962_v3 }
 0x32b   : > { %5534 = vmatprep.mubr.f32.mxu1 %v7964_v0  ;;  %v3537_v0 = vld [vmem:[#allocation11 + $0x148] sm:$0xff] }
 0x32e   : > { %5535 = vmatmul.mubr.f32.gmra.mrb[56].mxu1 %v7977_v29 }
 0x32f   : > { %5537 = vmatprep.mubr.f32.mxu1 %v7979_v2  ;;  %v3536_v2 = vld [vmem:[#allocation11 + $0x140] sm:$0xff] }
 0x330   : > { %v5959_v18 = vpack.c.bf16 %v3538_v1, %v3536_v2 }
 0x332   : > { %5538 = vmatmul.mubr.f32.gmra.mrb[58].mxu1 %v7974_v45  ;;  %v3539_v45 = vld [vmem:[#allocation11 + $0x158] sm:$0xff] }
 0x333   : > { %5540 = vmatprep.mubr.f32.mxu1 %v8069_v48  ;;  %v5957_v29 = vpack.c.bf16 %v3539_v45, %v3537_v0 }
 0x336   : > { %5541 = vmatmul.mubr.f32.gmra.mrb[60].mxu1 %v8069_v48 }
 0x337   : > { %5543 = vmatprep.mubr.f32.mxu1 %v8069_v48 }
 0x33a   : > { %5544 = vmatmul.mubr.f32.gmra.mrb[62].mxu1 %v8069_v48 }
 0x33b   : > { %5578 = vmatprep.mubr.f32.mxu1 %v7764_v56  ;;  %v8327_v56 = vld [vmem:[#allocation26_spill] sm:$0xff] }
 0x33e   : > { %5579 = vmatmul.mubr.f32.vlgmr.msra.gmra.mrb[32].mxu1 %v7766_v58  ;;  %v8328_v58 = vld [vmem:[#allocation27_spill] sm:$0xff] }
 0x33f   : > { %5581 = vmatprep.mubr.f32.mxu1 %v7794_v13  ;;  %v8329_v13 = vld [vmem:[#allocation28_spill] sm:$0xff] }
 0x342   : > { %5582 = vmatmul.mubr.f32.gmra.mrb[34].mxu1 %v7796_v31  ;;  %v8330_v31 = vld [vmem:[#allocation29_spill] sm:$0xff] }
 0x343   : > { %5584 = vmatprep.mubr.f32.mxu1 %v7816_v8  ;;  %v8331_v8 = vld [vmem:[#allocation30_spill] sm:$0xff] }
 0x346   : > { %5585 = vmatmul.mubr.f32.gmra.mrb[36].mxu1 %v7818_v23  ;;  %v8332_v23 = vld [vmem:[#allocation31_spill] sm:$0xff] }
 0x347   : > { %5587 = vmatprep.mubr.f32.mxu1 %v7846_v39  ;;  %v8334_v39 = vld [vmem:[#allocation33_spill] sm:$0xff] }
 0x34a   : > { %5588 = vmatmul.mubr.f32.gmra.mrb[38].mxu1 %v7848_v35  ;;  %v8335_v35 = vld [vmem:[#allocation34_spill] sm:$0xff] }
 0x34b   : > { %5590 = vmatprep.mubr.f32.mxu1 %v7868_v61  ;;  %v2870_v61 = vld [vmem:[#allocation3 + $0x102] sm:$0xff] }
 0x34e   : > { %5591 = vmatmul.mubr.f32.gmra.mrb[40].mxu1 %v7870_v25  ;;  %v8338_v25 = vld [vmem:[#allocation37_spill] sm:$0xff] }
 0x34f   : > { %5593 = vmatprep.mubr.f32.mxu1 %v7900_v9  ;;  %v2873_v9 = vld [vmem:[#allocation3 + $0x11a] sm:$0xff] }
 0x352   : > { %5594 = vmatmul.mubr.f32.gmra.mrb[42].mxu1 %v7902_v30  ;;  %v3529_v30 = vld [vmem:[#allocation11 + $0x108] sm:$0xff] }
 0x353   : > { %5596 = vmatprep.mubr.f32.mxu1 %v7919_v44  ;;  %v5949_v32 = vpack.c.bf16 %v3531_v42, %v3529_v30  ;;  %v3528_v44 = vld [vmem:[#allocation11 + $0x100] sm:$0xff] }
 0x355   : > { %5950 = vmatprep.subr.bf16.mxu0 %v5949_v32 }
 0x356   : > { %5597 = vmatmul.mubr.f32.gmra.mrb[44].mxu1 %v7921_v57  ;;  %v3530_v57 = vld [vmem:[#allocation11 + $0x110] sm:$0xff] }
 0x357   : > { %5599 = vmatprep.mubr.f32.mxu1 %v7937_v14  ;;  %v5951_v15 = vpack.c.bf16 %v3530_v57, %v3528_v44  ;;  %v3535_v14 = vld [vmem:[#allocation11 + $0x138] sm:$0xff] }
 0x358   : > { %v5953_v4 = vpack.c.bf16 %v3535_v14, %v3533_v37 }
 0x359   : > { %5952 = vmatpush1.bf16.msra.mxu0 %v5951_v15 }
 0x35a   : > { %5600 = vmatmul.mubr.f32.gmra.mrb[46].mxu1 %v8327_v56  ;;  %5954 = vmatprep.subr.bf16.mxu0 %v5953_v4  ;;  %v5979_v56 = vpack.c.bf16 %v3558_v10, %v3556_v47 }
 0x35b   : > { %5602 = vmatprep.mubr.f32.mxu1 %v8328_v58  ;;  %v3561_v58 = vld [vmem:[#allocation11 + $0x208] sm:$0xff] }
 0x35e   : > { %5603 = vmatmul.mubr.f32.gmra.mrb[48].mxu1 %v7955_v27  ;;  %v3534_v27 = vld [vmem:[#allocation11 + $0x130] sm:$0xff] }
 0x35f   : > { %5605 = vmatprep.mubr.f32.mxu1 %v8329_v13  ;;  %v5955_v3 = vpack.c.bf16 %v3534_v27, %v3532_v24  ;;  %v3563_v13 = vld [vmem:[#allocation11 + $0x218] sm:$0xff] }
 0x361   : > { %5956 = vmatpush1.bf16.msra.mxu0 %v5955_v3 }
 0x362   : > { %5606 = vmatmul.mubr.f32.gmra.mrb[50].mxu1 %v8330_v31  ;;  %5958 = vmatprep.subr.bf16.mxu0 %v5957_v29  ;;  %v5981_v31 = vpack.c.bf16 %v3563_v13, %v3561_v58 }
 0x363   : > { %5608 = vmatprep.mubr.f32.mxu1 %v8331_v8  ;;  %v8103_v8 = vld [vmem:[#allocation9] ss:$0 sm:$0xff] }
 0x365   : > { %5960 = vmatpush1.bf16.msra.mxu0 %v5959_v18 }
 0x366   : > { %5609 = vmatmul.mubr.f32.gmra.mrb[52].mxu1 %v8332_v23  ;;  %5962 = vmatprep.subr.bf16.mxu0 %v5961_v33 }
 0x367   : > { %5611 = vmatprep.mubr.f32.mxu1 %v8333_v34 }
 0x369   : > { %5964 = vmatpush1.bf16.msra.mxu0 %v5963_v62 }
 0x36a   : > { %5612 = vmatmul.mubr.f32.gmra.mrb[54].mxu1 %v8334_v39  ;;  %5966 = vmatprep.subr.bf16.mxu0 %v5965_v54 }
 0x36b   : > { %5614 = vmatprep.mubr.f32.mxu1 %v8335_v35 }
 0x36d   : > { %5968 = vmatpush1.bf16.msra.mxu0 %v5967_v11 }
 0x36e   : > { %5615 = vmatmul.mubr.f32.gmra.mrb[56].mxu1 %v8336_v63  ;;  %5970 = vmatprep.subr.bf16.mxu0 %v5969_v38 }
 0x36f   : > { %5617 = vmatprep.mubr.f32.mxu1 %v8337_v36 }
 0x371   : > { %5972 = vmatpush1.bf16.msra.mxu0 %v5971_v46 }
 0x372   : > { %5618 = vmatmul.mubr.f32.gmra.mrb[58].mxu1 %v8338_v25  ;;  %5974 = vmatprep.subr.bf16.mxu0 %v5973_v52 }
 0x373   : > { %5620 = vmatprep.mubr.f32.mxu1 %v2870_v61 }
 0x375   : > { %5976 = vmatpush1.bf16.msra.mxu0 %v5975_v59 }
 0x376   : > { %5621 = vmatmul.mubr.f32.gmra.mrb[60].mxu1 %v2871_v21  ;;  %5978 = vmatprep.subr.bf16.mxu0 %v5977_v26 }
 0x377   : > { %5623 = vmatprep.mubr.f32.mxu1 %v2872_v41 }
 0x379   : > { %5980 = vmatpush1.bf16.msra.mxu0 %v5979_v56 }
 0x37a   : > { %5624 = vmatmul.mubr.f32.gmra.mrb[62].mxu1 %v2873_v9  ;;  %5982 = vmatprep.subr.bf16.mxu0 %v5981_v31  ;;  %v3560_v31 = vld [vmem:[#allocation11 + $0x200] sm:$0xff] }
 0x411   : > { %v5580_v23 = vpop.f32.mrb[32].mxu1 }
 0x412   : > { %v3156_v34 = vadd.f32 %v5580_v23, %v8103_v8  ;;  %v2957_v39 = vpop.f32.mrb[33].mxu1  ;;  %v3562_v23 = vld [vmem:[#allocation11 + $0x210] sm:$0xff] }
 0x413   : > { %v3155_v35 = vadd.f32 %v8103_v8, %v2957_v39 }
 0x414   : > { %v3188_v63 = vmax.f32 %v3156_v34, 0.0 }
 0x415   : > { %v3187_v36 = vmax.f32 %v3155_v35, 0.0  ;;  %v5583_v61 = vpop.f32.mrb[34].mxu1 }
 0x416   : > { %3220 = vst [vmem:[#allocation2 + $0x8] sm:$0xff] %v3188_v63  ;;  %v3158_v25 = vadd.f32 %v5583_v61, %v8103_v8  ;;  %v2967_v21 = vpop.f32.mrb[35].mxu1  ;;  %v3565_v61 = vld [vmem:[#allocation11 + $0x228] sm:$0xff] }
 0x417   : > { %3219 = vst [vmem:[#allocation2] sm:$0xff] %v3187_v36  ;;  %v3157_v41 = vadd.f32 %v8103_v8, %v2967_v21 }
 0x418   : > { %v3190_v9 = vmax.f32 %v3158_v25, 0.0  ;;  %v3567_v25 = vld [vmem:[#allocation11 + $0x238] sm:$0xff] }
 0x419   : > { %v3189_v30 = vmax.f32 %v3157_v41, 0.0  ;;  %v5586_v42 = vpop.f32.mrb[36].mxu1 }
 0x41a   : > { %3222 = vst [vmem:[#allocation2 + $0x18] sm:$0xff] %v3190_v9  ;;  %v3160_v32 = vadd.f32 %v5586_v42, %v8103_v8  ;;  %v2977_v44 = vpop.f32.mrb[37].mxu1 }
 0x41b   : > { %3221 = vst [vmem:[#allocation2 + $0x10] sm:$0xff] %v3189_v30  ;;  %v3159_v57 = vadd.f32 %v8103_v8, %v2977_v44 }
 0x41c   : > { %v3192_v15 = vmax.f32 %v3160_v32, 0.0  ;;  %v5983_v32 = vpack.c.bf16 %v3562_v23, %v3560_v31 }
 0x41d   : > { %v3191_v37 = vmax.f32 %v3159_v57, 0.0  ;;  %v5589_v14 = vpop.f32.mrb[38].mxu1 }
 0x41e   : > { %v3283_v4 = vld [vmem:[#allocation2 + $0x2] sm:$0xff]  ;;  %3224 = vst [vmem:[#allocation2 + $0x28] sm:$0xff] %v3192_v15  ;;  %v3162_v24 = vadd.f32 %v5589_v14, %v8103_v8  ;;  %v2987_v27 = vpop.f32.mrb[39].mxu1  ;;  %v3564_v14 = vld [vmem:[#allocation11 + $0x220] sm:$0xff] }
 0x41f   : > { %v3315_v3 = vmax.f32 %v3187_v36, %v3283_v4  ;;  %3223 = vst [vmem:[#allocation2 + $0x20] sm:$0xff] %v3191_v37  ;;  %v3161_v0 = vadd.f32 %v8103_v8, %v2987_v27  ;;  %v3566_v4 = vld [vmem:[#allocation11 + $0x230] sm:$0xff] }
 0x420   : > { %v8113_v45 = vmax.f32 %v3162_v24, 0.0 }
 0x421   : > { %v3193_v29 = vmax.f32 %v3161_v0, 0.0  ;;  %v5592_v2 = vpop.f32.mrb[40].mxu1  ;;  %v3351_v1 = vmax.f32 %v3315_v3, %v3191_v37 }
 0x422   : > { %v3284_v18 = vld [vmem:[#allocation2 + $0xa] sm:$0xff]  ;;  %v3285_v43 = vld [vmem:[#allocation2 + $0x12] sm:$0xff]  ;;  %3226 = vst [vmem:[#allocation2 + $0x38] sm:$0xff] %v8113_v45  ;;  %v3164_v7 = vadd.f32 %v5592_v2, %v8103_v8  ;;  %v2997_v33 = vpop.f32.mrb[41].mxu1 }
 0x423   : > { %v3316_v5 = vmax.f32 %v3188_v63, %v3284_v18  ;;  %v3317_v20 = vmax.f32 %v3189_v30, %v3285_v43  ;;  %3225 = vst [vmem:[#allocation2 + $0x30] sm:$0xff] %v3193_v29  ;;  %v3163_v62 = vadd.f32 %v8103_v8, %v2997_v33  ;;  %v3569_v43 = vld [vmem:[#allocation11 + $0x248] sm:$0xff] }
 0x424   : > { %v8118_v40 = vmax.f32 %v3164_v7, 0.0  ;;  %v3571_v7 = vld [vmem:[#allocation11 + $0x258] sm:$0xff] }
 0x425   : > { %v3352_v51 = vmax.f32 %v3316_v5, %v3192_v15  ;;  %v3353_v54 = vmax.f32 %v3317_v20, %v3193_v29  ;;  %v3195_v55 = vmax.f32 %v3163_v62, 0.0  ;;  %v5595_v49 = vpop.f32.mrb[42].mxu1 }
 0x426   : > { %v3286_v11 = vld [vmem:[#allocation2 + $0x1a] sm:$0xff]  ;;  %3228 = vst [vmem:[#allocation2 + $0x48] sm:$0xff] %v8118_v40  ;;  %v3166_v28 = vadd.f32 %v5595_v49, %v8103_v8  ;;  %v3007_v6 = vpop.f32.mrb[43].mxu1  ;;  %v3287_v38 = vld [vmem:[#allocation2 + $0x22] sm:$0xff] }
 0x427   : > { %v3318_v19 = vmax.f32 %v3190_v9, %v3286_v11  ;;  %3227 = vst [vmem:[#allocation2 + $0x40] sm:$0xff] %v3195_v55  ;;  %v3165_v16 = vadd.f32 %v8103_v8, %v3007_v6  ;;  %v3319_v46 = vmax.f32 %v3191_v37, %v3287_v38  ;;  %v3387_v50 = vmax.f32 %v3351_v1, %v3287_v38 }
 0x428   : > { %v8123_v12 = vmax.f32 %v3166_v28, 0.0  ;;  %v3568_v28 = vld [vmem:[#allocation11 + $0x240] sm:$0xff] }
 0x429   : > { %v3354_v52 = vmax.f32 %v3318_v19, %v8113_v45  ;;  %v8126_v60 = vmax.f32 %v3165_v16, 0.0  ;;  %v5598_v17 = vpop.f32.mrb[44].mxu1  ;;  %v3355_v59 = vmax.f32 %v3319_v46, %v3195_v55  ;;  %3419 = vst [vmem:[#allocation3] sm:$0xff] %v3387_v50  ;;  %v5989_v19 = vpack.c.bf16 %v3571_v7, %v3569_v43  ;;  %v3570_v16 = vld [vmem:[#allocation11 + $0x250] sm:$0xff]  ;;  %v3573_v46 = vld [vmem:[#allocation11 + $0x268] sm:$0xff]  ;;  %v3575_v50 = vld [vmem:[#allocation11 + $0x278] sm:$0xff] }
 0x42a   : > { %v3288_v22 = vld [vmem:[#allocation2 + $0x2a] sm:$0xff]  ;;  %v3289_v53 = vld [vmem:[#allocation2 + $0x32] sm:$0xff]  ;;  %3230 = vst [vmem:[#allocation2 + $0x58] sm:$0xff] %v8123_v12  ;;  %v3168_v26 = vadd.f32 %v5598_v17, %v8103_v8  ;;  %v3017_v47 = vpop.f32.mrb[45].mxu1 }
 0x42b   : > { %v3320_v10 = vmax.f32 %v3192_v15, %v3288_v22  ;;  %v3321_v56 = vmax.f32 %v3193_v29, %v3289_v53  ;;  %v3388_v58 = vmax.f32 %v3352_v51, %v3288_v22  ;;  %v3389_v13 = vmax.f32 %v3353_v54, %v3289_v53  ;;  %3229 = vst [vmem:[#allocation2 + $0x50] sm:$0xff] %v8126_v60  ;;  %v3572_v53 = vld [vmem:[#allocation11 + $0x260] sm:$0xff] }
 0x42c   : > { %v8131_v34 = vmax.f32 %v3168_v26, 0.0  ;;  %v3167_v39 = vadd.f32 %v8103_v8, %v3017_v47  ;;  %v5985_v29 = vpack.c.bf16 %v3567_v25, %v3565_v61  ;;  %v5987_v51 = vpack.c.bf16 %v3566_v4, %v3564_v14  ;;  %v3577_v25 = vld [vmem:[#allocation11 + $0x288] sm:$0xff]  ;;  %v3576_v4 = vld [vmem:[#allocation11 + $0x280] sm:$0xff] }
 0x42d   : > { %3421 = vst [vmem:[#allocation3 + $0x10] sm:$0xff] %v3389_v13  ;;  %3420 = vst [vmem:[#allocation3 + $0x8] sm:$0xff] %v3388_v58  ;;  %v3356_v35 = vmax.f32 %v3320_v10, %v8118_v40  ;;  %v3357_v63 = vmax.f32 %v3321_v56, %v8126_v60  ;;  %v5601_v36 = vpop.f32.mrb[46].mxu1  ;;  %v5991_v56 = vpack.c.bf16 %v3570_v16, %v3568_v28  ;;  %v3574_v13 = vld [vmem:[#allocation11 + $0x270] sm:$0xff]  ;;  %v3585_v16 = vld [vmem:[#allocation11 + $0x2c8] sm:$0xff] }
 0x42e   : > { %v3290_v21 = vld [vmem:[#allocation2 + $0x3a] sm:$0xff]  ;;  %v3291_v41 = vld [vmem:[#allocation2 + $0x42] sm:$0xff]  ;;  %3232 = vst [vmem:[#allocation2 + $0x68] sm:$0xff] %v8131_v34  ;;  %v8137_v9 = vmax.f32 %v3167_v39, 0.0  ;;  %v3170_v30 = vadd.f32 %v5601_v36, %v8103_v8  ;;  %v3027_v42 = vpop.f32.mrb[47].mxu1  ;;  %v5993_v58 = vpack.c.bf16 %v3575_v50, %v3573_v46 }
 0x42f   : > { %v3322_v44 = vmax.f32 %v8113_v45, %v3290_v21  ;;  %v3323_v57 = vmax.f32 %v3195_v55, %v3291_v41  ;;  %v3390_v15 = vmax.f32 %v3354_v52, %v3290_v21  ;;  %v3169_v37 = vadd.f32 %v8103_v8, %v3027_v42  ;;  %v3579_v21 = vld [vmem:[#allocation11 + $0x298] sm:$0xff] }
 0x430   : > { %3231 = vst [vmem:[#allocation2 + $0x60] sm:$0xff] %v8137_v9  ;;  %v8143_v24 = vmax.f32 %v3170_v30, 0.0  ;;  %v3391_v27 = vmax.f32 %v3355_v59, %v3291_v41  ;;  %v4538_v3 = vld [vmem:[#allocation3 + $0x4] ss:$0 sm:$0xff]  ;;  %v4537_v0 = vld [vmem:[#allocation3] ss:$0 sm:$0xff] }
 0x431   : > { %3422 = vst [vmem:[#allocation3 + $0x18] sm:$0xff] %v3390_v15  ;;  %v3358_v2 = vmax.f32 %v3322_v44, %v8123_v12  ;;  %v3359_v1 = vmax.f32 %v3323_v57, %v8137_v9  ;;  %v8147_v45 = vmax.f32 %v3169_v37, 0.0  ;;  %v5604_v18 = vpop.f32.mrb[48].mxu1  ;;  %3860 = vmatprep.mubr.f32.mxu0 %v4538_v3  ;;  %v5995_v44 = vpack.c.bf16 %v3574_v13, %v3572_v53 }
 0x432   : > { %v3292_v33 = vld [vmem:[#allocation2 + $0x4a] sm:$0xff]  ;;  %v3293_v5 = vld [vmem:[#allocation2 + $0x52] sm:$0xff]  ;;  %3234 = vst [vmem:[#allocation2 + $0x78] sm:$0xff] %v8143_v24  ;;  %v3172_v20 = vadd.f32 %v5604_v18, %v8103_v8  ;;  %v3037_v62 = vpop.f32.mrb[49].mxu1  ;;  %3423 = vst [vmem:[#allocation3 + $0x20] sm:$0xff] %v3391_v27  ;;  %3861 = vmatmul.mubr.f32.vlgmr.msra.gmra.mrb[32].mxu0 %v4537_v0  ;;  %v5997_v0 = vpack.c.bf16 %v3579_v21, %v3577_v25 }
 0x433   : > { %v3324_v54 = vmax.f32 %v8118_v40, %v3292_v33  ;;  %v3325_v55 = vmax.f32 %v8126_v60, %v3293_v5  ;;  %v3392_v49 = vmax.f32 %v3356_v35, %v3292_v33  ;;  %v3393_v11 = vmax.f32 %v3357_v63, %v3293_v5  ;;  %3233 = vst [vmem:[#allocation2 + $0x70] sm:$0xff] %v8147_v45  ;;  %v3580_v5 = vld [vmem:[#allocation11 + $0x2a0] sm:$0xff]  ;;  %v3589_v25 = vld [vmem:[#allocation11 + $0x2e8] sm:$0xff]  ;;  %v3591_v21 = vld [vmem:[#allocation11 + $0x2f8] sm:$0xff] }
 0x434   : > { %5984 = vmatpush1.bf16.msra.mxu0 %v5983_v32  ;;  %v8154_v6 = vmax.f32 %v3172_v20, 0.0  ;;  %v3171_v38 = vadd.f32 %v8103_v8, %v3037_v62 }
 0x435   : > { %5986 = vmatprep.subr.bf16.mxu0 %v5985_v29  ;;  %3424 = vst [vmem:[#allocation3 + $0x28] sm:$0xff] %v3392_v49  ;;  %3425 = vst [vmem:[#allocation3 + $0x30] sm:$0xff] %v3393_v11  ;;  %v3360_v40 = vmax.f32 %v3324_v54, %v8131_v34  ;;  %v3361_v52 = vmax.f32 %v3325_v55, %v8147_v45  ;;  %v5607_v60 = vpop.f32.mrb[50].mxu1  ;;  %v3578_v29 = vld [vmem:[#allocation11 + $0x290] sm:$0xff] }
 0x436   : > { %3236 = vst [vmem:[#allocation2 + $0x88] sm:$0xff] %v8154_v6  ;;  %v8160_v17 = vmax.f32 %v3171_v38, 0.0  ;;  %v3174_v59 = vadd.f32 %v5607_v60, %v8103_v8  ;;  %v3047_v22 = vpop.f32.mrb[51].mxu1  ;;  %v5999_v54 = vpack.c.bf16 %v3578_v29, %v3576_v4  ;;  %v3582_v49 = vld [vmem:[#allocation11 + $0x2b0] sm:$0xff]  ;;  %v3587_v60 = vld [vmem:[#allocation11 + $0x2d8] sm:$0xff] }
 0x437   : > { %v3294_v26 = vld [vmem:[#allocation2 + $0x5a] sm:$0xff]  ;;  %v3295_v47 = vld [vmem:[#allocation2 + $0x62] sm:$0xff]  ;;  %v3173_v10 = vadd.f32 %v8103_v8, %v3047_v22 }
 0x438   : > { %5988 = vmatpush1.bf16.msra.mxu0 %v5987_v51  ;;  %v3326_v31 = vmax.f32 %v8123_v12, %v3294_v26  ;;  %v3327_v23 = vmax.f32 %v8137_v9, %v3295_v47  ;;  %v3394_v39 = vmax.f32 %v3358_v2, %v3294_v26  ;;  %v3395_v35 = vmax.f32 %v3359_v1, %v3295_v47  ;;  %v3581_v2 = vld [vmem:[#allocation11 + $0x2a8] sm:$0xff]  ;;  %v3583_v1 = vld [vmem:[#allocation11 + $0x2b8] sm:$0xff] }
 0x439   : > { %3235 = vst [vmem:[#allocation2 + $0x80] sm:$0xff] %v8160_v17  ;;  %5990 = vmatprep.subr.bf16.mxu0 %v5989_v19  ;;  %v8167_v63 = vmax.f32 %v3174_v59, 0.0  ;;  %v8169_v36 = vmax.f32 %v3173_v10, 0.0  ;;  %v5610_v61 = vpop.f32.mrb[52].mxu1  ;;  %v6001_v55 = vpack.c.bf16 %v3583_v1, %v3581_v2  ;;  %v6003_v47 = vpack.c.bf16 %v3582_v49, %v3580_v5 }
 0x43a   : > { %3426 = vst [vmem:[#allocation3 + $0x38] sm:$0xff] %v3394_v39  ;;  %3427 = vst [vmem:[#allocation3 + $0x40] sm:$0xff] %v3395_v35  ;;  %v3362_v41 = vmax.f32 %v3326_v31, %v8143_v24  ;;  %v3296_v30 = vld [vmem:[#allocation2 + $0x6a] sm:$0xff]  ;;  %v3297_v12 = vld [vmem:[#allocation2 + $0x72] sm:$0xff]  ;;  %v3363_v9 = vmax.f32 %v3327_v23, %v8160_v17  ;;  %v3176_v42 = vadd.f32 %v5610_v61, %v8103_v8  ;;  %v3057_v32 = vpop.f32.mrb[53].mxu1 }
 0x43b   : > { %v3328_v57 = vmax.f32 %v8131_v34, %v3296_v30  ;;  %v3329_v15 = vmax.f32 %v8147_v45, %v3297_v12  ;;  %v3396_v37 = vmax.f32 %v3360_v40, %v3296_v30  ;;  %v3397_v14 = vmax.f32 %v3361_v52, %v3297_v12  ;;  %3238 = vst [vmem:[#allocation2 + $0x98] sm:$0xff] %v8167_v63  ;;  %v3584_v31 = vld [vmem:[#allocation11 + $0x2c0] sm:$0xff]  ;;  %v3586_v61 = vld [vmem:[#allocation11 + $0x2d0] sm:$0xff] }
 0x43c   : > { %3237 = vst [vmem:[#allocation2 + $0x90] sm:$0xff] %v8169_v36  ;;  %5992 = vmatpush1.bf16.msra.mxu0 %v5991_v56  ;;  %v8178_v27 = vmax.f32 %v3176_v42, 0.0  ;;  %v3175_v3 = vadd.f32 %v8103_v8, %v3057_v32  ;;  %v6005_v35 = vpack.c.bf16 %v3587_v60, %v3585_v16  ;;  %v3588_v42 = vld [vmem:[#allocation11 + $0x2e0] sm:$0xff]  ;;  %v3594_v16 = vld [vmem:[#allocation11 + $0x310] sm:$0xff] }
 0x43d   : > { %5994 = vmatprep.subr.bf16.mxu0 %v5993_v58  ;;  %3429 = vst [vmem:[#allocation3 + $0x50] sm:$0xff] %v3397_v14  ;;  %3428 = vst [vmem:[#allocation3 + $0x48] sm:$0xff] %v3396_v37  ;;  %v3364_v34 = vmax.f32 %v3328_v57, %v8154_v6  ;;  %v3365_v45 = vmax.f32 %v3329_v15, %v8169_v36  ;;  %v5613_v18 = vpop.f32.mrb[54].mxu1  ;;  %v6007_v15 = vpack.c.bf16 %v3586_v61, %v3584_v31  ;;  %v3590_v14 = vld [vmem:[#allocation11 + $0x2f0] sm:$0xff] }
 0x43e   : > { %3240 = vst [vmem:[#allocation2 + $0xa8] sm:$0xff] %v8178_v27  ;;  %v8184_v43 = vmax.f32 %v3175_v3, 0.0  ;;  %v3178_v7 = vadd.f32 %v5613_v18, %v8103_v8  ;;  %v3067_v33 = vpop.f32.mrb[55].mxu1  ;;  %v6009_v37 = vpack.c.bf16 %v3591_v21, %v3589_v25  ;;  %v3595_v18 = vld [vmem:[#allocation11 + $0x318] sm:$0xff]  ;;  %v3601_v21 = vld [vmem:[#allocation11 + $0x348] sm:$0xff] }
 0x43f   : > { %v3177_v51 = vadd.f32 %v8103_v8, %v3067_v33 }
 0x440   : > { %v3298_v20 = vld [vmem:[#allocation2 + $0x7a] sm:$0xff]  ;;  %v3299_v62 = vld [vmem:[#allocation2 + $0x82] sm:$0xff]  ;;  %5996 = vmatpush1.bf16.msra.mxu0 %v5995_v44  ;;  %3239 = vst [vmem:[#allocation2 + $0xa0] sm:$0xff] %v8184_v43  ;;  %v8191_v46 = vmax.f32 %v3178_v7, 0.0 }
 0x441   : > { %v3330_v11 = vmax.f32 %v8143_v24, %v3298_v20  ;;  %v3331_v28 = vmax.f32 %v8160_v17, %v3299_v62  ;;  %v3398_v38 = vmax.f32 %v3362_v41, %v3298_v20  ;;  %v3399_v19 = vmax.f32 %v3363_v9, %v3299_v62  ;;  %5998 = vmatprep.subr.bf16.mxu0 %v5997_v0  ;;  %v5616_v40 = vpop.f32.mrb[56].mxu1  ;;  %v4540_v52 = vld [vmem:[#allocation3 + $0x40] ss:$0 sm:$0xff] }
 0x442   : > { %v8193_v50 = vmax.f32 %v3177_v51, 0.0  ;;  %v3180_v53 = vadd.f32 %v5616_v40, %v8103_v8  ;;  %v3077_v26 = vpop.f32.mrb[57].mxu1  ;;  %3931 = vmatprep.mubr.f32.mxu0 %v4540_v52  ;;  %3242 = vst [vmem:[#allocation2 + $0xb8] sm:$0xff] %v8191_v46  ;;  %v6011_v62 = vpack.c.bf16 %v3590_v14, %v3588_v42  ;;  %v3597_v40 = vld [vmem:[#allocation11 + $0x328] sm:$0xff]  ;;  %v3599_v52 = vld [vmem:[#allocation11 + $0x338] sm:$0xff] }
 0x443   : > { %3430 = vst [vmem:[#allocation3 + $0x58] sm:$0xff] %v3398_v38  ;;  %3431 = vst [vmem:[#allocation3 + $0x60] sm:$0xff] %v3399_v19  ;;  %v3366_v59 = vmax.f32 %v3330_v11, %v8167_v63  ;;  %v3300_v24 = vld [vmem:[#allocation2 + $0x8a] sm:$0xff]  ;;  %v3301_v22 = vld [vmem:[#allocation2 + $0x92] sm:$0xff]  ;;  %v3367_v17 = vmax.f32 %v3331_v28, %v8184_v43  ;;  %v3179_v39 = vadd.f32 %v8103_v8, %v3077_v26 }
 0x444   : > { %v3332_v10 = vmax.f32 %v8154_v6, %v3300_v24  ;;  %v3333_v56 = vmax.f32 %v8169_v36, %v3301_v22  ;;  %v3400_v58 = vmax.f32 %v3364_v34, %v3300_v24  ;;  %v3401_v13 = vmax.f32 %v3365_v45, %v3301_v22  ;;  %3241 = vst [vmem:[#allocation2 + $0xb0] sm:$0xff] %v8193_v50  ;;  %v3593_v45 = vld [vmem:[#allocation11 + $0x308] sm:$0xff]  ;;  %v3592_v11 = vld [vmem:[#allocation11 + $0x300] sm:$0xff]  ;;  %v3607_v14 = vld [vmem:[#allocation11 + $0x378] sm:$0xff] }
 0x445   : > { %6000 = vmatpush1.bf16.msra.mxu0 %v5999_v54  ;;  %v8202_v23 = vmax.f32 %v3180_v53, 0.0  ;;  %v5619_v41 = vpop.f32.mrb[58].mxu1  ;;  %v8208_v30 = vmax.f32 %v3179_v39, 0.0  ;;  %v6013_v19 = vpack.c.bf16 %v3595_v18, %v3593_v45  ;;  %v3606_v45 = vld [vmem:[#allocation11 + $0x370] sm:$0xff] }
 0x446   : > { %6002 = vmatprep.subr.bf16.mxu0 %v6001_v55  ;;  %3432 = vst [vmem:[#allocation3 + $0x68] sm:$0xff] %v3400_v58  ;;  %3433 = vst [vmem:[#allocation3 + $0x70] sm:$0xff] %v3401_v13  ;;  %v3368_v6 = vmax.f32 %v3332_v10, %v8178_v27  ;;  %v3369_v36 = vmax.f32 %v3333_v56, %v8193_v50  ;;  %v3182_v12 = vadd.f32 %v5619_v41, %v8103_v8  ;;  %v3087_v9 = vpop.f32.mrb[59].mxu1  ;;  %v3598_v58 = vld [vmem:[#allocation11 + $0x330] sm:$0xff] }
 0x447   : > { %3244 = vst [vmem:[#allocation2 + $0xc8] sm:$0xff] %v8202_v23  ;;  %v3302_v32 = vld [vmem:[#allocation2 + $0x9a] sm:$0xff]  ;;  %v3303_v44 = vld [vmem:[#allocation2 + $0xa2] sm:$0xff]  ;;  %v3181_v57 = vadd.f32 %v8103_v8, %v3087_v9  ;;  %3243 = vst [vmem:[#allocation2 + $0xc0] sm:$0xff] %v8208_v30  ;;  %v6015_v10 = vpack.c.bf16 %v3594_v16, %v3592_v11  ;;  %v6017_v56 = vpack.c.bf16 %v3599_v52, %v3597_v40 }
 0x448   : > { %v3334_v4 = vmax.f32 %v8167_v63, %v3302_v32  ;;  %v3335_v3 = vmax.f32 %v8184_v43, %v3303_v44  ;;  %v3402_v0 = vmax.f32 %v3366_v59, %v3302_v32  ;;  %v3403_v29 = vmax.f32 %v3367_v17, %v3303_v44  ;;  %v3596_v17 = vld [vmem:[#allocation11 + $0x320] sm:$0xff]  ;;  %v3384_v40 = vld [vmem:[#allocation2 + $0x10a] sm:$0xff] }
 0x449   : > { %6004 = vmatpush1.bf16.msra.mxu0 %v6003_v47  ;;  %v8215_v2 = vmax.f32 %v3182_v12, 0.0  ;;  %v8217_v1 = vmax.f32 %v3181_v57, 0.0  ;;  %v5622_v34 = vpop.f32.mrb[60].mxu1  ;;  %v3600_v44 = vld [vmem:[#allocation11 + $0x340] sm:$0xff] }
 0x44a   : > { %6006 = vmatprep.subr.bf16.mxu0 %v6005_v35  ;;  %3434 = vst [vmem:[#allocation3 + $0x78] sm:$0xff] %v3402_v0  ;;  %3435 = vst [vmem:[#allocation3 + $0x80] sm:$0xff] %v3403_v29  ;;  %v3370_v7 = vmax.f32 %v3334_v4, %v8191_v46  ;;  %v3371_v43 = vmax.f32 %v3335_v3, %v8208_v30  ;;  %v3184_v5 = vadd.f32 %v5622_v34, %v8103_v8  ;;  %v3097_v20 = vpop.f32.mrb[61].mxu1  ;;  %v3604_v3 = vld [vmem:[#allocation11 + $0x360] sm:$0xff] }
 0x44b   : > { %v3304_v33 = vld [vmem:[#allocation2 + $0xaa] sm:$0xff]  ;;  %v3305_v63 = vld [vmem:[#allocation2 + $0xb2] sm:$0xff]  ;;  %3246 = vst [vmem:[#allocation2 + $0xd8] sm:$0xff] %v8215_v2  ;;  %3245 = vst [vmem:[#allocation2 + $0xd0] sm:$0xff] %v8217_v1  ;;  %v3183_v38 = vadd.f32 %v8103_v8, %v3097_v20  ;;  %v6027_v11 = vpack.c.bf16 %v3606_v45, %v3604_v3 }
 0x44c   : > { %v3336_v51 = vmax.f32 %v8178_v27, %v3304_v33  ;;  %v3337_v54 = vmax.f32 %v8193_v50, %v3305_v63  ;;  %v3404_v55 = vmax.f32 %v3368_v6, %v3304_v33  ;;  %v3405_v49 = vmax.f32 %v3369_v36, %v3305_v63  ;;  %v3603_v6 = vld [vmem:[#allocation11 + $0x358] sm:$0xff]  ;;  %v3633_v45 = vld [vmem:[#allocation11 + $0x448] sm:$0xff] }
 0x44d   : > { %6008 = vmatpush1.bf16.msra.mxu0 %v6007_v15  ;;  %v8226_v28 = vmax.f32 %v3184_v5, 0.0  ;;  %v5625_v60 = vpop.f32.mrb[62].mxu1  ;;  %v3215_v59 = vmax.f32 %v3183_v38, 0.0  ;;  %v6021_v57 = vpack.c.bf16 %v3603_v6, %v3601_v21  ;;  %v3602_v15 = vld [vmem:[#allocation11 + $0x350] sm:$0xff]  ;;  %v3609_v5 = vld [vmem:[#allocation11 + $0x388] sm:$0xff]  ;;  %v3611_v20 = vld [vmem:[#allocation11 + $0x398] sm:$0xff] }
 0x44e   : > { %6010 = vmatprep.subr.bf16.mxu0 %v6009_v37  ;;  %3437 = vst [vmem:[#allocation3 + $0x90] sm:$0xff] %v3405_v49  ;;  %3436 = vst [vmem:[#allocation3 + $0x88] sm:$0xff] %v3404_v55  ;;  %v3372_v27 = vmax.f32 %v3336_v51, %v8202_v23  ;;  %v3373_v50 = vmax.f32 %v3337_v54, %v8217_v1  ;;  %v3186_v24 = vadd.f32 %v5625_v60, %v8103_v8  ;;  %v3107_v22 = vpop.f32.mrb[63].mxu1  ;;  %v3306_v53 = vld [vmem:[#allocation2 + $0xba] sm:$0xff]  ;;  %v3307_v26 = vld [vmem:[#allocation2 + $0xc2] sm:$0xff] }
 0x44f   : > { %3248 = vst [vmem:[#allocation2 + $0xe8] sm:$0xff] %v8226_v28  ;;  %v3185_v47 = vadd.f32 %v8103_v8, %v3107_v22  ;;  %v3338_v13 = vmax.f32 %v8191_v46, %v3306_v53  ;;  %v3339_v31 = vmax.f32 %v8208_v30, %v3307_v26  ;;  %v3406_v39 = vmax.f32 %v3370_v7, %v3306_v53  ;;  %v3605_v37 = vld [vmem:[#allocation11 + $0x368] sm:$0xff]  ;;  %v3385_v60 = vld [vmem:[#allocation2 + $0x112] sm:$0xff] }
 0x450   : > { %v3407_v35 = vmax.f32 %v3371_v43, %v3307_v26  ;;  %3247 = vst [vmem:[#allocation2 + $0xe0] sm:$0xff] %v3215_v59  ;;  %v8236_v61 = vmax.f32 %v3186_v24, 0.0  ;;  %v6019_v46 = vpack.c.bf16 %v3598_v58, %v3596_v17  ;;  %v6025_v34 = vpack.c.bf16 %v3607_v14, %v3605_v37  ;;  %v3383_v43 = vld [vmem:[#allocation2 + $0x102] sm:$0xff]  ;;  %v3608_v22 = vld [vmem:[#allocation11 + $0x380] sm:$0xff] }
 0x451   : > { %6012 = vmatpush1.bf16.msra.mxu0 %v6011_v62  ;;  %v8238_v25 = vmax.f32 %v3185_v47, 0.0  ;;  %3438 = vst [vmem:[#allocation3 + $0x98] sm:$0xff] %v3406_v39  ;;  %v3374_v8 = vmax.f32 %v3338_v13, %v8215_v2  ;;  %v3375_v12 = vmax.f32 %v3339_v31, %v3215_v59  ;;  %v6029_v24 = vpack.c.bf16 %v3611_v20, %v3609_v5  ;;  %v3610_v17 = vld [vmem:[#allocation11 + $0x390] sm:$0xff]  ;;  %v3624_v37 = vld [vmem:[#allocation11 + $0x400] sm:$0xff]  ;;  %v3637_v20 = vld [vmem:[#allocation11 + $0x468] sm:$0xff] }
 0x452   : > { %6014 = vmatprep.subr.bf16.mxu0 %v6013_v19  ;;  %3439 = vst [vmem:[#allocation3 + $0xa0] sm:$0xff] %v3407_v35  ;;  %v3308_v36 = vld [vmem:[#allocation2 + $0xca] sm:$0xff]  ;;  %v3309_v41 = vld [vmem:[#allocation2 + $0xd2] sm:$0xff]  ;;  %3250 = vst [vmem:[#allocation2 + $0xf8] sm:$0xff] %v8236_v61  ;;  %v6031_v31 = vpack.c.bf16 %v3610_v17, %v3608_v22 }
 0x453   : > { %v3340_v30 = vmax.f32 %v8202_v23, %v3308_v36  ;;  %v3341_v9 = vmax.f32 %v8217_v1, %v3309_v41  ;;  %v3408_v42 = vmax.f32 %v3372_v27, %v3308_v36  ;;  %v3409_v32 = vmax.f32 %v3373_v50, %v3309_v41  ;;  %3249 = vst [vmem:[#allocation2 + $0xf0] sm:$0xff] %v8238_v25  ;;  %v3612_v35 = vld [vmem:[#allocation11 + $0x3a0] sm:$0xff]  ;;  %v3618_v36 = vld [vmem:[#allocation11 + $0x3d0] sm:$0xff]  ;;  %v3621_v41 = vld [vmem:[#allocation11 + $0x3e8] sm:$0xff] }
 0x454   : > { %v6023_v1 = vpack.c.bf16 %v3602_v15, %v3600_v44  ;;  %v3627_v44 = vld [vmem:[#allocation11 + $0x418] sm:$0xff]  ;;  %v3626_v14 = vld [vmem:[#allocation11 + $0x410] sm:$0xff]  ;;  %v3649_v22 = vld [vmem:[#allocation11 + $0x4c8] sm:$0xff] }
 0x455   : > { %6016 = vmatpush1.bf16.msra.mxu0 %v6015_v10  ;;  %3440 = vst [vmem:[#allocation3 + $0xa8] sm:$0xff] %v3408_v42  ;;  %3441 = vst [vmem:[#allocation3 + $0xb0] sm:$0xff] %v3409_v32  ;;  %v3376_v4 = vmax.f32 %v3340_v30, %v8226_v28  ;;  %v3377_v23 = vmax.f32 %v3341_v9, %v8238_v25  ;;  %v3615_v10 = vld [vmem:[#allocation11 + $0x3b8] sm:$0xff]  ;;  %v3620_v9 = vld [vmem:[#allocation11 + $0x3e0] sm:$0xff]  ;;  %v6047_v3 = vpack.c.bf16 %v3626_v14, %v3624_v37 }
 0x456   : > { %6018 = vmatprep.subr.bf16.mxu0 %v6017_v56  ;;  %v3622_v42 = vld [vmem:[#allocation11 + $0x3f0] sm:$0xff]  ;;  %v3625_v32 = vld [vmem:[#allocation11 + $0x408] sm:$0xff]  ;;  %v3651_v17 = vld [vmem:[#allocation11 + $0x4d8] sm:$0xff] }
 0x457   : > { %v3310_v0 = vld [vmem:[#allocation2 + $0xda] sm:$0xff]  ;;  %v3311_v29 = vld [vmem:[#allocation2 + $0xe2] sm:$0xff]  ;;  %v6045_v15 = vpack.c.bf16 %v3627_v44, %v3625_v32 }
 0x458   : > { %v3342_v18 = vmax.f32 %v8215_v2, %v3310_v0  ;;  %v3343_v7 = vmax.f32 %v3215_v59, %v3311_v29  ;;  %v3410_v33 = vmax.f32 %v3374_v8, %v3310_v0  ;;  %v3411_v63 = vmax.f32 %v3375_v12, %v3311_v29  ;;  %v3386_v2 = vld [vmem:[#allocation2 + $0x11a] sm:$0xff]  ;;  %v3623_v12 = vld [vmem:[#allocation11 + $0x3f8] sm:$0xff]  ;;  %v3634_v5 = vld [vmem:[#allocation11 + $0x450] sm:$0xff] }
 0x459   : > { %6020 = vmatpush1.bf16.msra.mxu0 %v6019_v46  ;;  %v3314_v51 = vld [vmem:[#allocation2 + $0xfa] sm:$0xff]  ;;  %v6041_v30 = vpack.c.bf16 %v3623_v12, %v3621_v41  ;;  %v3666_v44 = vld [vmem:[#allocation11 + $0x550] sm:$0xff] }
 0x45a   : > { %6022 = vmatprep.subr.bf16.mxu0 %v6021_v57  ;;  %v3379_v62 = vmax.f32 %v3343_v7, %v8069_v48  ;;  %3442 = vst [vmem:[#allocation3 + $0xb8] sm:$0xff] %v3410_v33  ;;  %3443 = vst [vmem:[#allocation3 + $0xc0] sm:$0xff] %v3411_v63  ;;  %v3378_v54 = vmax.f32 %v3342_v18, %v8236_v61  ;;  %v3312_v55 = vld [vmem:[#allocation2 + $0xea] sm:$0xff]  ;;  %v3313_v49 = vld [vmem:[#allocation2 + $0xf2] sm:$0xff]  ;;  %v3346_v38 = vmax.f32 %v8236_v61, %v3314_v51 }
 0x45b   : > { %v3344_v19 = vmax.f32 %v8226_v28, %v3312_v55  ;;  %v3345_v16 = vmax.f32 %v8238_v25, %v3313_v49  ;;  %v3412_v52 = vmax.f32 %v3376_v4, %v3312_v55  ;;  %v3413_v59 = vmax.f32 %v3377_v23, %v3313_v49  ;;  %v3613_v28 = vld [vmem:[#allocation11 + $0x3a8] sm:$0xff]  ;;  %v3614_v61 = vld [vmem:[#allocation11 + $0x3b0] sm:$0xff]  ;;  %v3616_v8 = vld [vmem:[#allocation11 + $0x3c0] sm:$0xff] }
 0x45c   : > { %v3415_v27 = vmax.f32 %v3379_v62, %v3383_v43  ;;  %v3414_v50 = vmax.f32 %v3378_v54, %v3314_v51  ;;  %v3382_v53 = vmax.f32 %v3346_v38, %v8069_v48  ;;  %v6033_v39 = vpack.c.bf16 %v3615_v10, %v3613_v28  ;;  %v3617_v25 = vld [vmem:[#allocation11 + $0x3c8] sm:$0xff]  ;;  %v3631_v23 = vld [vmem:[#allocation11 + $0x438] sm:$0xff]  ;;  %v3628_v29 = vld [vmem:[#allocation11 + $0x420] sm:$0xff] }
 0x45d   : > { %6024 = vmatpush1.bf16.msra.mxu0 %v6023_v1  ;;  %v3380_v26 = vmax.f32 %v3344_v19, %v8069_v48  ;;  %v3381_v47 = vmax.f32 %v3345_v16, %v8069_v48  ;;  %3444 = vst [vmem:[#allocation3 + $0xc8] sm:$0xff] %v3412_v52  ;;  %3445 = vst [vmem:[#allocation3 + $0xd0] sm:$0xff] %v3413_v59  ;;  %v3619_v48 = vld [vmem:[#allocation11 + $0x3d8] sm:$0xff]  ;;  %v6035_v21 = vpack.c.bf16 %v3614_v61, %v3612_v35  ;;  %v3629_v4 = vld [vmem:[#allocation11 + $0x428] sm:$0xff] }
 0x45e   : > { %6026 = vmatprep.subr.bf16.mxu0 %v6025_v34  ;;  %3447 = vst [vmem:[#allocation3 + $0xe0] sm:$0xff] %v3415_v27  ;;  %3446 = vst [vmem:[#allocation3 + $0xd8] sm:$0xff] %v3414_v50  ;;  %v3418_v56 = vmax.f32 %v3382_v53, %v3386_v2  ;;  %v6037_v6 = vpack.c.bf16 %v3619_v48, %v3617_v25  ;;  %v6039_v46 = vpack.c.bf16 %v3618_v36, %v3616_v8  ;;  %v3630_v1 = vld [vmem:[#allocation11 + $0x430] sm:$0xff]  ;;  %v4539_v34 = vld [vmem:[#allocation3 + $0x8] ss:$0 sm:$0xff] }
 0x45f   : > { %v3416_v58 = vmax.f32 %v3380_v26, %v3384_v40  ;;  %v3417_v13 = vmax.f32 %v3381_v47, %v3385_v60  ;;  %v6043_v57 = vpack.c.bf16 %v3622_v42, %v3620_v9  ;;  %v6049_v0 = vpack.c.bf16 %v3631_v23, %v3629_v4  ;;  %v3635_v18 = vld [vmem:[#allocation11 + $0x458] sm:$0xff]  ;;  %v3632_v43 = vld [vmem:[#allocation11 + $0x440] sm:$0xff]  ;;  %v3638_v49 = vld [vmem:[#allocation11 + $0x470] sm:$0xff] }
 0x460   : > { %3450 = vst [vmem:[#allocation3 + $0xf8] sm:$0xff] %v3418_v56  ;;  %v4542_v7 = vld [vmem:[#allocation3 + $0x48] ss:$0 sm:$0xff]  ;;  %v6051_v33 = vpack.c.bf16 %v3630_v1, %v3628_v29  ;;  %v6053_v63 = vpack.c.bf16 %v3635_v18, %v3633_v45  ;;  %v6055_v51 = vpack.c.bf16 %v3634_v5, %v3632_v43  ;;  %v3636_v55 = vld [vmem:[#allocation11 + $0x460] sm:$0xff]  ;;  %v3642_v40 = vld [vmem:[#allocation11 + $0x490] sm:$0xff]  ;;  %v6069_v26 = vpack.c.bf16 %v3651_v17, %v3649_v22 }
 0x461   : > { %6028 = vmatpush1.bf16.msra.mxu0 %v6027_v11  ;;  %3448 = vst [vmem:[#allocation3 + $0xe8] sm:$0xff] %v3416_v58  ;;  %3449 = vst [vmem:[#allocation3 + $0xf0] sm:$0xff] %v3417_v13  ;;  %v3639_v62 = vld [vmem:[#allocation11 + $0x478] sm:$0xff]  ;;  %v3641_v11 = vld [vmem:[#allocation11 + $0x488] sm:$0xff]  ;;  %v6059_v2 = vpack.c.bf16 %v3638_v49, %v3636_v55 }
 0x462   : > { %6030 = vmatprep.subr.bf16.mxu0 %v6029_v24  ;;  %v6057_v54 = vpack.c.bf16 %v3639_v62, %v3637_v20  ;;  %v3643_v38 = vld [vmem:[#allocation11 + $0x498] sm:$0xff]  ;;  %v3640_v16 = vld [vmem:[#allocation11 + $0x480] sm:$0xff]  ;;  %v3645_v52 = vld [vmem:[#allocation11 + $0x4a8] sm:$0xff] }
 0x463   : > { %v6061_v19 = vpack.c.bf16 %v3643_v38, %v3641_v11  ;;  %v3647_v27 = vld [vmem:[#allocation11 + $0x4b8] sm:$0xff]  ;;  %v6063_v50 = vpack.c.bf16 %v3642_v40, %v3640_v16  ;;  %v3644_v59 = vld [vmem:[#allocation11 + $0x4a0] sm:$0xff]  ;;  %v3646_v24 = vld [vmem:[#allocation11 + $0x4b0] sm:$0xff] }
 0x464   : > { %v6065_v60 = vpack.c.bf16 %v3647_v27, %v3645_v52  ;;  %v6067_v53 = vpack.c.bf16 %v3646_v24, %v3644_v59  ;;  %v3648_v47 = vld [vmem:[#allocation11 + $0x4c0] sm:$0xff]  ;;  %v3650_v28 = vld [vmem:[#allocation11 + $0x4d0] sm:$0xff]  ;;  %v3653_v10 = vld [vmem:[#allocation11 + $0x4e8] sm:$0xff] }
 0x465   : > { %6032 = vmatpush1.bf16.msra.mxu0 %v6031_v31  ;;  %v3655_v56 = vld [vmem:[#allocation11 + $0x4f8] sm:$0xff]  ;;  %v6071_v58 = vpack.c.bf16 %v3650_v28, %v3648_v47  ;;  %v3652_v31 = vld [vmem:[#allocation11 + $0x4e0] sm:$0xff]  ;;  %v3657_v35 = vld [vmem:[#allocation11 + $0x508] sm:$0xff] }
 0x466   : > { %6034 = vmatprep.subr.bf16.mxu0 %v6033_v39  ;;  %v6073_v13 = vpack.c.bf16 %v3655_v56, %v3653_v10  ;;  %v3654_v39 = vld [vmem:[#allocation11 + $0x4f0] sm:$0xff]  ;;  %v3659_v61 = vld [vmem:[#allocation11 + $0x518] sm:$0xff]  ;;  %v3661_v8 = vld [vmem:[#allocation11 + $0x528] sm:$0xff] }
 0x467   : > { %v6075_v25 = vpack.c.bf16 %v3654_v39, %v3652_v31  ;;  %v6077_v48 = vpack.c.bf16 %v3659_v61, %v3657_v35  ;;  %v3663_v36 = vld [vmem:[#allocation11 + $0x538] sm:$0xff]  ;;  %v3665_v9 = vld [vmem:[#allocation11 + $0x548] sm:$0xff]  ;;  %v3664_v32 = vld [vmem:[#allocation11 + $0x540] sm:$0xff] }
 0x468   : > { %v6081_v12 = vpack.c.bf16 %v3663_v36, %v3661_v8  ;;  %v3667_v42 = vld [vmem:[#allocation11 + $0x558] sm:$0xff]  ;;  %v4153_v37 = vld [vmem:[#allocation14] sm:$0xff]  ;;  %v4154_v23 = vld [vmem:[#allocation14 + $0x8] sm:$0xff]  ;;  %v6087_v20 = vpack.c.bf16 %v3666_v44, %v3664_v32 }
 0x469   : > { %6036 = vmatpush1.bf16.msra.mxu0 %v6035_v21  ;;  %v3656_v21 = vld [vmem:[#allocation11 + $0x500] sm:$0xff]  ;;  %v6085_v29 = vpack.c.bf16 %v3667_v42, %v3665_v9  ;;  %v6207_v1 = vpack.c.bf16 %v4154_v23, %v4153_v37  ;;  %v4155_v45 = vld [vmem:[#allocation14 + $0x10] sm:$0xff]  ;;  %v4174_v43 = vld [vmem:[#allocation14 + $0xa8] sm:$0xff] }
 0x46a   : > { %6038 = vmatprep.subr.bf16.mxu0 %v6037_v6  ;;  %v3658_v6 = vld [vmem:[#allocation11 + $0x510] sm:$0xff]  ;;  %v4156_v18 = vld [vmem:[#allocation14 + $0x18] sm:$0xff]  ;;  %v4177_v17 = vld [vmem:[#allocation14 + $0xc0] sm:$0xff] }
 0x46b   : > { %v6079_v41 = vpack.c.bf16 %v3658_v6, %v3656_v21  ;;  %v6211_v5 = vpack.c.bf16 %v4156_v18, %v4155_v45  ;;  %v3668_v62 = vld [vmem:[#allocation11 + $0x560] sm:$0xff]  ;;  %v4158_v55 = vld [vmem:[#allocation14 + $0x28] sm:$0xff]  ;;  %v4175_v38 = vld [vmem:[#allocation14 + $0xb0] sm:$0xff] }
 0x46c   : > { %v3670_v11 = vld [vmem:[#allocation11 + $0x570] sm:$0xff]  ;;  %v3675_v16 = vld [vmem:[#allocation11 + $0x598] sm:$0xff]  ;;  %v3672_v27 = vld [vmem:[#allocation11 + $0x580] sm:$0xff] }
 0x46d   : > { %6040 = vmatpush1.bf16.msra.mxu0 %v6039_v46  ;;  %v3660_v46 = vld [vmem:[#allocation11 + $0x520] sm:$0xff]  ;;  %v6091_v52 = vpack.c.bf16 %v3670_v11, %v3668_v62  ;;  %v3674_v22 = vld [vmem:[#allocation11 + $0x590] sm:$0xff]  ;;  %v3679_v47 = vld [vmem:[#allocation11 + $0x5b8] sm:$0xff] }
 0x46e   : > { %6042 = vmatprep.subr.bf16.mxu0 %v6041_v30  ;;  %v3662_v30 = vld [vmem:[#allocation11 + $0x530] sm:$0xff]  ;;  %v4160_v59 = vld [vmem:[#allocation14 + $0x38] sm:$0xff]  ;;  %v6095_v10 = vpack.c.bf16 %v3674_v22, %v3672_v27  ;;  %v4181_v42 = vld [vmem:[#allocation14 + $0xe0] sm:$0xff] }
 0x46f   : > { %v6083_v14 = vpack.c.bf16 %v3662_v30, %v3660_v46  ;;  %v3676_v56 = vld [vmem:[#allocation11 + $0x5a0] sm:$0xff]  ;;  %v4162_v31 = vld [vmem:[#allocation14 + $0x48] sm:$0xff]  ;;  %v4179_v61 = vld [vmem:[#allocation14 + $0xd0] sm:$0xff] }
 0x470   : > { %v3678_v35 = vld [vmem:[#allocation11 + $0x5b0] sm:$0xff]  ;;  %v3683_v21 = vld [vmem:[#allocation11 + $0x5d8] sm:$0xff]  ;;  %v3680_v36 = vld [vmem:[#allocation11 + $0x5c0] sm:$0xff] }
 0x471   : > { %6044 = vmatpush1.bf16.msra.mxu0 %v6043_v57  ;;  %v4169_v57 = vld [vmem:[#allocation14 + $0x80] sm:$0xff]  ;;  %v6099_v8 = vpack.c.bf16 %v3678_v35, %v3676_v56  ;;  %v4164_v46 = vld [vmem:[#allocation14 + $0x58] sm:$0xff]  ;;  %v3682_v9 = vld [vmem:[#allocation11 + $0x5d0] sm:$0xff] }
 0x472   : > { %6046 = vmatprep.subr.bf16.mxu0 %v6045_v15  ;;  %v4170_v15 = vld [vmem:[#allocation14 + $0x88] sm:$0xff]  ;;  %v6103_v37 = vpack.c.bf16 %v3682_v9, %v3680_v36  ;;  %v4165_v23 = vld [vmem:[#allocation14 + $0x60] sm:$0xff]  ;;  %v3691_v18 = vld [vmem:[#allocation11 + $0x618] sm:$0xff] }
 0x473   : > { %v6205_v4 = vpack.c.bf16 %v4170_v15, %v4169_v57  ;;  %v4182_v32 = vld [vmem:[#allocation14 + $0xe8] sm:$0xff]  ;;  %v3687_v57 = vld [vmem:[#allocation11 + $0x5f8] sm:$0xff]  ;;  %v3696_v27 = vld [vmem:[#allocation11 + $0x640] sm:$0xff] }
 0x474   : > { %3932 = vmatmul.mubr.f32.vlgmr.msra.gmra.mrb[32].mxu0 %v4539_v34  ;;  %v3685_v44 = vld [vmem:[#allocation11 + $0x5e8] sm:$0xff]  ;;  %v3694_v11 = vld [vmem:[#allocation11 + $0x630] sm:$0xff]  ;;  %v3704_v56 = vld [vmem:[#allocation11 + $0x680] sm:$0xff] }
 0x475   : > { %6048 = vmatpush1.bf16.msra.mxu0 %v6047_v3  ;;  %4002 = vmatprep.mubr.f32.mxu0 %v4542_v7  ;;  %v4171_v3 = vld [vmem:[#allocation14 + $0x90] sm:$0xff]  ;;  %v4173_v7 = vld [vmem:[#allocation14 + $0xa0] sm:$0xff] }
 0x476   : > { %6050 = vmatprep.subr.bf16.mxu0 %v6049_v0  ;;  %v4172_v0 = vld [vmem:[#allocation14 + $0x98] sm:$0xff]  ;;  %6206 = vmatprep.subr.bf16.mxu1 %v6205_v4  ;;  %v6229_v4 = vpack.c.bf16 %v4182_v32, %v4181_v42  ;;  %v3689_v45 = vld [vmem:[#allocation11 + $0x608] sm:$0xff]  ;;  %v3718_v32 = vld [vmem:[#allocation11 + $0x6f0] sm:$0xff] }
 0x477   : > { %v6209_v34 = vpack.c.bf16 %v4172_v0, %v4171_v3  ;;  %6208 = vmatpush3.bf16.msra.mxu1 %v6207_v1  ;;  %v4166_v3 = vld [vmem:[#allocation14 + $0x68] sm:$0xff]  ;;  %v6105_v0 = vpack.c.bf16 %v3687_v57, %v3685_v44  ;;  %v4183_v1 = vld [vmem:[#allocation14 + $0xf0] sm:$0xff]  ;;  %v3712_v36 = vld [vmem:[#allocation11 + $0x6c0] sm:$0xff] }
 0x478   : > { %v3693_v62 = vld [vmem:[#allocation11 + $0x628] sm:$0xff]  ;;  %v3716_v42 = vld [vmem:[#allocation11 + $0x6e0] sm:$0xff]  ;;  %v3723_v57 = vld [vmem:[#allocation11 + $0x718] sm:$0xff] }
 0x479   : > { %6052 = vmatpush1.bf16.msra.mxu0 %v6051_v33  ;;  %v3669_v33 = vld [vmem:[#allocation11 + $0x568] sm:$0xff]  ;;  %6210 = vmatprep.subr.bf16.mxu1 %v6209_v34  ;;  %v4184_v34 = vld [vmem:[#allocation14 + $0xf8] sm:$0xff] }
 0x47a   : > { %6054 = vmatprep.subr.bf16.mxu0 %v6053_v63  ;;  %v3671_v63 = vld [vmem:[#allocation11 + $0x578] sm:$0xff]  ;;  %v3721_v44 = vld [vmem:[#allocation11 + $0x708] sm:$0xff] }
 0x47b   : > { %v6089_v49 = vpack.c.bf16 %v3671_v63, %v3669_v33  ;;  %6212 = vmatpush3.bf16.msra.mxu1 %v6211_v5  ;;  %v6233_v63 = vpack.c.bf16 %v4184_v34, %v4183_v1  ;;  %v3688_v5 = vld [vmem:[#allocation11 + $0x600] sm:$0xff]  ;;  %v3726_v34 = vld [vmem:[#allocation11 + $0x730] sm:$0xff] }
 0x47c   : > { %v3724_v1 = vld [vmem:[#allocation11 + $0x720] sm:$0xff] }
 0x47d   : > { %6056 = vmatpush1.bf16.msra.mxu0 %v6055_v51  ;;  %v6213_v51 = vpack.c.bf16 %v4174_v43, %v4173_v7  ;;  %v6231_v7 = vpack.c.bf16 %v4166_v3, %v4165_v23  ;;  %v6109_v43 = vpack.c.bf16 %v3691_v18, %v3689_v45  ;;  %v3725_v23 = vld [vmem:[#allocation11 + $0x728] sm:$0xff]  ;;  %v3727_v3 = vld [vmem:[#allocation11 + $0x738] sm:$0xff] }
 0x47e   : > { %6058 = vmatprep.subr.bf16.mxu0 %v6057_v54  ;;  %v4157_v54 = vld [vmem:[#allocation14 + $0x20] sm:$0xff]  ;;  %v3731_v18 = vld [vmem:[#allocation11 + $0x758] sm:$0xff] }
 0x47f   : > { %v6215_v40 = vpack.c.bf16 %v4158_v55, %v4157_v54  ;;  %6214 = vmatprep.subr.bf16.mxu1 %v6213_v51  ;;  %v3695_v51 = vld [vmem:[#allocation11 + $0x638] sm:$0xff]  ;;  %v3729_v45 = vld [vmem:[#allocation11 + $0x748] sm:$0xff] }
 0x480   : > { %v6113_v55 = vpack.c.bf16 %v3695_v51, %v3693_v62 }
 0x481   : > { %6060 = vmatpush1.bf16.msra.mxu0 %v6059_v2  ;;  %v4176_v2 = vld [vmem:[#allocation14 + $0xb8] sm:$0xff]  ;;  %6216 = vmatpush3.bf16.msra.mxu1 %v6215_v40 }
 0x482   : > { %6062 = vmatprep.subr.bf16.mxu0 %v6061_v19  ;;  %v3673_v19 = vld [vmem:[#allocation11 + $0x588] sm:$0xff] }
 0x483   : > { %v6093_v24 = vpack.c.bf16 %v3675_v16, %v3673_v19  ;;  %v3699_v19 = vld [vmem:[#allocation11 + $0x658] sm:$0xff] }
 0x484   : > { %v4544_v16 = vld [vmem:[#allocation3 + $0x84] ss:$0 sm:$0xff] }
 0x485   : > { %6064 = vmatpush1.bf16.msra.mxu0 %v6063_v50  ;;  %v6217_v50 = vpack.c.bf16 %v4176_v2, %v4175_v38  ;;  %v4541_v38 = vld [vmem:[#allocation3 + $0x44] ss:$0 sm:$0xff]  ;;  %v3697_v2 = vld [vmem:[#allocation11 + $0x648] sm:$0xff] }
 0x486   : > { %6066 = vmatprep.subr.bf16.mxu0 %v6065_v60  ;;  %v4159_v60 = vld [vmem:[#allocation14 + $0x30] sm:$0xff] }
 0x487   : > { %v6219_v28 = vpack.c.bf16 %v4160_v59, %v4159_v60  ;;  %6218 = vmatprep.subr.bf16.mxu1 %v6217_v50  ;;  %v3698_v50 = vld [vmem:[#allocation11 + $0x650] sm:$0xff]  ;;  %v3701_v60 = vld [vmem:[#allocation11 + $0x668] sm:$0xff]  ;;  %v3703_v59 = vld [vmem:[#allocation11 + $0x678] sm:$0xff] }
 0x488   : > { %v6121_v22 = vpack.c.bf16 %v3703_v59, %v3701_v60  ;;  %v3740_v60 = vld [vmem:[#allocation11 + $0x7a0] sm:$0xff]  ;;  %v3742_v59 = vld [vmem:[#allocation11 + $0x7b0] sm:$0xff] }
 0x489   : > { %6068 = vmatpush1.bf16.msra.mxu0 %v6067_v53  ;;  %v4178_v53 = vld [vmem:[#allocation14 + $0xc8] sm:$0xff]  ;;  %6220 = vmatpush3.bf16.msra.mxu1 %v6219_v28 }
 0x48a   : > { %6070 = vmatprep.subr.bf16.mxu0 %v6069_v26  ;;  %v3677_v26 = vld [vmem:[#allocation11 + $0x5a8] sm:$0xff] }
 0x48b   : > { %v6097_v39 = vpack.c.bf16 %v3679_v47, %v3677_v26  ;;  %v3705_v26 = vld [vmem:[#allocation11 + $0x688] sm:$0xff]  ;;  %v3707_v47 = vld [vmem:[#allocation11 + $0x698] sm:$0xff] }
 0x48d   : > { %6072 = vmatpush1.bf16.msra.mxu0 %v6071_v58  ;;  %v6221_v58 = vpack.c.bf16 %v4178_v53, %v4177_v17  ;;  %v3700_v17 = vld [vmem:[#allocation11 + $0x660] sm:$0xff]  ;;  %v3702_v53 = vld [vmem:[#allocation11 + $0x670] sm:$0xff] }
 0x48e   : > { %6074 = vmatprep.subr.bf16.mxu0 %v6073_v13  ;;  %v4161_v13 = vld [vmem:[#allocation14 + $0x40] sm:$0xff]  ;;  %v6123_v28 = vpack.c.bf16 %v3702_v53, %v3700_v17  ;;  %v6163_v17 = vpack.c.bf16 %v3742_v59, %v3740_v60  ;;  %v4545_v59 = vld [vmem:[#allocation3 + $0x88] ss:$0 sm:$0xff] }
 0x48f   : > { %v6223_v6 = vpack.c.bf16 %v4162_v31, %v4161_v13  ;;  %6222 = vmatprep.subr.bf16.mxu1 %v6221_v58  ;;  %v3706_v58 = vld [vmem:[#allocation11 + $0x690] sm:$0xff]  ;;  %v3709_v13 = vld [vmem:[#allocation11 + $0x6a8] sm:$0xff]  ;;  %v3711_v31 = vld [vmem:[#allocation11 + $0x6b8] sm:$0xff] }
 0x490   : > { %v6129_v35 = vpack.c.bf16 %v3711_v31, %v3709_v13  ;;  %v3748_v13 = vld [vmem:[#allocation11 + $0x7e0] sm:$0xff]  ;;  %v3750_v31 = vld [vmem:[#allocation11 + $0x7f0] sm:$0xff] }
 0x491   : > { %6076 = vmatpush1.bf16.msra.mxu0 %v6075_v25  ;;  %v4180_v25 = vld [vmem:[#allocation14 + $0xd8] sm:$0xff]  ;;  %6224 = vmatpush3.bf16.msra.mxu1 %v6223_v6 }
 0x492   : > { %6078 = vmatprep.subr.bf16.mxu0 %v6077_v48  ;;  %v3681_v48 = vld [vmem:[#allocation11 + $0x5c8] sm:$0xff] }
 0x493   : > { %v6101_v30 = vpack.c.bf16 %v3683_v21, %v3681_v48  ;;  %v3713_v48 = vld [vmem:[#allocation11 + $0x6c8] sm:$0xff]  ;;  %v3715_v21 = vld [vmem:[#allocation11 + $0x6d8] sm:$0xff] }
 0x495   : > { %6080 = vmatpush1.bf16.msra.mxu0 %v6079_v41  ;;  %v6225_v41 = vpack.c.bf16 %v4180_v25, %v4179_v61  ;;  %v3708_v61 = vld [vmem:[#allocation11 + $0x6a0] sm:$0xff]  ;;  %v3710_v25 = vld [vmem:[#allocation11 + $0x6b0] sm:$0xff] }
 0x496   : > { %6082 = vmatprep.subr.bf16.mxu0 %v6081_v12  ;;  %v4163_v12 = vld [vmem:[#allocation14 + $0x50] sm:$0xff]  ;;  %v6131_v6 = vpack.c.bf16 %v3710_v25, %v3708_v61  ;;  %v6171_v61 = vpack.c.bf16 %v3750_v31, %v3748_v13 }
 0x497   : > { %v6227_v15 = vpack.c.bf16 %v4164_v46, %v4163_v12  ;;  %6226 = vmatprep.subr.bf16.mxu1 %v6225_v41  ;;  %v3714_v41 = vld [vmem:[#allocation11 + $0x6d0] sm:$0xff]  ;;  %v3717_v12 = vld [vmem:[#allocation11 + $0x6e8] sm:$0xff]  ;;  %v3719_v46 = vld [vmem:[#allocation11 + $0x6f8] sm:$0xff] }
 0x498   : > { %v6137_v9 = vpack.c.bf16 %v3719_v46, %v3717_v12  ;;  %v3756_v12 = vld [vmem:[#allocation11 + $0x820] sm:$0xff]  ;;  %v3758_v46 = vld [vmem:[#allocation11 + $0x830] sm:$0xff] }
 0x499   : > { %6084 = vmatpush1.bf16.msra.mxu0 %v6083_v14  ;;  %v3684_v14 = vld [vmem:[#allocation11 + $0x5e0] sm:$0xff]  ;;  %6228 = vmatpush3.bf16.msra.mxu1 %v6227_v15  ;;  %v6139_v15 = vpack.c.bf16 %v3718_v32, %v3716_v42  ;;  %v3763_v42 = vld [vmem:[#allocation11 + $0x858] sm:$0xff]  ;;  %v6179_v32 = vpack.c.bf16 %v3758_v46, %v3756_v12 }
 0x49a   : > { %6086 = vmatprep.subr.bf16.mxu0 %v6085_v29  ;;  %v3686_v29 = vld [vmem:[#allocation11 + $0x5f0] sm:$0xff]  ;;  %6230 = vmatprep.subr.bf16.mxu1 %v6229_v4  ;;  %v4267_v46 = vld [vmem:[#allocation17 + $0x20] sm:$0xff] }
 0x49b   : > { %v6107_v33 = vpack.c.bf16 %v3686_v29, %v3684_v14  ;;  %v3720_v14 = vld [vmem:[#allocation11 + $0x700] sm:$0xff]  ;;  %v3722_v4 = vld [vmem:[#allocation11 + $0x710] sm:$0xff]  ;;  %v6145_v29 = vpack.c.bf16 %v3727_v3, %v3725_v23 }
 0x49d   : > { %6088 = vmatpush1.bf16.msra.mxu0 %v6087_v20  ;;  %v3690_v20 = vld [vmem:[#allocation11 + $0x610] sm:$0xff]  ;;  %6232 = vmatpush3.bf16.msra.mxu1 %v6231_v7  ;;  %v6147_v7 = vpack.c.bf16 %v3726_v34, %v3724_v1  ;;  %v3769_v1 = vld [vmem:[#allocation11 + $0x888] sm:$0xff]  ;;  %v3771_v34 = vld [vmem:[#allocation11 + $0x898] sm:$0xff] }
 0x49e   : > { %6090 = vmatprep.subr.bf16.mxu0 %v6089_v49  ;;  %v6111_v54 = vpack.c.bf16 %v3690_v20, %v3688_v5  ;;  %6234 = vmatprep.subr.bf16.mxu1 %v6233_v63  ;;  %v3692_v49 = vld [vmem:[#allocation11 + $0x620] sm:$0xff]  ;;  %v3733_v5 = vld [vmem:[#allocation11 + $0x768] sm:$0xff]  ;;  %v3735_v20 = vld [vmem:[#allocation11 + $0x778] sm:$0xff] }
 0x49f   : > { %v6115_v40 = vpack.c.bf16 %v3694_v11, %v3692_v49  ;;  %v3728_v63 = vld [vmem:[#allocation11 + $0x740] sm:$0xff]  ;;  %v6153_v51 = vpack.c.bf16 %v3735_v20, %v3733_v5  ;;  %v3737_v49 = vld [vmem:[#allocation11 + $0x788] sm:$0xff]  ;;  %v3739_v11 = vld [vmem:[#allocation11 + $0x798] sm:$0xff] }
 0x4a1   : > { %6092 = vmatpush1.bf16.msra.mxu0 %v6091_v52  ;;  %v6117_v52 = vpack.c.bf16 %v3699_v19, %v3697_v2  ;;  %v6157_v2 = vpack.c.bf16 %v3739_v11, %v3737_v49  ;;  %v3736_v19 = vld [vmem:[#allocation11 + $0x780] sm:$0xff] }
 0x4a2   : > { %6094 = vmatprep.subr.bf16.mxu0 %v6093_v24  ;;  %v6119_v24 = vpack.c.bf16 %v3698_v50, %v3696_v27 }
 0x4a5   : > { %6096 = vmatpush1.bf16.msra.mxu0 %v6095_v10  ;;  %v6125_v10 = vpack.c.bf16 %v3707_v47, %v3705_v26  ;;  %v3744_v26 = vld [vmem:[#allocation11 + $0x7c0] sm:$0xff]  ;;  %v3746_v47 = vld [vmem:[#allocation11 + $0x7d0] sm:$0xff] }
 0x4a6   : > { %6098 = vmatprep.subr.bf16.mxu0 %v6097_v39  ;;  %v6127_v39 = vpack.c.bf16 %v3706_v58, %v3704_v56  ;;  %v6167_v56 = vpack.c.bf16 %v3746_v47, %v3744_v26  ;;  %v3786_v26 = vlaneseq }
 0x4a8   : > { %v3787_v47 = vshrl.u32 %v3786_v26, 7 }
 0x4a9   : > { %6100 = vmatpush1.bf16.msra.mxu0 %v6099_v8  ;;  %v6133_v8 = vpack.c.bf16 %v3715_v21, %v3713_v48  ;;  %v3752_v48 = vld [vmem:[#allocation11 + $0x800] sm:$0xff]  ;;  %v3754_v21 = vld [vmem:[#allocation11 + $0x810] sm:$0xff] }
 0x4aa   : > { %6102 = vmatprep.subr.bf16.mxu0 %v6101_v30  ;;  %v6135_v30 = vpack.c.bf16 %v3714_v41, %v3712_v36  ;;  %v6175_v36 = vpack.c.bf16 %v3754_v21, %v3752_v48 }
 0x4ad   : > { %6104 = vmatpush1.bf16.msra.mxu0 %v6103_v37  ;;  %v6141_v37 = vpack.c.bf16 %v3723_v57, %v3721_v44  ;;  %v8256_v44 = vld [vmem:[#allocation2 + $0x100] sm:$0xff] }
 0x4ae   : > { %6106 = vmatprep.subr.bf16.mxu0 %v6105_v0  ;;  %v6143_v0 = vpack.c.bf16 %v3722_v4, %v3720_v14  ;;  %v3765_v14 = vld [vmem:[#allocation11 + $0x868] sm:$0xff]  ;;  %v3767_v4 = vld [vmem:[#allocation11 + $0x878] sm:$0xff] }
 0x4af   : > { %v6185_v3 = vpack.c.bf16 %v3767_v4, %v3765_v14  ;;  %v4273_v4 = vld [vmem:[#allocation17 + $0x50] sm:$0xff] }
 0x4b1   : > { %6108 = vmatpush1.bf16.msra.mxu0 %v6107_v33  ;;  %v6149_v33 = vpack.c.bf16 %v3731_v18, %v3729_v45  ;;  %v6189_v18 = vpack.c.bf16 %v3771_v34, %v3769_v1  ;;  %v4277_v34 = vld [vmem:[#allocation17 + $0x70] sm:$0xff] }
 0x4b2   : > { %6110 = vmatprep.subr.bf16.mxu0 %v6109_v43  ;;  %v3730_v43 = vld [vmem:[#allocation11 + $0x750] sm:$0xff] }
 0x4b3   : > { %v6151_v62 = vpack.c.bf16 %v3730_v43, %v3728_v63  ;;  %v3773_v63 = vld [vmem:[#allocation11 + $0x8a8] sm:$0xff]  ;;  %v3775_v43 = vld [vmem:[#allocation11 + $0x8b8] sm:$0xff] }
 0x4b4   : > { %4003 = vmatmul.mubr.f32.vlgmr.msra.gmra.mrb[32].mxu0 %v4541_v38  ;;  %v6193_v20 = vpack.c.bf16 %v3775_v43, %v3773_v63 }
 0x4b5   : > { %6112 = vmatpush1.bf16.msra.mxu0 %v6111_v54  ;;  %4073 = vmatprep.mubr.f32.mxu0 %v4544_v16  ;;  %v3732_v54 = vld [vmem:[#allocation11 + $0x760] sm:$0xff]  ;;  %v3738_v16 = vld [vmem:[#allocation11 + $0x790] sm:$0xff] }
 0x4b6   : > { %6114 = vmatprep.subr.bf16.mxu0 %v6113_v55  ;;  %v3734_v55 = vld [vmem:[#allocation11 + $0x770] sm:$0xff]  ;;  %v6159_v27 = vpack.c.bf16 %v3738_v16, %v3736_v19  ;;  %v3781_v19 = vld [vmem:[#allocation11 + $0x8e8] sm:$0xff]  ;;  %v3783_v16 = vld [vmem:[#allocation11 + $0x8f8] sm:$0xff] }
 0x4b7   : > { %v6155_v38 = vpack.c.bf16 %v3734_v55, %v3732_v54  ;;  %v3777_v54 = vld [vmem:[#allocation11 + $0x8c8] sm:$0xff]  ;;  %v3779_v55 = vld [vmem:[#allocation11 + $0x8d8] sm:$0xff] }
 0x4b8   : > { %v6197_v11 = vpack.c.bf16 %v3779_v55, %v3777_v54 }
 0x4b9   : > { %6116 = vmatpush1.bf16.msra.mxu0 %v6115_v40  ;;  %v3741_v40 = vld [vmem:[#allocation11 + $0x7a8] sm:$0xff] }
 0x4ba   : > { %6118 = vmatprep.subr.bf16.mxu0 %v6117_v52  ;;  %v3743_v52 = vld [vmem:[#allocation11 + $0x7b8] sm:$0xff] }
 0x4bb   : > { %v6161_v50 = vpack.c.bf16 %v3743_v52, %v3741_v40  ;;  %v6201_v52 = vpack.c.bf16 %v3783_v16, %v3781_v19 }
 0x4bd   : > { %6120 = vmatpush1.bf16.msra.mxu0 %v6119_v24  ;;  %v3745_v24 = vld [vmem:[#allocation11 + $0x7c8] sm:$0xff] }
 0x4be   : > { %6122 = vmatprep.subr.bf16.mxu0 %v6121_v22  ;;  %v3747_v22 = vld [vmem:[#allocation11 + $0x7d8] sm:$0xff] }
 0x4bf   : > { %v6165_v53 = vpack.c.bf16 %v3747_v22, %v3745_v24  ;;  %v4167_v24 = vld [vmem:[#allocation14 + $0x70] sm:$0xff]  ;;  %v4168_v22 = vld [vmem:[#allocation14 + $0x78] sm:$0xff] }
 0x4c1   : > { %6124 = vmatpush1.bf16.msra.mxu0 %v6123_v28  ;;  %v3749_v28 = vld [vmem:[#allocation11 + $0x7e8] sm:$0xff] }
 0x4c2   : > { %6126 = vmatprep.subr.bf16.mxu0 %v6125_v10  ;;  %v3751_v10 = vld [vmem:[#allocation11 + $0x7f8] sm:$0xff] }
 0x4c3   : > { %v6169_v58 = vpack.c.bf16 %v3751_v10, %v3749_v28  ;;  %v3788_v28 = vsub.s32 0, %v3787_v47  ;;  %v3784_v10 = vld [vmem:[#allocation12] sm:$0x3] }
 0x4c5   : > { %6128 = vmatpush1.bf16.msra.mxu0 %v6127_v39  ;;  %v3753_v39 = vld [vmem:[#allocation11 + $0x808] sm:$0xff] }
 0x4c6   : > { %6130 = vmatprep.subr.bf16.mxu0 %v6129_v35  ;;  %v3755_v35 = vld [vmem:[#allocation11 + $0x818] sm:$0xff] }
 0x4c7   : > { %v6173_v25 = vpack.c.bf16 %v3755_v35, %v3753_v39 }
 0x4c9   : > { %6132 = vmatpush1.bf16.msra.mxu0 %v6131_v6  ;;  %v3757_v6 = vld [vmem:[#allocation11 + $0x828] sm:$0xff] }
 0x4ca   : > { %6134 = vmatprep.subr.bf16.mxu0 %v6133_v8  ;;  %v3759_v8 = vld [vmem:[#allocation11 + $0x838] sm:$0xff] }
 0x4cb   : > { %v6177_v41 = vpack.c.bf16 %v3759_v8, %v3757_v6 }
 0x4cd   : > { %6136 = vmatpush1.bf16.msra.mxu0 %v6135_v30  ;;  %v4543_v30 = vld [vmem:[#allocation3 + $0x80] ss:$0 sm:$0xff] }
 0x4ce   : > { %6138 = vmatprep.subr.bf16.mxu0 %v6137_v9  ;;  %v3761_v9 = vld [vmem:[#allocation11 + $0x848] sm:$0xff] }
 0x4cf   : > { %v6181_v57 = vpack.c.bf16 %v3763_v42, %v3761_v9  ;;  %v4269_v42 = vld [vmem:[#allocation17 + $0x30] sm:$0xff] }
 0x4d1   : > { %6140 = vmatpush1.bf16.msra.mxu0 %v6139_v15  ;;  %v3760_v15 = vld [vmem:[#allocation11 + $0x840] sm:$0xff] }
 0x4d2   : > { %6142 = vmatprep.subr.bf16.mxu0 %v6141_v37  ;;  %v3762_v37 = vld [vmem:[#allocation11 + $0x850] sm:$0xff] }
 0x4d3   : > { %v6183_v23 = vpack.c.bf16 %v3762_v37, %v3760_v15  ;;  %v4271_v15 = vld [vmem:[#allocation17 + $0x40] sm:$0xff]  ;;  %v4272_v37 = vld [vmem:[#allocation17 + $0x48] sm:$0xff] }
 0x4d4   : > { %v6250_v14 = vpack.c.bf16 %v4272_v37, %v4271_v15 }
 0x4d5   : > { %6144 = vmatpush1.bf16.msra.mxu0 %v6143_v0  ;;  %v3764_v0 = vld [vmem:[#allocation11 + $0x860] sm:$0xff] }
 0x4d6   : > { %6146 = vmatprep.subr.bf16.mxu0 %v6145_v29  ;;  %v3766_v29 = vld [vmem:[#allocation11 + $0x870] sm:$0xff] }
 0x4d7   : > { %v6187_v45 = vpack.c.bf16 %v3766_v29, %v3764_v0  ;;  %v4275_v0 = vld [vmem:[#allocation17 + $0x60] sm:$0xff]  ;;  %v4276_v29 = vld [vmem:[#allocation17 + $0x68] sm:$0xff] }
 0x4d8   : > { %v6256_v1 = vpack.c.bf16 %v4276_v29, %v4275_v0 }
 0x4d9   : > { %6148 = vmatpush1.bf16.msra.mxu0 %v6147_v7  ;;  %v3768_v7 = vld [vmem:[#allocation11 + $0x880] sm:$0xff] }
 0x4da   : > { %6150 = vmatprep.subr.bf16.mxu0 %v6149_v33  ;;  %v3770_v33 = vld [vmem:[#allocation11 + $0x890] sm:$0xff] }
 0x4db   : > { %v6191_v5 = vpack.c.bf16 %v3770_v33, %v3768_v7  ;;  %v4546_v33 = vld [vmem:[#allocation15] ss:$0 sm:$0xff] }
 0x4dd   : > { %6152 = vmatpush1.bf16.msra.mxu0 %v6151_v62  ;;  %v3772_v62 = vld [vmem:[#allocation11 + $0x8a0] sm:$0xff] }
 0x4de   : > { %6154 = vmatprep.subr.bf16.mxu0 %v6153_v51  ;;  %v3774_v51 = vld [vmem:[#allocation11 + $0x8b0] sm:$0xff] }
 0x4df   : > { %v6195_v49 = vpack.c.bf16 %v3774_v51, %v3772_v62  ;;  %v4547_v62 = vld [vmem:[#allocation18] ss:$0 sm:$0xff] }
 0x4e1   : > { %6156 = vmatpush1.bf16.msra.mxu0 %v6155_v38  ;;  %v3776_v38 = vld [vmem:[#allocation11 + $0x8c0] sm:$0xff] }
 0x4e2   : > { %6158 = vmatprep.subr.bf16.mxu0 %v6157_v2  ;;  %v3778_v2 = vld [vmem:[#allocation11 + $0x8d0] sm:$0xff] }
 0x4e3   : > { %v6199_v40 = vpack.c.bf16 %v3778_v2, %v3776_v38 }
 0x4e5   : > { %6160 = vmatpush1.bf16.msra.mxu0 %v6159_v27  ;;  %v3780_v27 = vld [vmem:[#allocation11 + $0x8e0] sm:$0xff] }
 0x4e6   : > { %6162 = vmatprep.subr.bf16.mxu0 %v6161_v50  ;;  %v3782_v50 = vld [vmem:[#allocation11 + $0x8f0] sm:$0xff] }
 0x4e7   : > { %v6203_v60 = vpack.c.bf16 %v3782_v50, %v3780_v27 }
 0x4e9   : > { %6164 = vmatpush1.bf16.msra.mxu0 %v6163_v17  ;;  %v6235_v17 = vpack.c.bf16 %v4168_v22, %v4167_v24 }
 0x4ea   : > { %6166 = vmatprep.subr.bf16.mxu0 %v6165_v53  ;;  %v6925_v53 = vmov 0.0|0.0  }
 0x4eb   : > { %6236 = vmatpush3.bf16.msra.mxu1 %v6235_v17 }
 0x4ec   : > { %6237 = vmatprep.subr.bf16.mxu1 %v6925_v53 }
 0x4ed   : > { %6168 = vmatpush1.bf16.msra.mxu0 %v6167_v56  ;;  %v3792_v56 = vsub.s32 1, %v3787_v47 }
 0x4ee   : > { %6170 = vmatprep.subr.bf16.mxu0 %v6169_v58  ;;  %v3789_v58 = vrot.slane %v3784_v10, %v3788_v28 }
 0x4ef   : > { %v3793_v13 = vrot.slane %v3784_v10, %v3792_v56 }
 0x4f1   : > { %6172 = vmatpush1.bf16.msra.mxu0 %v6171_v61  ;;  %v4263_v61 = vld [vmem:[#allocation17] sm:$0xff] }
 0x4f2   : > { %6174 = vmatprep.subr.bf16.mxu0 %v6173_v25  ;;  %v4264_v25 = vld [vmem:[#allocation17 + $0x8] sm:$0xff] }
 0x4f3   : > { %v6238_v6 = vpack.c.bf16 %v4264_v25, %v4263_v61 }
 0x4f4   : > { %4074 = vmatmul.mubr.f32.vlgmr.msra.gmra.mrb[32].mxu0 %v4543_v30  ;;  %v4268_v30 = vld [vmem:[#allocation17 + $0x28] sm:$0xff] }
 0x4f5   : > { %6176 = vmatpush1.bf16.msra.mxu0 %v6175_v36  ;;  %4144 = vmatprep.mubr.f32.mxu0 %v8256_v44  ;;  %v4265_v36 = vld [vmem:[#allocation17 + $0x10] sm:$0xff]  ;;  %v6244_v9 = vpack.c.bf16 %v4268_v30, %v4267_v46 }
 0x4f6   : > { %6178 = vmatprep.subr.bf16.mxu0 %v6177_v41  ;;  %v4266_v41 = vld [vmem:[#allocation17 + $0x18] sm:$0xff] }
 0x4f7   : > { %v6241_v12 = vpack.c.bf16 %v4266_v41, %v4265_v36 }
 0x4f9   : > { %6180 = vmatpush1.bf16.msra.mxu0 %v6179_v32  ;;  %v4270_v32 = vld [vmem:[#allocation17 + $0x38] sm:$0xff] }
 0x4fa   : > { %6182 = vmatprep.subr.bf16.mxu0 %v6181_v57  ;;  %v6247_v57 = vpack.c.bf16 %v4270_v32, %v4269_v42 }
 0x4fd   : > { %6184 = vmatpush1.bf16.msra.mxu0 %v6183_v23  ;;  %v4274_v23 = vld [vmem:[#allocation17 + $0x58] sm:$0xff] }
 0x4fe   : > { %6186 = vmatprep.subr.bf16.mxu0 %v6185_v3  ;;  %v6253_v3 = vpack.c.bf16 %v4274_v23, %v4273_v4 }
 0x501   : > { %6188 = vmatpush1.bf16.msra.mxu0 %v6187_v45  ;;  %v4278_v45 = vld [vmem:[#allocation17 + $0x78] sm:$0xff] }
 0x502   : > { %6190 = vmatprep.subr.bf16.mxu0 %v6189_v18  ;;  %v6259_v18 = vpack.c.bf16 %v4278_v45, %v4277_v34 }
 0x505   : > { %6192 = vmatpush1.bf16.msra.mxu0 %v6191_v5 }
 0x506   : > { %6194 = vmatprep.subr.bf16.mxu0 %v6193_v20 }
 0x509   : > { %6196 = vmatpush1.bf16.msra.mxu0 %v6195_v49 }
 0x50a   : > { %6198 = vmatprep.subr.bf16.mxu0 %v6197_v11 }
 0x50d   : > { %6200 = vmatpush1.bf16.msra.mxu0 %v6199_v40 }
 0x50e   : > { %6202 = vmatprep.subr.bf16.mxu0 %v6201_v52 }
 0x511   : > { %6204 = vmatpush1.bf16.msra.mxu0 %v6203_v60 }
 0x514   : > { %4145 = vmatmul.mubr.f32.vlgmr.msra.gmra.mrb[32].mxu0 %v4545_v59 }
 0x5e7   : > { %v4146_v31 = vpop.f32.mrb[32].mxu0 }
 0x5e8   : > { %v6309_v39 = vadd.f32 %v4146_v31, %v3789_v58  ;;  %v4148_v35 = vpop.f32.mrb[33].mxu0 }
 0x5e9   : > { %v6310_v48 = vadd.f32 %v4148_v35, %v3793_v13 }
 0x5ea   : > { %v4151_v8 = vmax.f32 %v6309_v39, 0.0 }
 0x5eb   : > { %v4152_v21 = vmax.f32 %v6310_v48, 0.0 }
 0x5ed   : > { %4256 = vmatprep.mubr.f32.mxu1 %v4152_v21 }
 0x5ee   : > { %4257 = vmatmul.mubr.f32.vlgmr.msra.gmra.mrb[64].mxu1 %v4151_v8 }
 0x5ef   : > { %6239 = vmatpush3.bf16.msra.mxu1 %v6238_v6  ;;  %5658 = vmatprep.mubr.msk.f32.mxu1 %vm6926_vm0, %v8256_v44 }
 0x5f0   : > { %6240 = vmatprep.subr.bf16.mxu1 %v6925_v53 }
 0x5f3   : > { %6242 = vmatpush3.bf16.msra.mxu1 %v6241_v12 }
 0x5f4   : > { %6243 = vmatprep.subr.bf16.mxu1 %v6925_v53 }
 0x5f7   : > { %6245 = vmatpush3.bf16.msra.mxu1 %v6244_v9 }
 0x5f8   : > { %6246 = vmatprep.subr.bf16.mxu1 %v6925_v53 }
 0x5fb   : > { %6248 = vmatpush3.bf16.msra.mxu1 %v6247_v57 }
 0x5fc   : > { %6249 = vmatprep.subr.bf16.mxu1 %v6925_v53 }
 0x5ff   : > { %6251 = vmatpush3.bf16.msra.mxu1 %v6250_v14 }
 0x600   : > { %6252 = vmatprep.subr.bf16.mxu1 %v6925_v53 }
 0x603   : > { %6254 = vmatpush3.bf16.msra.mxu1 %v6253_v3 }
 0x604   : > { %6255 = vmatprep.subr.bf16.mxu1 %v6925_v53 }
 0x607   : > { %6257 = vmatpush3.bf16.msra.mxu1 %v6256_v1 }
 0x608   : > { %6258 = vmatprep.subr.bf16.mxu1 %v6925_v53 }
 0x60b   : > { %6260 = vmatpush3.bf16.msra.mxu1 %v6259_v18 }
 0x6c1   : > { %v4966_v7 = vpop.f32.mrb[64].mxu1 }
 0x6c2   : > { %v4967_v63 = vpop.f32.mrb[65].mxu1 }
 0x6c3   : > { %v4968_v43 = vadd.f32 %v4967_v63, %v4966_v7 }
 0x6c5   : > { %v4259_v5 = vadd.f32 %v4968_v43, %v4546_v33 }
 0x6c7   : > { %v4262_v20 = vmax.f32 %v4259_v5, 0.0 }
 0x6c9   : > { %5659 = vmatmul.mubr.f32.vlgmr.msra.gmra.mrb[66].mxu1 %v4262_v20 }
 0x79c   : > { %v4352_v51 = vpop.f32.mrb[66].mxu1 }
 0x79d   : > { %v4353_v54 = vadd.f32 %v4547_v62, %v4352_v51  ;;  %v5660_v55 = vpop.f32.mrb[67].mxu1 }
 0x79f   : > { %4356 = vst [vmem:[%s520_s22] sm:$0xff] %v4353_v54 }
 0x7a0 PF: > { %s27_s17 = sadd.s32 1, %s6908_s17  }
 0x7a1   : > { %p24_p2 = scmp.ge.s32.totalorder %s27_s17, 4  }
 0x7a3   :  { %26 = sbr.rel (!%p24_p2) target bundleno = 6 (0x6), region = 141 }
 0x7aa   :  { %4376 = vsyncpa [#allocation5], 1 }
 0x7ab   :  { %4378 = vsyncpa [#allocation5 + $0x1], 1 }
 0x7ac   :  { %4379 = vsyncpa [#allocation7], 1 }
 0x7ad   :  { %4380 = vsyncpa [#allocation10], 1 }
 0x7ae   :  { %4381 = vsyncpa [#allocation13], 1 }
 0x7af   :  { %4382 = vsyncpa [#allocation16], 1 }
 0x7b0   :  { %4383 = vsyncpa [#allocation19], 1 }

</bundles_post_ra>
